<compile_context>
chip_gen: v6e
topology: v6e:2x2x1
jax: 0.10.0
libtpu: 0.0.40
codegen_flags: <defaults>
</compile_context>

<pallas_src>
import math
import numpy as np

import jax
import jax.numpy as jnp
from jax import lax
from jax.experimental import pallas as pl
from jax.experimental.pallas import tpu as pltpu

# ---- module hyper-parameters (small, consistent with BasicTransformerBlock) ----
DIM      = 32                 # query_dim
HEADS    = 4                  # n_heads
DHEAD    = 8                  # d_head
INNER    = HEADS * DHEAD      # 32
CTX_DIM  = 16                 # context_dim
FF_INNER = DIM * 4            # 128  (FeedForward mult=4, gated GEGLU)
B, N, M  = 2, 16, 8           # batch, query tokens, context tokens
EPS      = 1e-5               # nn.LayerNorm default eps
SCALE    = DHEAD ** -0.5

# rows of the (9, DIM) gain/bias slab
VEC_ORDER = ["n1g", "n1b", "n2g", "n2b", "n3g", "n3b", "bo1", "bo2", "ffb2"]
VEC_ROW = {k: i for i, k in enumerate(VEC_ORDER)}

# lane-dense (64, 128) weight slab layout:
#   rows  0:32  cols   0:96  = wq1 | wk1 | wv1   (fused self-attn QKV)
#   rows  0:32  cols  96:128 = wo1
#   rows 32:64  cols   0:32  = wq2
#   rows 32:64  cols  32:64  = wo2
#   rows 32:48  cols  64:128 = wk2 | wv2         (fused cross-attn KV), rows 48:64 zero pad


# ---------------------------- shared math helpers ----------------------------
def _layer_norm(x, g, b):
    # one-pass LN: compute E[x] and E[x^2] together; var = E[x^2] - E[x]^2
    mu = jnp.mean(x, axis=-1, keepdims=True)
    mu2 = jnp.mean(x * x, axis=-1, keepdims=True)
    var = mu2 - mu * mu
    return (x - mu) * lax.rsqrt(var + EPS) * g + b


def _erf(x):
    # Abramowitz & Stegun 7.1.26 (max abs err ~1.5e-7) built only from ops with
    # guaranteed Mosaic lowerings (abs / mul / add / exp / where).
    a1, a2, a3, a4, a5 = 0.254829592, -0.284496736, 1.421413741, -1.453152027, 1.061405429
    pp = 0.3275911
    ax = jnp.abs(x)
    t = 1.0 / (1.0 + pp * ax)
    poly = t * (a1 + t * (a2 + t * (a3 + t * (a4 + t * a5))))
    y = 1.0 - poly * jnp.exp(-ax * ax)
    return jnp.where(x >= 0.0, y, -y)


def _gelu_exact(x):
    # F.gelu default = exact (erf) GELU
    return 0.5 * x * (1.0 + _erf(x * (1.0 / math.sqrt(2.0))))


# ---------------------------- in-kernel attention -----------------------------
def _split_heads(t, n_tok):
    # (B*n_tok, HEADS*DHEAD) -> (B*HEADS, n_tok, DHEAD)   [einops '(b n)(h d)->(b h) n d']
    return (t.reshape(B, n_tok, HEADS, DHEAD)
             .transpose(0, 2, 1, 3)
             .reshape(B * HEADS, n_tok, DHEAD))


def _merge_heads(t, n_tok):
    # (B*HEADS, n_tok, DHEAD) -> (B*n_tok, HEADS*DHEAD)   [einops '(b h) n d->(b n)(h d)']
    return (t.reshape(B, HEADS, n_tok, DHEAD)
             .transpose(0, 2, 1, 3)
             .reshape(B * n_tok, HEADS * DHEAD))


def _fused_mha(q, k, v, n_q, n_kv):
    """q: (B*n_q, INNER), k/v: (B*n_kv, INNER)  ->  (B*n_q, INNER).

    All B*HEADS attention problems batched on one leading axis (single reshape/
    transpose, no per-head slicing); the softmax runs once on a flattened
    (B*H*n_q, n_kv) 2-D tensor (single max/exp/sum chain)."""
    qs, ks, vs = _split_heads(q, n_q), _split_heads(k, n_kv), _split_heads(v, n_kv)
    sim = jnp.einsum("bnd,bmd->bnm", qs, ks,
                     preferred_element_type=jnp.float32) * SCALE      # (B*H, n_q, n_kv)
    s2 = sim.reshape(B * HEADS * n_q, n_kv)                           # fold onto sublanes
    s2 = s2 - jnp.max(s2, axis=-1, keepdims=True)
    p = jnp.exp(s2)
    p = p / jnp.sum(p, axis=-1, keepdims=True)                        # exact softmax
    o = jnp.einsum("bnm,bmd->bnd", p.reshape(B * HEADS, n_q, n_kv), vs,
                   preferred_element_type=jnp.float32)                # (B*H, n_q, DHEAD)
    return _merge_heads(o, n_q)


# -------------------------------- Pallas kernel --------------------------------
def transformer_block_kernel(x_ref, ctx_ref, vec_ref, w_ref, ff1_ref, ffw2_ref, o_ref):
    def vec(name):                         # (1, DIM) gain / bias row, point-of-use read
        r = VEC_ROW[name]
        return vec_ref[r:r + 1, :]

    x = x_ref[...]                         # (B*N, DIM)
    ctx = ctx_ref[...]                     # (B*M, CTX_DIM)

    # ---- self-attention: x = attn1(norm1(x)) + x   (fused QKV projection) ----
    xn = _layer_norm(x, vec("n1g"), vec("n1b"))
    qkv = jnp.dot(xn, w_ref[0:DIM, 0:3 * INNER],
                  preferred_element_type=jnp.float32)                 # (B*N, 96)
    a = _fused_mha(qkv[:, 0:INNER], qkv[:, INNER:2 * INNER],
                   qkv[:, 2 * INNER:3 * INNER], N, N)                 # (B*N, INNER)
    x = jnp.dot(a, w_ref[0:INNER, 3 * INNER:4 * INNER],
                preferred_element_type=jnp.float32) + vec("bo1") + x

    # ---- cross-attention: x = attn2(norm2(x), context) + x  (fused KV projection) ----
    xn = _layer_norm(x, vec("n2g"), vec("n2b"))
    q = jnp.dot(xn, w_ref[DIM:2 * DIM, 0:INNER],
                preferred_element_type=jnp.float32)
    kv = jnp.dot(ctx, w_ref[DIM:DIM + CTX_DIM, 2 * INNER:4 * INNER],
                 preferred_element_type=jnp.float32)                  # (B*M, 64)
    a = _fused_mha(q, kv[:, 0:INNER], kv[:, INNER:2 * INNER], N, M)
    x = jnp.dot(a, w_ref[DIM:DIM + INNER, INNER:2 * INNER],
                preferred_element_type=jnp.float32) + vec("bo2") + x

    # ---- GEGLU feed-forward: x = ff(norm3(x)) + x ----
    xn = _layer_norm(x, vec("n3g"), vec("n3b"))
    h = jnp.dot(xn, ff1_ref[0:DIM, :],
                preferred_element_type=jnp.float32) + ff1_ref[DIM:DIM + 1, :]   # (B*N, 256)
    y = h[:, 0:FF_INNER] * _gelu_exact(h[:, FF_INNER:])
    x = jnp.dot(y, ffw2_ref[...],
                preferred_element_type=jnp.float32) + vec("ffb2") + x

    o_ref[...] = x


# --------------------------------- wrapper -------------------------------------
def _pack_params(p):
    vec_slab = jnp.concatenate([p[k] for k in VEC_ORDER], axis=0)                # (9, DIM)
    blk0 = jnp.concatenate([p["wq1"], p["wk1"], p["wv1"], p["wo1"]], axis=1)     # (32, 128)
    kv2 = jnp.concatenate([p["wk2"], p["wv2"]], axis=1)                          # (16, 64)
    kv2 = jnp.concatenate(
        [kv2, jnp.zeros((DIM - CTX_DIM, 2 * INNER), jnp.float32)], axis=0)       # (32, 64)
    blk1 = jnp.concatenate([p["wq2"], p["wo2"], kv2], axis=1)                    # (32, 128)
    w_slab = jnp.concatenate([blk0, blk1], axis=0)                               # (64, 128)
    ff1_slab = jnp.concatenate([p["ffw1"], p["ffb1"]], axis=0)                   # (33, 256)
    return vec_slab, w_slab, ff1_slab, p["ffw2"]


def basic_transformer_block(x, context, params):
    b, n, d = x.shape
    _, m, cd = context.shape
    vec_slab, w_slab, ff1_slab, ffw2 = _pack_params(params)
    vmem = pl.BlockSpec(memory_space=pltpu.MemorySpace.VMEM)
    # NOTE: for real diffusion-UNet workloads (thousands of tokens) tile b*n into
    # >=128-row blocks with a grid marked ("parallel",) via
    # pltpu.CompilerParams(dimension_semantics=...) so the two TensorCores on v7x
    # split the token blocks, keep the feature dim a lane-dense multiple of 128,
    # and re-derive the tile for v7x's 64 MiB VMEM (GEGLU intermediate is
    # rows x 256 f32 per tile and every input is double-buffered).  At these toy
    # shapes the whole problem fits one invocation and any grid is pure overhead.
    out = pl.pallas_call(
        transformer_block_kernel,
        out_shape=jax.ShapeDtypeStruct((b * n, d), jnp.float32),
        in_specs=[vmem] * 6,
        out_specs=vmem,
    )(x.reshape(b * n, d), context.reshape(b * m, cd), vec_slab, w_slab, ff1_slab, ffw2)
    return out.reshape(b, n, d)


# ------------------------- deterministic parameter init -------------------------
def init_params(key):
    ks = jax.random.split(key, 12)

    def w(k, shape):
        fan_in = shape[0]
        return jax.random.normal(k, shape, jnp.float32) / math.sqrt(fan_in)

    return {
        # norm1 / attn1 (self-attention: q,k,v all take DIM inputs)
        "n1g": jnp.ones((1, DIM), jnp.float32),
        "n1b": jnp.zeros((1, DIM), jnp.float32),
        "wq1": w(ks[0], (DIM, INNER)),
        "wk1": w(ks[1], (DIM, INNER)),
        "wv1": w(ks[2], (DIM, INNER)),
        "wo1": w(ks[3], (INNER, DIM)),
        "bo1": jnp.zeros((1, DIM), jnp.float32),
        # norm2 / attn2 (cross-attention: k,v take CTX_DIM inputs)
        "n2g": jnp.ones((1, DIM), jnp.float32),
        "n2b": jnp.zeros((1, DIM), jnp.float32),
        "wq2": w(ks[4], (DIM, INNER)),
        "wk2": w(ks[5], (CTX_DIM, INNER)),
        "wv2": w(ks[6], (CTX_DIM, INNER)),
        "wo2": w(ks[7], (INNER, DIM)),
        "bo2": jnp.zeros((1, DIM), jnp.float32),
        # norm3 / GEGLU feed-forward
        "n3g": jnp.ones((1, DIM), jnp.float32),
        "n3b": jnp.zeros((1, DIM), jnp.float32),
        "ffw1": w(ks[8], (DIM, 2 * FF_INNER)),
        "ffb1": jnp.zeros((1, 2 * FF_INNER), jnp.float32),
        "ffw2": w(ks[9], (FF_INNER, DIM)),
        "ffb2": jnp.zeros((1, DIM), jnp.float32),
    }


# ----------------------------- pure-JAX reference -------------------------------
def _layer_norm_ref(x, g, b):
    mu = jnp.mean(x, axis=-1, keepdims=True)
    var = jnp.mean((x - mu) ** 2, axis=-1, keepdims=True)
    return (x - mu) * lax.rsqrt(var + EPS) * g + b


def _gelu_ref(x):
    return 0.5 * x * (1.0 + lax.erf(x / math.sqrt(2.0)))


def _attention_ref(xq, ctx, wq, wk, wv, wo, bo):
    q = jnp.dot(xq, wq)
    k = jnp.dot(ctx, wk)
    v = jnp.dot(ctx, wv)
    outs = []
    for h in range(HEADS):
        sl = slice(h * DHEAD, (h + 1) * DHEAD)
        sim = jnp.dot(q[:, sl], k[:, sl].T) * SCALE
        p = jax.nn.softmax(sim, axis=-1)
        outs.append(jnp.dot(p, v[:, sl]))
    o = jnp.concatenate(outs, axis=-1)
    return jnp.dot(o, wo) + bo


def _block_ref(x, ctx, p):
    xn = _layer_norm_ref(x, p["n1g"], p["n1b"])
    x = _attention_ref(xn, xn, p["wq1"], p["wk1"], p["wv1"], p["wo1"], p["bo1"]) + x
    xn = _layer_norm_ref(x, p["n2g"], p["n2b"])
    x = _attention_ref(xn, ctx, p["wq2"], p["wk2"], p["wv2"], p["wo2"], p["bo2"]) + x
    xn = _layer_norm_ref(x, p["n3g"], p["n3b"])
    h = jnp.dot(xn, p["ffw1"]) + p["ffb1"]
    y = h[:, :FF_INNER] * _gelu_ref(h[:, FF_INNER:])
    return jnp.dot(y, p["ffw2"]) + p["ffb2"] + x


def reference(x, context, params):
    return jax.vmap(lambda xb, cb: _block_ref(xb, cb, params))(x, context)


if __name__ == "__main__":
    key = jax.random.PRNGKey(0)
    kx, kc, kp = jax.random.split(key, 3)

    x = jax.random.normal(kx, (B, N, DIM), jnp.float32)
    context = jax.random.normal(kc, (B, M, CTX_DIM), jnp.float32)
    params = init_params(kp)

    out = basic_transformer_block(x, context, params)
    out = jax.block_until_ready(out)

    ref = jax.block_until_ready(reference(x, context, params))
    assert out.shape == (B, N, DIM)
    np.testing.assert_allclose(np.asarray(out), np.asarray(ref), atol=2e-3, rtol=2e-3)

    print("KERNEL_OK")
</pallas_src>

<mosaic_0001>
module attributes {stable_mosaic.version = 11 : i64} {
  func.func @transformer_block_kernel(%arg0: memref<32x32xf32, #tpu.memory_space<vmem>>, %arg1: memref<16x16xf32, #tpu.memory_space<vmem>>, %arg2: memref<9x32xf32, #tpu.memory_space<vmem>>, %arg3: memref<64x128xf32, #tpu.memory_space<vmem>>, %arg4: memref<33x256xf32, #tpu.memory_space<vmem>>, %arg5: memref<128x32xf32, #tpu.memory_space<vmem>>, %arg6: memref<32x32xf32, #tpu.memory_space<vmem>>) attributes {dimension_semantics = [], scalar_prefetch = 0 : i64, scratch_operands = 0 : i64, tpu.core_type = #tpu.core_type<tc>} {
    %c0 = arith.constant 0 : index
    %c0_0 = arith.constant 0 : index
    %0 = vector.load %arg0[%c0, %c0_0] : memref<32x32xf32, #tpu.memory_space<vmem>>, vector<32x32xf32>
    %c0_1 = arith.constant 0 : index
    %c0_2 = arith.constant 0 : index
    %1 = vector.load %arg1[%c0_1, %c0_2] : memref<16x16xf32, #tpu.memory_space<vmem>>, vector<16x16xf32>
    %c0_3 = arith.constant 0 : index
    %c0_4 = arith.constant 0 : index
    %2 = vector.load %arg2[%c0_3, %c0_4] : memref<9x32xf32, #tpu.memory_space<vmem>>, vector<1x32xf32>
    %c1 = arith.constant 1 : index
    %c0_5 = arith.constant 0 : index
    %3 = vector.load %arg2[%c1, %c0_5] : memref<9x32xf32, #tpu.memory_space<vmem>>, vector<1x32xf32>
    %cst = arith.constant dense<0.000000e+00> : vector<32xf32>
    %4 = vector.multi_reduction <add>, %0, %cst [1] : vector<32x32xf32> to vector<32xf32>
    %5 = vector.shape_cast %4 : vector<32xf32> to vector<32x1xf32>
    %cst_6 = arith.constant 3.200000e+01 : f32
    %6 = vector.broadcast %cst_6 : f32 to vector<32x1xf32>
    %7 = arith.divf %5, %6 : vector<32x1xf32>
    %8 = arith.mulf %0, %0 : vector<32x32xf32>
    %cst_7 = arith.constant dense<0.000000e+00> : vector<32xf32>
    %9 = vector.multi_reduction <add>, %8, %cst_7 [1] : vector<32x32xf32> to vector<32xf32>
    %10 = vector.shape_cast %9 : vector<32xf32> to vector<32x1xf32>
    %cst_8 = arith.constant 3.200000e+01 : f32
    %11 = vector.broadcast %cst_8 : f32 to vector<32x1xf32>
    %12 = arith.divf %10, %11 : vector<32x1xf32>
    %13 = arith.mulf %7, %7 : vector<32x1xf32>
    %14 = arith.subf %12, %13 : vector<32x1xf32>
    %15 = vector.broadcast %7 : vector<32x1xf32> to vector<32x32xf32>
    %16 = arith.subf %0, %15 : vector<32x32xf32>
    %cst_9 = arith.constant 9.99999974E-6 : f32
    %17 = vector.broadcast %cst_9 : f32 to vector<32x1xf32>
    %18 = arith.addf %14, %17 : vector<32x1xf32>
    %19 = math.rsqrt %18 : vector<32x1xf32>
    %20 = vector.broadcast %19 : vector<32x1xf32> to vector<32x32xf32>
    %21 = arith.mulf %16, %20 : vector<32x32xf32>
    %22 = vector.broadcast %2 : vector<1x32xf32> to vector<32x32xf32>
    %23 = arith.mulf %21, %22 : vector<32x32xf32>
    %24 = vector.broadcast %3 : vector<1x32xf32> to vector<32x32xf32>
    %25 = arith.addf %23, %24 : vector<32x32xf32>
    %c0_10 = arith.constant 0 : index
    %c0_11 = arith.constant 0 : index
    %26 = vector.load %arg3[%c0_10, %c0_11] : memref<64x128xf32, #tpu.memory_space<vmem>>, vector<32x96xf32>
    %cst_12 = arith.constant dense<0.000000e+00> : vector<32x96xf32>
    %27 = tpu.matmul %25, %26, %cst_12 {dimension_numbers = #tpu.dot_dimension_numbers<[1], [0], [0], [1], [0, 0, 1, 1], [], []>} : vector<32x32xf32>, vector<32x96xf32>, vector<32x96xf32> -> vector<32x96xf32>
    %28 = vector.extract_strided_slice %27 {offsets = [0, 0], sizes = [32, 32], strides = [1, 1]} : vector<32x96xf32> to vector<32x32xf32>
    %29 = vector.extract_strided_slice %27 {offsets = [0, 32], sizes = [32, 32], strides = [1, 1]} : vector<32x96xf32> to vector<32x32xf32>
    %30 = vector.extract_strided_slice %27 {offsets = [0, 64], sizes = [32, 32], strides = [1, 1]} : vector<32x96xf32> to vector<32x32xf32>
    %31 = vector.shape_cast %28 : vector<32x32xf32> to vector<2x16x4x8xf32>
    %32 = tpu.transpose %31, [0, 2, 1, 3] : vector<2x16x4x8xf32> -> vector<2x4x16x8xf32>
    %33 = vector.shape_cast %32 : vector<2x4x16x8xf32> to vector<8x16x8xf32>
    %34 = vector.shape_cast %29 : vector<32x32xf32> to vector<2x16x4x8xf32>
    %35 = tpu.transpose %34, [0, 2, 1, 3] : vector<2x16x4x8xf32> -> vector<2x4x16x8xf32>
    %36 = vector.shape_cast %35 : vector<2x4x16x8xf32> to vector<8x16x8xf32>
    %37 = vector.shape_cast %30 : vector<32x32xf32> to vector<2x16x4x8xf32>
    %38 = tpu.transpose %37, [0, 2, 1, 3] : vector<2x16x4x8xf32> -> vector<2x4x16x8xf32>
    %39 = vector.shape_cast %38 : vector<2x4x16x8xf32> to vector<8x16x8xf32>
    "tpu.trace_start"() <{level = 10 : i32, message = "bnd,bmd->bnm"}> : () -> ()
    %cst_13 = arith.constant dense<0.000000e+00> : vector<8x16x16xf32>
    %40 = tpu.matmul %33, %36, %cst_13 {dimension_numbers = #tpu.dot_dimension_numbers<[2], [2], [1], [1], [0, 0, 0, 1, 1, 1], [0], [0]>} : vector<8x16x8xf32>, vector<8x16x8xf32>, vector<8x16x16xf32> -> vector<8x16x16xf32>
    "tpu.trace_stop"() : () -> ()
    %cst_14 = arith.constant 0.353553385 : f32
    %41 = vector.broadcast %cst_14 : f32 to vector<8x16x16xf32>
    %42 = arith.mulf %40, %41 : vector<8x16x16xf32>
    %43 = vector.shape_cast %42 : vector<8x16x16xf32> to vector<128x16xf32>
    %cst_15 = arith.constant dense<0xFF800000> : vector<128xf32>
    %44 = vector.multi_reduction <maximumf>, %43, %cst_15 [1] : vector<128x16xf32> to vector<128xf32>
    %45 = vector.shape_cast %44 : vector<128xf32> to vector<128x1xf32>
    %46 = vector.broadcast %45 : vector<128x1xf32> to vector<128x16xf32>
    %47 = arith.subf %43, %46 : vector<128x16xf32>
    %48 = math.exp %47 : vector<128x16xf32>
    %cst_16 = arith.constant dense<0.000000e+00> : vector<128xf32>
    %49 = vector.multi_reduction <add>, %48, %cst_16 [1] : vector<128x16xf32> to vector<128xf32>
    %50 = vector.shape_cast %49 : vector<128xf32> to vector<128x1xf32>
    %51 = vector.broadcast %50 : vector<128x1xf32> to vector<128x16xf32>
    %52 = arith.divf %48, %51 : vector<128x16xf32>
    %53 = vector.shape_cast %52 : vector<128x16xf32> to vector<8x16x16xf32>
    "tpu.trace_start"() <{level = 10 : i32, message = "bnm,bmd->bnd"}> : () -> ()
    %cst_17 = arith.constant dense<0.000000e+00> : vector<8x16x8xf32>
    %54 = tpu.matmul %53, %39, %cst_17 {dimension_numbers = #tpu.dot_dimension_numbers<[2], [1], [1], [2], [0, 0, 0, 1, 1, 2], [0], [0]>} : vector<8x16x16xf32>, vector<8x16x8xf32>, vector<8x16x8xf32> -> vector<8x16x8xf32>
    "tpu.trace_stop"() : () -> ()
    %55 = vector.shape_cast %54 : vector<8x16x8xf32> to vector<2x4x16x8xf32>
    %56 = tpu.transpose %55, [0, 2, 1, 3] : vector<2x4x16x8xf32> -> vector<2x16x4x8xf32>
    %57 = vector.shape_cast %56 : vector<2x16x4x8xf32> to vector<32x32xf32>
    %c0_18 = arith.constant 0 : index
    %c96 = arith.constant 96 : index
    %58 = vector.load %arg3[%c0_18, %c96] : memref<64x128xf32, #tpu.memory_space<vmem>>, vector<32x32xf32>
    %cst_19 = arith.constant dense<0.000000e+00> : vector<32x32xf32>
    %59 = tpu.matmul %57, %58, %cst_19 {dimension_numbers = #tpu.dot_dimension_numbers<[1], [0], [0], [1], [0, 0, 1, 1], [], []>} : vector<32x32xf32>, vector<32x32xf32>, vector<32x32xf32> -> vector<32x32xf32>
    %c6 = arith.constant 6 : index
    %c0_20 = arith.constant 0 : index
    %60 = vector.load %arg2[%c6, %c0_20] : memref<9x32xf32, #tpu.memory_space<vmem>>, vector<1x32xf32>
    %61 = vector.broadcast %60 : vector<1x32xf32> to vector<32x32xf32>
    %62 = arith.addf %59, %61 : vector<32x32xf32>
    %63 = arith.addf %62, %0 : vector<32x32xf32>
    %c2 = arith.constant 2 : index
    %c0_21 = arith.constant 0 : index
    %64 = vector.load %arg2[%c2, %c0_21] : memref<9x32xf32, #tpu.memory_space<vmem>>, vector<1x32xf32>
    %c3 = arith.constant 3 : index
    %c0_22 = arith.constant 0 : index
    %65 = vector.load %arg2[%c3, %c0_22] : memref<9x32xf32, #tpu.memory_space<vmem>>, vector<1x32xf32>
    %cst_23 = arith.constant dense<0.000000e+00> : vector<32xf32>
    %66 = vector.multi_reduction <add>, %63, %cst_23 [1] : vector<32x32xf32> to vector<32xf32>
    %67 = vector.shape_cast %66 : vector<32xf32> to vector<32x1xf32>
    %cst_24 = arith.constant 3.200000e+01 : f32
    %68 = vector.broadcast %cst_24 : f32 to vector<32x1xf32>
    %69 = arith.divf %67, %68 : vector<32x1xf32>
    %70 = arith.mulf %63, %63 : vector<32x32xf32>
    %cst_25 = arith.constant dense<0.000000e+00> : vector<32xf32>
    %71 = vector.multi_reduction <add>, %70, %cst_25 [1] : vector<32x32xf32> to vector<32xf32>
    %72 = vector.shape_cast %71 : vector<32xf32> to vector<32x1xf32>
    %cst_26 = arith.constant 3.200000e+01 : f32
    %73 = vector.broadcast %cst_26 : f32 to vector<32x1xf32>
    %74 = arith.divf %72, %73 : vector<32x1xf32>
    %75 = arith.mulf %69, %69 : vector<32x1xf32>
    %76 = arith.subf %74, %75 : vector<32x1xf32>
    %77 = vector.broadcast %69 : vector<32x1xf32> to vector<32x32xf32>
    %78 = arith.subf %63, %77 : vector<32x32xf32>
    %cst_27 = arith.constant 9.99999974E-6 : f32
    %79 = vector.broadcast %cst_27 : f32 to vector<32x1xf32>
    %80 = arith.addf %76, %79 : vector<32x1xf32>
    %81 = math.rsqrt %80 : vector<32x1xf32>
    %82 = vector.broadcast %81 : vector<32x1xf32> to vector<32x32xf32>
    %83 = arith.mulf %78, %82 : vector<32x32xf32>
    %84 = vector.broadcast %64 : vector<1x32xf32> to vector<32x32xf32>
    %85 = arith.mulf %83, %84 : vector<32x32xf32>
    %86 = vector.broadcast %65 : vector<1x32xf32> to vector<32x32xf32>
    %87 = arith.addf %85, %86 : vector<32x32xf32>
    %c32 = arith.constant 32 : index
    %c0_28 = arith.constant 0 : index
    %88 = vector.load %arg3[%c32, %c0_28] : memref<64x128xf32, #tpu.memory_space<vmem>>, vector<32x32xf32>
    %cst_29 = arith.constant dense<0.000000e+00> : vector<32x32xf32>
    %89 = tpu.matmul %87, %88, %cst_29 {dimension_numbers = #tpu.dot_dimension_numbers<[1], [0], [0], [1], [0, 0, 1, 1], [], []>} : vector<32x32xf32>, vector<32x32xf32>, vector<32x32xf32> -> vector<32x32xf32>
    %c32_30 = arith.constant 32 : index
    %c64 = arith.constant 64 : index
    %90 = vector.load %arg3[%c32_30, %c64] : memref<64x128xf32, #tpu.memory_space<vmem>>, vector<16x64xf32>
    %cst_31 = arith.constant dense<0.000000e+00> : vector<16x64xf32>
    %91 = tpu.matmul %1, %90, %cst_31 {dimension_numbers = #tpu.dot_dimension_numbers<[1], [0], [0], [1], [0, 0, 1, 1], [], []>} : vector<16x16xf32>, vector<16x64xf32>, vector<16x64xf32> -> vector<16x64xf32>
    %92 = vector.extract_strided_slice %91 {offsets = [0, 0], sizes = [16, 32], strides = [1, 1]} : vector<16x64xf32> to vector<16x32xf32>
    %93 = vector.extract_strided_slice %91 {offsets = [0, 32], sizes = [16, 32], strides = [1, 1]} : vector<16x64xf32> to vector<16x32xf32>
    %94 = vector.shape_cast %89 : vector<32x32xf32> to vector<2x16x4x8xf32>
    %95 = tpu.transpose %94, [0, 2, 1, 3] : vector<2x16x4x8xf32> -> vector<2x4x16x8xf32>
    %96 = vector.shape_cast %95 : vector<2x4x16x8xf32> to vector<8x16x8xf32>
    %97 = vector.shape_cast %92 : vector<16x32xf32> to vector<2x8x4x8xf32>
    %98 = tpu.transpose %97, [0, 2, 1, 3] : vector<2x8x4x8xf32> -> vector<2x4x8x8xf32>
    %99 = vector.shape_cast %98 : vector<2x4x8x8xf32> to vector<8x8x8xf32>
    %100 = vector.shape_cast %93 : vector<16x32xf32> to vector<2x8x4x8xf32>
    %101 = tpu.transpose %100, [0, 2, 1, 3] : vector<2x8x4x8xf32> -> vector<2x4x8x8xf32>
    %102 = vector.shape_cast %101 : vector<2x4x8x8xf32> to vector<8x8x8xf32>
    "tpu.trace_start"() <{level = 10 : i32, message = "bnd,bmd->bnm"}> : () -> ()
    %cst_32 = arith.constant dense<0.000000e+00> : vector<8x16x8xf32>
    %103 = tpu.matmul %96, %99, %cst_32 {dimension_numbers = #tpu.dot_dimension_numbers<[2], [2], [1], [1], [0, 0, 0, 1, 1, 1], [0], [0]>} : vector<8x16x8xf32>, vector<8x8x8xf32>, vector<8x16x8xf32> -> vector<8x16x8xf32>
    "tpu.trace_stop"() : () -> ()
    %cst_33 = arith.constant 0.353553385 : f32
    %104 = vector.broadcast %cst_33 : f32 to vector<8x16x8xf32>
    %105 = arith.mulf %103, %104 : vector<8x16x8xf32>
    %106 = vector.shape_cast %105 : vector<8x16x8xf32> to vector<128x8xf32>
    %cst_34 = arith.constant dense<0xFF800000> : vector<128xf32>
    %107 = vector.multi_reduction <maximumf>, %106, %cst_34 [1] : vector<128x8xf32> to vector<128xf32>
    %108 = vector.shape_cast %107 : vector<128xf32> to vector<128x1xf32>
    %109 = vector.broadcast %108 : vector<128x1xf32> to vector<128x8xf32>
    %110 = arith.subf %106, %109 : vector<128x8xf32>
    %111 = math.exp %110 : vector<128x8xf32>
    %cst_35 = arith.constant dense<0.000000e+00> : vector<128xf32>
    %112 = vector.multi_reduction <add>, %111, %cst_35 [1] : vector<128x8xf32> to vector<128xf32>
    %113 = vector.shape_cast %112 : vector<128xf32> to vector<128x1xf32>
    %114 = vector.broadcast %113 : vector<128x1xf32> to vector<128x8xf32>
    %115 = arith.divf %111, %114 : vector<128x8xf32>
    %116 = vector.shape_cast %115 : vector<128x8xf32> to vector<8x16x8xf32>
    "tpu.trace_start"() <{level = 10 : i32, message = "bnm,bmd->bnd"}> : () -> ()
    %cst_36 = arith.constant dense<0.000000e+00> : vector<8x16x8xf32>
    %117 = tpu.matmul %116, %102, %cst_36 {dimension_numbers = #tpu.dot_dimension_numbers<[2], [1], [1], [2], [0, 0, 0, 1, 1, 2], [0], [0]>} : vector<8x16x8xf32>, vector<8x8x8xf32>, vector<8x16x8xf32> -> vector<8x16x8xf32>
    "tpu.trace_stop"() : () -> ()
    %118 = vector.shape_cast %117 : vector<8x16x8xf32> to vector<2x4x16x8xf32>
    %119 = tpu.transpose %118, [0, 2, 1, 3] : vector<2x4x16x8xf32> -> vector<2x16x4x8xf32>
    %120 = vector.shape_cast %119 : vector<2x16x4x8xf32> to vector<32x32xf32>
    %c32_37 = arith.constant 32 : index
    %c32_38 = arith.constant 32 : index
    %121 = vector.load %arg3[%c32_37, %c32_38] : memref<64x128xf32, #tpu.memory_space<vmem>>, vector<32x32xf32>
    %cst_39 = arith.constant dense<0.000000e+00> : vector<32x32xf32>
    %122 = tpu.matmul %120, %121, %cst_39 {dimension_numbers = #tpu.dot_dimension_numbers<[1], [0], [0], [1], [0, 0, 1, 1], [], []>} : vector<32x32xf32>, vector<32x32xf32>, vector<32x32xf32> -> vector<32x32xf32>
    %c7 = arith.constant 7 : index
    %c0_40 = arith.constant 0 : index
    %123 = vector.load %arg2[%c7, %c0_40] : memref<9x32xf32, #tpu.memory_space<vmem>>, vector<1x32xf32>
    %124 = vector.broadcast %123 : vector<1x32xf32> to vector<32x32xf32>
    %125 = arith.addf %122, %124 : vector<32x32xf32>
    %126 = arith.addf %125, %63 : vector<32x32xf32>
    %c4 = arith.constant 4 : index
    %c0_41 = arith.constant 0 : index
    %127 = vector.load %arg2[%c4, %c0_41] : memref<9x32xf32, #tpu.memory_space<vmem>>, vector<1x32xf32>
    %c5 = arith.constant 5 : index
    %c0_42 = arith.constant 0 : index
    %128 = vector.load %arg2[%c5, %c0_42] : memref<9x32xf32, #tpu.memory_space<vmem>>, vector<1x32xf32>
    %cst_43 = arith.constant dense<0.000000e+00> : vector<32xf32>
    %129 = vector.multi_reduction <add>, %126, %cst_43 [1] : vector<32x32xf32> to vector<32xf32>
    %130 = vector.shape_cast %129 : vector<32xf32> to vector<32x1xf32>
    %cst_44 = arith.constant 3.200000e+01 : f32
    %131 = vector.broadcast %cst_44 : f32 to vector<32x1xf32>
    %132 = arith.divf %130, %131 : vector<32x1xf32>
    %133 = arith.mulf %126, %126 : vector<32x32xf32>
    %cst_45 = arith.constant dense<0.000000e+00> : vector<32xf32>
    %134 = vector.multi_reduction <add>, %133, %cst_45 [1] : vector<32x32xf32> to vector<32xf32>
    %135 = vector.shape_cast %134 : vector<32xf32> to vector<32x1xf32>
    %cst_46 = arith.constant 3.200000e+01 : f32
    %136 = vector.broadcast %cst_46 : f32 to vector<32x1xf32>
    %137 = arith.divf %135, %136 : vector<32x1xf32>
    %138 = arith.mulf %132, %132 : vector<32x1xf32>
    %139 = arith.subf %137, %138 : vector<32x1xf32>
    %140 = vector.broadcast %132 : vector<32x1xf32> to vector<32x32xf32>
    %141 = arith.subf %126, %140 : vector<32x32xf32>
    %cst_47 = arith.constant 9.99999974E-6 : f32
    %142 = vector.broadcast %cst_47 : f32 to vector<32x1xf32>
    %143 = arith.addf %139, %142 : vector<32x1xf32>
    %144 = math.rsqrt %143 : vector<32x1xf32>
    %145 = vector.broadcast %144 : vector<32x1xf32> to vector<32x32xf32>
    %146 = arith.mulf %141, %145 : vector<32x32xf32>
    %147 = vector.broadcast %127 : vector<1x32xf32> to vector<32x32xf32>
    %148 = arith.mulf %146, %147 : vector<32x32xf32>
    %149 = vector.broadcast %128 : vector<1x32xf32> to vector<32x32xf32>
    %150 = arith.addf %148, %149 : vector<32x32xf32>
    %c0_48 = arith.constant 0 : index
    %c0_49 = arith.constant 0 : index
    %151 = vector.load %arg4[%c0_48, %c0_49] : memref<33x256xf32, #tpu.memory_space<vmem>>, vector<32x256xf32>
    %cst_50 = arith.constant dense<0.000000e+00> : vector<32x256xf32>
    %152 = tpu.matmul %150, %151, %cst_50 {dimension_numbers = #tpu.dot_dimension_numbers<[1], [0], [0], [1], [0, 0, 1, 1], [], []>} : vector<32x32xf32>, vector<32x256xf32>, vector<32x256xf32> -> vector<32x256xf32>
    %c32_51 = arith.constant 32 : index
    %c0_52 = arith.constant 0 : index
    %153 = vector.load %arg4[%c32_51, %c0_52] : memref<33x256xf32, #tpu.memory_space<vmem>>, vector<1x256xf32>
    %154 = vector.broadcast %153 : vector<1x256xf32> to vector<32x256xf32>
    %155 = arith.addf %152, %154 : vector<32x256xf32>
    %156 = vector.extract_strided_slice %155 {offsets = [0, 0], sizes = [32, 128], strides = [1, 1]} : vector<32x256xf32> to vector<32x128xf32>
    %157 = vector.extract_strided_slice %155 {offsets = [0, 128], sizes = [32, 128], strides = [1, 1]} : vector<32x256xf32> to vector<32x128xf32>
    %cst_53 = arith.constant 5.000000e-01 : f32
    %158 = vector.broadcast %cst_53 : f32 to vector<32x128xf32>
    %159 = arith.mulf %158, %157 : vector<32x128xf32>
    %cst_54 = arith.constant 0.707106769 : f32
    %160 = vector.broadcast %cst_54 : f32 to vector<32x128xf32>
    %161 = arith.mulf %157, %160 : vector<32x128xf32>
    %162 = math.absf %161 : vector<32x128xf32>
    %cst_55 = arith.constant 0.327591091 : f32
    %163 = vector.broadcast %cst_55 : f32 to vector<32x128xf32>
    %164 = arith.mulf %163, %162 : vector<32x128xf32>
    %cst_56 = arith.constant 1.000000e+00 : f32
    %165 = vector.broadcast %cst_56 : f32 to vector<32x128xf32>
    %166 = arith.addf %165, %164 : vector<32x128xf32>
    %cst_57 = arith.constant 1.000000e+00 : f32
    %167 = vector.broadcast %cst_57 : f32 to vector<32x128xf32>
    %168 = arith.divf %167, %166 : vector<32x128xf32>
    %cst_58 = arith.constant 1.06140542 : f32
    %169 = vector.broadcast %cst_58 : f32 to vector<32x128xf32>
    %170 = arith.mulf %168, %169 : vector<32x128xf32>
    %cst_59 = arith.constant -1.45315206 : f32
    %171 = vector.broadcast %cst_59 : f32 to vector<32x128xf32>
    %172 = arith.addf %171, %170 : vector<32x128xf32>
    %173 = arith.mulf %168, %172 : vector<32x128xf32>
    %cst_60 = arith.constant 1.42141378 : f32
    %174 = vector.broadcast %cst_60 : f32 to vector<32x128xf32>
    %175 = arith.addf %174, %173 : vector<32x128xf32>
    %176 = arith.mulf %168, %175 : vector<32x128xf32>
    %cst_61 = arith.constant -0.284496725 : f32
    %177 = vector.broadcast %cst_61 : f32 to vector<32x128xf32>
    %178 = arith.addf %177, %176 : vector<32x128xf32>
    %179 = arith.mulf %168, %178 : vector<32x128xf32>
    %cst_62 = arith.constant 0.254829586 : f32
    %180 = vector.broadcast %cst_62 : f32 to vector<32x128xf32>
    %181 = arith.addf %180, %179 : vector<32x128xf32>
    %182 = arith.mulf %168, %181 : vector<32x128xf32>
    %cst_63 = arith.constant 0.000000e+00 : f32
    %183 = vector.broadcast %cst_63 : f32 to vector<32x128xf32>
    %184 = arith.subf %183, %162 : vector<32x128xf32>
    %185 = arith.mulf %184, %162 : vector<32x128xf32>
    %186 = math.exp %185 : vector<32x128xf32>
    %187 = arith.mulf %182, %186 : vector<32x128xf32>
    %cst_64 = arith.constant 1.000000e+00 : f32
    %188 = vector.broadcast %cst_64 : f32 to vector<32x128xf32>
    %189 = arith.subf %188, %187 : vector<32x128xf32>
    %cst_65 = arith.constant 0.000000e+00 : f32
    %190 = vector.broadcast %cst_65 : f32 to vector<32x128xf32>
    %191 = arith.cmpf oge, %161, %190 : vector<32x128xf32>
    %cst_66 = arith.constant 0.000000e+00 : f32
    %192 = vector.broadcast %cst_66 : f32 to vector<32x128xf32>
    %193 = arith.subf %192, %189 : vector<32x128xf32>
    %194 = arith.select %191, %189, %193 : vector<32x128xi1>, vector<32x128xf32>
    %cst_67 = arith.constant 1.000000e+00 : f32
    %195 = vector.broadcast %cst_67 : f32 to vector<32x128xf32>
    %196 = arith.addf %195, %194 : vector<32x128xf32>
    %197 = arith.mulf %159, %196 : vector<32x128xf32>
    %198 = arith.mulf %156, %197 : vector<32x128xf32>
    %c0_68 = arith.constant 0 : index
    %c0_69 = arith.constant 0 : index
    %199 = vector.load %arg5[%c0_68, %c0_69] : memref<128x32xf32, #tpu.memory_space<vmem>>, vector<128x32xf32>
    %cst_70 = arith.constant dense<0.000000e+00> : vector<32x32xf32>
    %200 = tpu.matmul %198, %199, %cst_70 {dimension_numbers = #tpu.dot_dimension_numbers<[1], [0], [0], [1], [0, 0, 1, 1], [], []>} : vector<32x128xf32>, vector<128x32xf32>, vector<32x32xf32> -> vector<32x32xf32>
    %c8 = arith.constant 8 : index
    %c0_71 = arith.constant 0 : index
    %201 = vector.load %arg2[%c8, %c0_71] : memref<9x32xf32, #tpu.memory_space<vmem>>, vector<1x32xf32>
    %202 = vector.broadcast %201 : vector<1x32xf32> to vector<32x32xf32>
    %203 = arith.addf %200, %202 : vector<32x32xf32>
    %204 = arith.addf %203, %126 : vector<32x32xf32>
    %c0_72 = arith.constant 0 : index
    %c0_73 = arith.constant 0 : index
    %205 = vector.load %arg6[%c0_72, %c0_73] : memref<32x32xf32, #tpu.memory_space<vmem>>, vector<32x32xf32>
    tpu.vector_store %arg6[%c0_72, %c0_73], %204 {strides = array<i32>} : memref<32x32xf32, #tpu.memory_space<vmem>>, vector<32x32xf32>,
    return
  }
}

</mosaic_0001>

<bundles_post_ra>
// kernel: tpu_custom_call.1
= control target key start
LH: loop header
LB: loop body
LE: loop exit
PB: predicated region body
PF: predicated region fallthrough
CT: control target
= control target key end

     0   :  { %11 = vsyncpa [#allocation3], 0  ;;  %s11125_s0 = inlined_call_operand.hbm [shape: f32[32,32], index: 0, kind: input, shape index: {}]   ;;  %s11126_s1 = inlined_call_operand.vmem [shape: f32[16,16], index: 1, kind: input, shape index: {}]   ;;  %s11127_s2 = inlined_call_operand.hbm [shape: f32[9,32], index: 2, kind: input, shape index: {}]   ;;  %s11128_s3 = inlined_call_operand.vmem [shape: f32[64,128], index: 3, kind: input, shape index: {}]   ;;  %s11129_s4 = inlined_call_operand.vmem [shape: f32[33,256], index: 4, kind: input, shape index: {}]   ;;  %s11130_s5 = inlined_call_operand.vmem [shape: f32[128,32], index: 5, kind: input, shape index: {}]   ;;  %s11131_s6 = inlined_call_operand.hbm [shape: f32[32,32], index: 6, kind: output, shape index: {}]  }
   0x1   :  { %12 = vsyncpa [#allocation6], 0 }
   0x2   :  { %13 = vsyncpa [#allocation4], 0  ;;  %s9295_s21 = smov [#allocation2]  }
   0x3   :  { %s19_s22 = sshll.u32 %s9295_s21, 4  ;;  %s20_s22 = int_to_ptr.vmem [resolvable:$true] %s19_s22 }
   0x4   :  { %s9237_s23 = scalar_lea.vmem %s20_s22, 512  ;;  %p9242_p1 = scmp.lt.s32.totalorder %s20_s22, %s20_s22 }
   0x5   :  { %p9238_p0 = scmp.ne.s32.totalorder %s20_s22, %s9237_s23  ;;  %p9243_p2 = scmp.lt.s32.totalorder %s9237_s23, %s9237_s23 }
   0x7   :  { %p9244_p3 = por %p9243_p2, %p9242_p1 }
   0x9   :  { %p9245_p4 = pnand %p9244_p3, %p9238_p0 }
   0xb   :  { %9248 = shalt.err (!%p9245_p4)
}
   0xc   :  { %s9296_s24 = smov 128   ;;  %s9297_s25 = smov 8  }
   0xd   :  { %25 = dma.hbm_to_vmem [thread:$0]  %s11125_s0, 512, %s20_s22, [#allocation3], %s9296_s24, %s9296_s24, %s9297_s25  }
   0xe   :  { %s9298_s28 = smov [#allocation5]  }
   0xf   :  { %s33_s29 = sshll.u32 %s9298_s28, 4  ;;  %s34_s29 = int_to_ptr.vmem [resolvable:$true] %s33_s29 }
  0x10   :  { %s9257_s30 = scalar_lea.vmem %s34_s29, 256  ;;  %p9262_p6 = scmp.lt.s32.totalorder %s34_s29, %s34_s29 }
  0x11   :  { %p9258_p5 = scmp.ne.s32.totalorder %s34_s29, %s9257_s30  ;;  %p9263_p7 = scmp.lt.s32.totalorder %s9257_s30, %s9257_s30 }
  0x13   :  { %p9264_p8 = por %p9263_p7, %p9262_p6 }
  0x15   :  { %p9265_p9 = pnand %p9264_p8, %p9258_p5 }
  0x17   :  { %9268 = shalt.err (!%p9265_p9)
}
  0x18   :  { %39 = dma.hbm_to_vmem [thread:$0]  %s11127_s2, 256, %s34_s29, [#allocation6], %s9296_s24, %s9296_s24, %s9297_s25  }
  0x19   :  { %9289 = dma.done.wait [#allocation3], 512  }
  0x1a   :  { %9290 = vsyncadd [#allocation3], 4294966784 }
  0x1b   :  { %9291 = dma.done.wait [#allocation6], 256  }
  0x1c   :  { %9292 = vsyncadd [#allocation6], 4294967040  ;;  %vm60_vm0 = vcmask 261120   ;;  %v9358_v0 = vld [vmem:[#allocation2] sm:$0xff]  ;;  %v9360_v1 = vld [vmem:[#allocation2 + $0x8] sm:$0xff]  ;;  %s9299_s15 = smov 112  }
  0x1d   :  { %v61_v2 = vsel %vm60_vm0, %v9358_v0, 0.0  ;;  %v78_v3 = vmul.f32 %v9358_v0, %v9358_v0  ;;  %v79_v4 = vmul.f32 %v9360_v1, %v9360_v1  ;;  %v64_v6 = vsel %vm60_vm0, %v9360_v1, 0.0  ;;  %v9371_v7 = vld [vmem:[#allocation2 + $0x10] sm:$0xff]  ;;  %v9374_v9 = vld [vmem:[#allocation2 + $0x18] sm:$0xff]  ;;  %v139_v18 = vld [vmem:[%s11128_s3 + $0x8] sm:$0xff]  ;;  %s9300_s16 = smov 120  }
  0x1e   :  { %62 = vadd.xlane.f32.xlu0 %v61_v2  ;;  %v67_v10 = vsel %vm60_vm0, %v9371_v7, 0.0  ;;  %v80_v11 = vmul.f32 %v9371_v7, %v9371_v7  ;;  %v70_v12 = vsel %vm60_vm0, %v9374_v9, 0.0  ;;  %v81_v13 = vmul.f32 %v9374_v9, %v9374_v9  ;;  %v141_v16 = vld [vmem:[%s11128_s3 + $0x18] sm:$0xff]  ;;  %v140_v17 = vld [vmem:[%s11128_s3 + $0x10] sm:$0xff]  ;;  %v138_v19 = vld [vmem:[%s11128_s3] sm:$0xff]  ;;  %s9301_s17 = smov 104  }
  0x1f   :  { %v82_v5 = vsel %vm60_vm0, %v78_v3, 0.0  ;;  %v85_v8 = vsel %vm60_vm0, %v79_v4, 0.0  ;;  %8748 = vmatprep.subr.mxu0 %v141_v16  ;;  %v8404_v50 = vld [vmem:[#allocation5] ss:$0 sm:$0xff]  ;;  %v8405_v52 = vld [vmem:[#allocation5 + $0x1] ss:$0 sm:$0xff] }
  0x20   :  { %83 = vadd.xlane.f32.xlu1 %v82_v5  ;;  %v88_v14 = vsel %vm60_vm0, %v80_v11, 0.0  ;;  %v91_v15 = vsel %vm60_vm0, %v81_v13, 0.0  ;;  %8749 = vmatpush3.msra.mxu0 %v141_v16  ;;  %s9302_s18 = smov 96   ;;  %v284_v16 = vlaneseq  ;;  %s9305_s19 = smov 64   ;;  %vm2007_vm1 = vcmask 64512  }
  0x21   :  { %8750 = vmatprep.subr.mxu0 %v140_v17  ;;  %vm2720_vm2 = vcmask 130048   ;;  %s9306_s26 = smov 32   ;;  %s9307_s7 = smov 24   ;;  %vm4145_vm3 = vcmask 195584  }
  0x22   :  { %65 = vadd.xlane.f32.xlu0 %v64_v6  ;;  %8751 = vmatpush3.msra.mxu0 %v140_v17  ;;  %v9304_v17 = vmov 1934713408   ;;  %s9308_s8 = smov 16  }
  0x23   :  { %8752 = vmatprep.subr.mxu0 %v139_v18 }
  0x24   :  { %86 = vadd.xlane.f32.xlu1 %v85_v8  ;;  %8753 = vmatpush3.msra.mxu0 %v139_v18  ;;  %v314_v18 = vunpack.c.l.s4 %v9304_v17 }
  0x25   :  { %8754 = vmatprep.subr.mxu0 %v138_v19 }
  0x26   :  { %68 = vadd.xlane.f32.xlu0 %v67_v10  ;;  %8755 = vmatpush3.msra.mxu0 %v138_v19 }
  0x28   :  { %71 = vadd.xlane.f32.xlu1 %v70_v12 }
  0x2a   :  { %89 = vadd.xlane.f32.xlu0 %v88_v14  ;;  %v9303_v14 = vmov 1983009808  }
  0x2c   :  { %92 = vadd.xlane.f32.xlu1 %v91_v15  ;;  %v282_v15 = vunpack.c.l.s4 %v9303_v14 }
  0xa7   :  { %v63_v20 = vpop.xlane.xlu0 %62 }
  0xa8   :  { %v74_v21 = vmul.f32 0.03125, %v63_v20  ;;  %v283_v20 = vunpack.c.0.s8 %v282_v15 }
  0xa9   :  { %v84_v22 = vpop.xlane.xlu1 %83 }
  0xaa   :  { %v98_v23 = vmul.f32 %v74_v21, %v74_v21  ;;  %v94_v24 = vmul.f32 0.03125, %v84_v22  ;;  %v106_v48 = vsub.f32 %v9358_v0, %v74_v21  ;;  %v9460_v21 = vshrl.u32 %v284_v16, 7 }
  0xab   :  { %v66_v25 = vpop.xlane.xlu0 %65 }
  0xac   :  { %v102_v26 = vsub.f32 %v94_v24, %v98_v23  ;;  %v75_v27 = vmul.f32 0.03125, %v66_v25  ;;  %v315_v25 = vunpack.c.0.s8 %v314_v18 }
  0xad   :  { %v87_v28 = vpop.xlane.xlu1 %86 }
  0xae   :  { %v110_v29 = vadd.f32 1e-05, %v102_v26  ;;  %v99_v30 = vmul.f32 %v75_v27, %v75_v27  ;;  %v95_v31 = vmul.f32 0.03125, %v87_v28  ;;  %v107_v53 = vsub.f32 %v9360_v1, %v75_v27 }
  0xaf   :  { %v69_v32 = vpop.xlane.xlu0 %68  ;;  %v9473_v27 = vsub.s32 %v283_v20, %v9460_v21 }
  0xb0   :  { %9057 = vrsqrt.f32 %v110_v29  ;;  %v103_v33 = vsub.f32 %v95_v31, %v99_v30  ;;  %v76_v34 = vmul.f32 0.03125, %v69_v32 }
  0xb1   :  { %v72_v35 = vpop.xlane.xlu1 %71 }
  0xb2   :  { %v111_v36 = vadd.f32 1e-05, %v103_v33  ;;  %v100_v37 = vmul.f32 %v76_v34, %v76_v34  ;;  %v77_v38 = vmul.f32 0.03125, %v72_v35  ;;  %v108_v59 = vsub.f32 %v9371_v7, %v76_v34 }
  0xb3   :  { %v90_v39 = vpop.xlane.xlu0 %89  ;;  %v9487_v35 = vsub.s32 %v315_v25, %v9460_v21 }
  0xb4   :  { %9059 = vrsqrt.f32 %v111_v36  ;;  %v101_v40 = vmul.f32 %v77_v38, %v77_v38  ;;  %v96_v41 = vmul.f32 0.03125, %v90_v39  ;;  %v109_v62 = vsub.f32 %v9374_v9, %v77_v38 }
  0xb5   :  { %v93_v42 = vpop.xlane.xlu1 %92 }
  0xb6   :  { %v104_v43 = vsub.f32 %v96_v41, %v100_v37  ;;  %v97_v44 = vmul.f32 0.03125, %v93_v42 }
  0xb8   :  { %v112_v45 = vadd.f32 1e-05, %v104_v43  ;;  %v105_v46 = vsub.f32 %v97_v44, %v101_v40 }
  0xba   :  { %9061 = vrsqrt.f32 %v112_v45  ;;  %v113_v47 = vadd.f32 1e-05, %v105_v46 }
  0xbc   :  { %9063 = vrsqrt.f32 %v113_v47 }
  0xbd   :  { %v9058_v49 = vpop.eup %9057 }
  0xbe   :  { %v118_v51 = vmul.f32 %v9058_v49, %v106_v48 }
  0xc0   :  { %v126_v54 = vmul.f32 %v8404_v50, %v118_v51 }
  0xc1   :  { %v9060_v55 = vpop.eup %9059 }
  0xc2   :  { %v134_v56 = vadd.f32 %v8405_v52, %v126_v54  ;;  %v119_v57 = vmul.f32 %v9060_v55, %v107_v53 }
  0xc4   :  { %8756 = vmatprep.mubr.msk.f32.mxu0 %vm60_vm0, %v134_v56  ;;  %v127_v58 = vmul.f32 %v8404_v50, %v119_v57 }
  0xc6   :  { %v135_v60 = vadd.f32 %v8405_v52, %v127_v58 }
  0xc7   :  { %v9062_v61 = vpop.eup %9061 }
  0xc8   :  { %8757 = vmatmul.mubr.msk.f32.vlgmr.msra.gmra.mxu0 %vm60_vm0, %v135_v60  ;;  %v120_v63 = vmul.f32 %v9062_v61, %v108_v59 }
  0xc9   :  { %v9064_v0 = vpop.eup %9063 }
  0xca   :  { %v128_v2 = vmul.f32 %v8404_v50, %v120_v63  ;;  %v121_v3 = vmul.f32 %v9064_v0, %v109_v62 }
  0xcc   :  { %v136_v1 = vadd.f32 %v8405_v52, %v128_v2  ;;  %v129_v4 = vmul.f32 %v8404_v50, %v121_v3 }
  0xce   :  { %8759 = vmatprep.mubr.msk.f32.mxu0 %vm60_vm0, %v136_v1  ;;  %v137_v5 = vadd.f32 %v8405_v52, %v129_v4 }
  0xd0   :  { %8760 = vmatmul.mubr.msk.f32.gmra.mxu0 %vm60_vm0, %v137_v5 }
 0x188   :  { %v9406_v6 = vpop.f32.mrf.mxu0 }
 0x189   :  { %257 = vrot.lane.b32.xlu1 %v9406_v6, %s9299_s15  ;;  %245 = vrot.lane.b32.xlu0 %v9406_v6, %s9300_s16 }
 0x18a   :  { %v9412_v7 = vpop.f32.mrf.mxu0 }
 0x18d   :  { %269 = vrot.lane.b32.xlu1 %v9406_v6, %s9301_s17  ;;  %255 = vrot.lane.b32.xlu0 %v9412_v7, %s9299_s15 }
 0x190   :  { %v9418_v8 = vpop.f32.mrf.mxu0 }
 0x191   :  { %243 = vrot.lane.b32.xlu1 %v9412_v7, %s9300_s16  ;;  %249 = vrot.lane.b32.xlu0 %v9418_v8, %s9300_s16 }
 0x192   :  { %v9428_v9 = vpop.f32.mrf.mxu0 }
 0x195   :  { %267 = vrot.lane.b32.xlu1 %v9412_v7, %s9301_s17  ;;  %273 = vrot.lane.b32.xlu0 %v9418_v8, %s9301_s17 }
 0x199   :  { %261 = vrot.lane.b32.xlu1 %v9418_v8, %s9299_s15  ;;  %259 = vrot.lane.b32.xlu0 %v9428_v9, %s9299_s15 }
 0x19d   :  { %825 = vrot.lane.b32.xlu0 %v9406_v6, %s9302_s18  ;;  %247 = vrot.lane.b32.xlu1 %v9428_v9, %s9300_s16 }
 0x1a1   :  { %823 = vrot.lane.b32.xlu0 %v9412_v7, %s9302_s18  ;;  %271 = vrot.lane.b32.xlu1 %v9428_v9, %s9301_s17 }
 0x1fb   :  { %v9442_v10 = vpop.permute.xlu1 %257  ;;  %v9444_v11 = vpop.permute.xlu0 %245 }
 0x1fc   :  { %841 = vrot.lane.b32.xlu0 %v9442_v10, %s9302_s18  ;;  %833 = vrot.lane.b32.xlu1 %v9444_v11, %s9302_s18 }
 0x1ff   :  { %v9450_v12 = vpop.permute.xlu1 %269  ;;  %v9452_v13 = vpop.permute.xlu0 %255 }
 0x200   :  { %849 = vrot.lane.b32.xlu1 %v9450_v12, %s9302_s18  ;;  %839 = vrot.lane.b32.xlu0 %v9452_v13, %s9302_s18  ;;  %v279_v23 = vcombine.low %v9412_v7, %v9452_v13  ;;  %v280_v24 = vcombine.high %v9412_v7, %v9452_v13  ;;  %v363_v4 = vcombine.low %v9444_v11, %v9450_v12 }
 0x201   :  { %v364_v5 = vcombine.high %v9444_v11, %v9450_v12 }
 0x202   :  { %v287_v30 = vrot.slane %v279_v23, %v9473_v27  ;;  %v294_v31 = vrot.slane %v280_v24, %v9473_v27  ;;  %v371_v14 = vrot.slane %v363_v4, %v9473_v27 }
 0x203   :  { %v9458_v19 = vpop.permute.xlu1 %243  ;;  %v9462_v22 = vpop.permute.xlu0 %249  ;;  %v378_v15 = vrot.slane %v364_v5, %v9473_v27 }
 0x204   :  { %831 = vrot.lane.b32.xlu1 %v9458_v19, %s9302_s18  ;;  %829 = vrot.lane.b32.xlu0 %v9418_v8, %s9302_s18 }
 0x207   :  { %v268_v26 = vpop.permute.xlu1 %267  ;;  %v9484_v34 = vpop.permute.xlu0 %273 }
 0x208   :  { %v295_v28 = vcombine.low %v9458_v19, %v268_v26  ;;  %v296_v29 = vcombine.high %v9458_v19, %v268_v26  ;;  %847 = vrot.lane.b32.xlu1 %v268_v26, %s9302_s18  ;;  %827 = vrot.lane.b32.xlu0 %v9428_v9, %s9302_s18  ;;  %v499_v24 = vcombine.low %v9462_v22, %v9484_v34 }
 0x209   :  { %v500_v25 = vcombine.high %v9462_v22, %v9484_v34 }
 0x20a   :  { %v303_v32 = vrot.slane %v295_v28, %v9473_v27  ;;  %v310_v33 = vrot.slane %v296_v29, %v9473_v27 }
 0x20b   :  { %v9489_v36 = vpop.permute.xlu1 %261  ;;  %v9499_v45 = vpop.permute.xlu0 %259 }
 0x20c   :  { %v311_v37 = vcombine.low %v287_v30, %v303_v32  ;;  %v312_v38 = vcombine.high %v287_v30, %v303_v32  ;;  %v327_v39 = vcombine.low %v294_v31, %v310_v33  ;;  %v328_v40 = vcombine.high %v294_v31, %v310_v33  ;;  %837 = vrot.lane.b32.xlu1 %v9462_v22, %s9302_s18 }
 0x20d   :  { %845 = vrot.lane.b32.xlu0 %v9489_v36, %s9302_s18  ;;  %v415_v23 = vcombine.low %v9428_v9, %v9499_v45  ;;  %v416_v28 = vcombine.high %v9428_v9, %v9499_v45 }
 0x20e   :  { %v319_v41 = vrot.slane %v311_v37, %v9487_v35  ;;  %v326_v42 = vrot.slane %v312_v38, %v9487_v35  ;;  %v335_v43 = vrot.slane %v327_v39, %v9487_v35  ;;  %v342_v44 = vrot.slane %v328_v40, %v9487_v35 }
 0x20f   :  { %v9503_v50 = vpop.permute.xlu1 %247  ;;  %v514_v37 = vrot.slane %v500_v25, %v9473_v27  ;;  %v430_v39 = vrot.slane %v416_v28, %v9473_v27 }
 0x210   :  { %853 = vrot.lane.b32.xlu1 %v9484_v34, %s9302_s18  ;;  %v551_v46 = vcombine.low %v319_v41, %v326_v42  ;;  %v8410_v47 = vcombine.high %v319_v41, %v326_v42  ;;  %v567_v48 = vcombine.low %v335_v43, %v342_v44  ;;  %v8411_v49 = vcombine.high %v335_v43, %v342_v44 }
 0x211   :  { %843 = vrot.lane.b32.xlu0 %v9499_v45, %s9302_s18 }
 0x212   :  { %v558_v51 = vrot.slane %v551_v46, %v9473_v27  ;;  %v566_v52 = vrot.slane %v8410_v47, %v9473_v27  ;;  %v574_v53 = vrot.slane %v567_v48, %v9473_v27  ;;  %v582_v54 = vrot.slane %v8411_v49, %v9473_v27 }
 0x213   :  { %v9515_v58 = vpop.permute.xlu1 %271 }
 0x214   :  { %835 = vrot.lane.b32.xlu1 %v9503_v50, %s9302_s18  ;;  %v583_v55 = vcombine.low %v558_v51, %v566_v52  ;;  %v584_v56 = vcombine.high %v558_v51, %v566_v52  ;;  %v599_v57 = vcombine.low %v574_v53, %v582_v54  ;;  %v600_v60 = vcombine.high %v574_v53, %v582_v54 }
 0x215   :  { %1417 = vrot.lane.b32.xlu0 %v9406_v6, %s9305_s19  ;;  %v431_v18 = vcombine.low %v9503_v50, %v9515_v58 }
 0x216   :  { %v591_v59 = vrot.slane %v583_v55, %v9487_v35  ;;  %v607_v61 = vrot.slane %v599_v57, %v9487_v35  ;;  %v9526_v0 = vrot.slane %v584_v56, %v9487_v35  ;;  %v9529_v2 = vrot.slane %v600_v60, %v9487_v35 }
 0x218   :  { %851 = vrot.lane.b32.xlu1 %v9515_v58, %s9302_s18  ;;  %v615_v62 = vcombine.low %v591_v59, %v607_v61  ;;  %v616_v63 = vcombine.high %v591_v59, %v607_v61  ;;  %v617_v3 = vcombine.low %v9526_v0, %v9529_v2  ;;  %v618_v1 = vcombine.high %v9526_v0, %v9529_v2  ;;  %v826_v61 = vpop.permute.xlu0 %825 }
 0x219   :  { %1415 = vrot.lane.b32.xlu0 %v9412_v7, %s9305_s19  ;;  %v347_v7 = vcombine.low %v9406_v6, %v9442_v10 }
 0x21a   :  { %8766 = vmatprep.mubr.msk.f32.mxu1 %vm2007_vm1, %v615_v62  ;;  %8773 = vmatprep.mubr.msk.f32.mxu0 %vm2007_vm1, %v616_v63 }
 0x21b   :  { %v355_v16 = vrot.slane %v347_v7, %v9473_v27 }
 0x21c   :  { %1425 = vrot.lane.b32.xlu1 %v9444_v11, %s9305_s19  ;;  %v483_v11 = vcombine.low %v9418_v8, %v9489_v36 }
 0x21d   :  { %1431 = vrot.lane.b32.xlu0 %v9452_v13, %s9305_s19  ;;  %v348_v13 = vcombine.high %v9406_v6, %v9442_v10  ;;  %v380_v20 = vcombine.high %v355_v16, %v371_v14 }
 0x21e   :  { %v491_v30 = vrot.slane %v483_v11, %v9473_v27 }
 0x21f   :  { %v362_v17 = vrot.slane %v348_v13, %v9473_v27  ;;  %v394_v32 = vrot.slane %v380_v20, %v9487_v35  ;;  %v9606_v20 = vpop.permute.xlu0 %823 }
 0x220   :  { %1433 = vrot.lane.b32.xlu1 %v9442_v10, %s9305_s19 }
 0x221   :  { %1421 = vrot.lane.b32.xlu0 %v9418_v8, %s9305_s19  ;;  %v395_v6 = vcombine.low %v362_v17, %v378_v15  ;;  %v396_v10 = vcombine.high %v362_v17, %v378_v15 }
 0x223   :  { %v403_v33 = vrot.slane %v395_v6, %v9487_v35 }
 0x224   :  { %1441 = vrot.lane.b32.xlu1 %v9450_v12, %s9305_s19  ;;  %v484_v12 = vcombine.high %v9418_v8, %v9489_v36  ;;  %v439_v8 = vrot.slane %v431_v18, %v9473_v27 }
 0x226   :  { %v498_v31 = vrot.slane %v484_v12, %v9473_v27 }
 0x228   :  { %1423 = vrot.lane.b32.xlu1 %v9458_v19, %s9305_s19  ;;  %v379_v19 = vcombine.low %v355_v16, %v371_v14  ;;  %v531_v44 = vcombine.low %v498_v31, %v514_v37  ;;  %v532_v46 = vcombine.high %v498_v31, %v514_v37 }
 0x22a   :  { %v387_v29 = vrot.slane %v379_v19, %v9487_v35  ;;  %v539_v59 = vrot.slane %v531_v44, %v9487_v35  ;;  %v546_v60 = vrot.slane %v532_v46, %v9487_v35 }
 0x22c   :  { %1439 = vrot.lane.b32.xlu1 %v268_v26, %s9305_s19  ;;  %v432_v26 = vcombine.high %v9503_v50, %v9515_v58  ;;  %v619_v47 = vcombine.low %v387_v29, %v394_v32  ;;  %v8412_v48 = vcombine.high %v387_v29, %v394_v32  ;;  %v771_v18 = vcombine.low %v539_v59, %v546_v60 }
 0x22d   :  { %v8417_v19 = vcombine.high %v539_v59, %v546_v60 }
 0x22e   :  { %v446_v38 = vrot.slane %v432_v26, %v9473_v27  ;;  %v626_v62 = vrot.slane %v619_v47, %v9473_v27  ;;  %v634_v63 = vrot.slane %v8412_v48, %v9473_v27  ;;  %v778_v29 = vrot.slane %v771_v18, %v9473_v27 }
 0x230   :  { %1429 = vrot.lane.b32.xlu1 %v9462_v22, %s9305_s19  ;;  %v410_v22 = vrot.slane %v396_v10, %v9487_v35  ;;  %v463_v52 = vcombine.low %v430_v39, %v446_v38  ;;  %v464_v53 = vcombine.high %v430_v39, %v446_v38  ;;  %v651_v11 = vcombine.low %v626_v62, %v634_v63 }
 0x232   :  { %v635_v49 = vcombine.low %v403_v33, %v410_v22  ;;  %v8413_v51 = vcombine.high %v403_v33, %v410_v22  ;;  %v471_v7 = vrot.slane %v463_v52, %v9487_v35  ;;  %v478_v13 = vrot.slane %v464_v53, %v9487_v35 }
 0x233   :  { %v9615_v31 = vrot.slane %v651_v11, %v9487_v35 }
 0x234   :  { %1437 = vrot.lane.b32.xlu1 %v9489_v36, %s9305_s19  ;;  %v507_v36 = vrot.slane %v499_v24, %v9473_v27  ;;  %v642_v4 = vrot.slane %v635_v49, %v9473_v27  ;;  %v650_v5 = vrot.slane %v8413_v51, %v9473_v27  ;;  %v703_v6 = vcombine.low %v471_v7, %v478_v13 }
 0x235   :  { %v8415_v10 = vcombine.high %v471_v7, %v478_v13 }
 0x236   :  { %v515_v42 = vcombine.low %v491_v30, %v507_v36  ;;  %v516_v43 = vcombine.high %v491_v30, %v507_v36  ;;  %v667_v12 = vcombine.low %v642_v4, %v650_v5  ;;  %v668_v24 = vcombine.high %v642_v4, %v650_v5 }
 0x237   :  { %v786_v30 = vrot.slane %v8417_v19, %v9473_v27  ;;  %v718_v36 = vrot.slane %v8415_v10, %v9473_v27 }
 0x238   :  { %1445 = vrot.lane.b32.xlu1 %v9484_v34, %s9305_s19  ;;  %v423_v34 = vrot.slane %v415_v23, %v9473_v27  ;;  %v523_v56 = vrot.slane %v515_v42, %v9487_v35  ;;  %v530_v57 = vrot.slane %v516_v43, %v9487_v35  ;;  %v652_v23 = vcombine.high %v626_v62, %v634_v63 }
 0x239   :  { %v9618_v32 = vrot.slane %v667_v12, %v9487_v35  ;;  %v9626_v38 = vrot.slane %v668_v24, %v9487_v35  ;;  %v804_v53 = vcombine.high %v778_v29, %v786_v30 }
 0x23a   :  { %v447_v40 = vcombine.low %v423_v34, %v439_v8  ;;  %v448_v41 = vcombine.high %v423_v34, %v439_v8  ;;  %v755_v16 = vcombine.low %v523_v56, %v530_v57  ;;  %v8416_v17 = vcombine.high %v523_v56, %v530_v57 }
 0x23b   :  { %v710_v34 = vrot.slane %v703_v6, %v9473_v27  ;;  %v9623_v37 = vrot.slane %v652_v23, %v9487_v35  ;;  %v683_v46 = vcombine.low %v9615_v31, %v9618_v32  ;;  %v684_v47 = vcombine.high %v9615_v31, %v9618_v32 }
 0x23c   :  { %v455_v54 = vrot.slane %v447_v40, %v9487_v35  ;;  %v462_v55 = vrot.slane %v448_v41, %v9487_v35  ;;  %v762_v28 = vrot.slane %v755_v16, %v9473_v27  ;;  %v770_v8 = vrot.slane %v8416_v17, %v9473_v27 }
 0x23d   :  { %v803_v41 = vcombine.low %v778_v29, %v786_v30  ;;  %v735_v49 = vcombine.low %v710_v34, %v718_v36  ;;  %v736_v51 = vcombine.high %v710_v34, %v718_v36  ;;  %v685_v57 = vcombine.low %v9623_v37, %v9626_v38 }
 0x23e   :  { %v687_v14 = vcombine.low %v455_v54, %v462_v55  ;;  %v8414_v15 = vcombine.high %v455_v54, %v462_v55  ;;  %v787_v40 = vcombine.low %v762_v28, %v770_v8  ;;  %v788_v52 = vcombine.high %v762_v28, %v770_v8 }
 0x23f   :  { %v686_v59 = vcombine.high %v9623_v37, %v9626_v38  ;;  %v9643_v62 = vrot.slane %v803_v41, %v9487_v35  ;;  %v9656_v16 = vrot.slane %v736_v51, %v9487_v35  ;;  %v9662_v18 = vrot.slane %v804_v53, %v9487_v35 }
 0x240   :  { %v694_v25 = vrot.slane %v687_v14, %v9473_v27  ;;  %v702_v26 = vrot.slane %v8414_v15, %v9473_v27  ;;  %v9653_v15 = vrot.slane %v735_v49, %v9487_v35  ;;  %v9659_v17 = vrot.slane %v788_v52, %v9487_v35 }
 0x242   :  { %v719_v39 = vcombine.low %v694_v25, %v702_v26  ;;  %v720_v42 = vcombine.high %v694_v25, %v702_v26 }
 0x244   :  { %v9637_v60 = vrot.slane %v719_v39, %v9487_v35  ;;  %v9646_v63 = vrot.slane %v720_v42, %v9487_v35 }
 0x26e   :  { %v834_v33 = vpop.permute.xlu1 %833  ;;  %v842_v22 = vpop.permute.xlu0 %841 }
 0x26f   :  { %v939_v43 = vcombine.low %v826_v61, %v842_v22  ;;  %v940_v44 = vcombine.high %v826_v61, %v842_v22  ;;  %v9640_v61 = vrot.slane %v787_v40, %v9487_v35  ;;  %v751_v22 = vcombine.low %v9637_v60, %v9653_v15 }
 0x271   :  { %v947_v4 = vrot.slane %v939_v43, %v9473_v27  ;;  %v954_v5 = vrot.slane %v940_v44, %v9473_v27  ;;  %v819_v25 = vcombine.low %v9640_v61, %v9643_v62  ;;  %v820_v26 = vcombine.high %v9640_v61, %v9643_v62 }
 0x272   :  { %v850_v48 = vpop.permute.xlu1 %849  ;;  %v840_v56 = vpop.permute.xlu0 %839 }
 0x273   :  { %v955_v54 = vcombine.low %v834_v33, %v850_v48  ;;  %v956_v55 = vcombine.high %v834_v33, %v850_v48  ;;  %v871_v23 = vcombine.low %v9606_v20, %v840_v56  ;;  %v872_v24 = vcombine.high %v9606_v20, %v840_v56 }
 0x274   :  { %v752_v20 = vcombine.high %v9637_v60, %v9653_v15 }
 0x275   :  { %v963_v7 = vrot.slane %v955_v54, %v9473_v27  ;;  %v970_v13 = vrot.slane %v956_v55, %v9473_v27  ;;  %v879_v44 = vrot.slane %v871_v23, %v9473_v27  ;;  %v886_v48 = vrot.slane %v872_v24, %v9473_v27 }
 0x276   :  { %v832_v14 = vpop.permute.xlu1 %831  ;;  %v830_v10 = vpop.permute.xlu0 %829 }
 0x277   :  { %v971_v19 = vcombine.low %v947_v4, %v963_v7  ;;  %v972_v11 = vcombine.high %v947_v4, %v963_v7  ;;  %v987_v12 = vcombine.low %v954_v5, %v970_v13  ;;  %v988_v6 = vcombine.high %v954_v5, %v970_v13 }
 0x279   :  { %v979_v28 = vrot.slane %v971_v19, %v9487_v35  ;;  %v986_v8 = vrot.slane %v972_v11, %v9487_v35  ;;  %v995_v29 = vrot.slane %v987_v12, %v9487_v35  ;;  %v1002_v30 = vrot.slane %v988_v6, %v9487_v35 }
 0x27a   :  { %v848_v33 = vpop.permute.xlu1 %847  ;;  %v828_v41 = vpop.permute.xlu0 %827 }
 0x27b   :  { %v887_v39 = vcombine.low %v832_v14, %v848_v33  ;;  %v888_v40 = vcombine.high %v832_v14, %v848_v33  ;;  %v1211_v42 = vcombine.low %v979_v28, %v986_v8  ;;  %v8420_v43 = vcombine.high %v979_v28, %v986_v8 }
 0x27c   :  { %v1227_v49 = vcombine.low %v995_v29, %v1002_v30  ;;  %v8421_v51 = vcombine.high %v995_v29, %v1002_v30 }
 0x27d   :  { %v895_v52 = vrot.slane %v887_v39, %v9473_v27  ;;  %v902_v53 = vrot.slane %v888_v40, %v9473_v27  ;;  %v1218_v54 = vrot.slane %v1211_v42, %v9473_v27  ;;  %v1226_v55 = vrot.slane %v8420_v43, %v9473_v27 }
 0x27e   :  { %v838_v56 = vpop.permute.xlu1 %837  ;;  %v9689_v4 = vrot.slane %v1227_v49, %v9473_v27  ;;  %v9692_v5 = vrot.slane %v8421_v51, %v9473_v27 }
 0x27f   :  { %v903_v14 = vcombine.low %v879_v44, %v895_v52  ;;  %v904_v19 = vcombine.high %v879_v44, %v895_v52  ;;  %v919_v11 = vcombine.low %v886_v48, %v902_v53  ;;  %v920_v12 = vcombine.high %v886_v48, %v902_v53  ;;  %v846_v6 = vpop.permute.xlu0 %845 }
 0x280   :  { %v1075_v23 = vcombine.low %v830_v10, %v846_v6  ;;  %v1076_v24 = vcombine.high %v830_v10, %v846_v6  ;;  %v1243_v28 = vcombine.low %v1218_v54, %v1226_v55  ;;  %v1244_v8 = vcombine.high %v1218_v54, %v1226_v55 }
 0x281   :  { %v911_v29 = vrot.slane %v903_v14, %v9487_v35  ;;  %v918_v30 = vrot.slane %v904_v19, %v9487_v35  ;;  %v927_v33 = vrot.slane %v919_v11, %v9487_v35  ;;  %v934_v39 = vrot.slane %v920_v12, %v9487_v35 }
 0x282   :  { %v1083_v40 = vrot.slane %v1075_v23, %v9473_v27  ;;  %v1090_v42 = vrot.slane %v1076_v24, %v9473_v27  ;;  %v854_v43 = vpop.permute.xlu1 %853  ;;  %v1251_v44 = vrot.slane %v1243_v28, %v9487_v35  ;;  %v1259_v10 = vcombine.low %v9689_v4, %v9692_v5 }
 0x283   :  { %v1143_v48 = vcombine.low %v911_v29, %v918_v30  ;;  %v8418_v49 = vcombine.high %v911_v29, %v918_v30  ;;  %v1159_v51 = vcombine.low %v927_v33, %v934_v39  ;;  %v8419_v52 = vcombine.high %v927_v33, %v934_v39  ;;  %v844_v53 = vpop.permute.xlu0 %843 }
 0x284   :  { %v1091_v54 = vcombine.low %v838_v56, %v854_v43  ;;  %v1092_v55 = vcombine.high %v838_v56, %v854_v43  ;;  %v1007_v14 = vcombine.low %v828_v41, %v844_v53  ;;  %v1008_v19 = vcombine.high %v828_v41, %v844_v53 }
 0x285   :  { %v1260_v11 = vcombine.high %v9689_v4, %v9692_v5  ;;  %v1267_v12 = vrot.slane %v1259_v10, %v9487_v35  ;;  %v1150_v6 = vrot.slane %v1143_v48, %v9473_v27  ;;  %v1158_v23 = vrot.slane %v8418_v49, %v9473_v27 }
 0x286   :  { %v1099_v24 = vrot.slane %v1091_v54, %v9473_v27  ;;  %v1106_v28 = vrot.slane %v1092_v55, %v9473_v27  ;;  %v1015_v29 = vrot.slane %v1007_v14, %v9473_v27  ;;  %v1022_v30 = vrot.slane %v1008_v19, %v9473_v27  ;;  %v836_v56 = vpop.permute.xlu1 %835 }
 0x287   :  { %v1275_v33 = vcombine.low %v1251_v44, %v1267_v12  ;;  %v1276_v41 = vcombine.high %v1251_v44, %v1267_v12  ;;  %v9716_v39 = vpop.permute.xlu0 %1417  ;;  %v1166_v4 = vrot.slane %v1159_v51, %v9473_v27  ;;  %v1174_v5 = vrot.slane %v8419_v52, %v9473_v27 }
 0x288   :  { %v1107_v43 = vcombine.low %v1083_v40, %v1099_v24  ;;  %v1108_v10 = vcombine.high %v1083_v40, %v1099_v24  ;;  %v1123_v48 = vcombine.low %v1090_v42, %v1106_v28  ;;  %v1124_v49 = vcombine.high %v1090_v42, %v1106_v28 }
 0x289   :  { %8762 = vmatprep.subr.msk.mxu1 %vm2007_vm1, %v1275_v33  ;;  %8769 = vmatprep.subr.msk.mxu0 %vm2007_vm1, %v1276_v41  ;;  %v1175_v53 = vcombine.low %v1150_v6, %v1158_v23  ;;  %v1191_v54 = vcombine.low %v1166_v4, %v1174_v5  ;;  %v1258_v55 = vrot.slane %v1244_v8, %v9487_v35 }
 0x28a   :  { %v1115_v44 = vrot.slane %v1107_v43, %v9487_v35  ;;  %v1122_v14 = vrot.slane %v1108_v10, %v9487_v35  ;;  %v9726_v51 = vrot.slane %v1123_v48, %v9487_v35  ;;  %v9729_v52 = vrot.slane %v1124_v49, %v9487_v35  ;;  %8763 = vmatpush3.xpose.msk.msra.mxu1 %vm2007_vm1, %v1275_v33  ;;  %v852_v40 = vpop.permute.xlu1 %851 }
 0x28b   :  { %8770 = vmatpush3.xpose.msk.msra.mxu0 %vm2007_vm1, %v1276_v41  ;;  %v1023_v42 = vcombine.low %v836_v56, %v852_v40  ;;  %v1024_v19 = vcombine.high %v836_v56, %v852_v40  ;;  %v1416_v12 = vpop.permute.xlu0 %1415  ;;  %v1183_v8 = vrot.slane %v1175_v53, %v9487_v35  ;;  %v1199_v24 = vrot.slane %v1191_v54, %v9487_v35 }
 0x28c   :  { %v1347_v28 = vcombine.low %v1115_v44, %v1122_v14  ;;  %v8424_v43 = vcombine.high %v1115_v44, %v1122_v14  ;;  %v1363_v10 = vcombine.low %v9726_v51, %v9729_v52  ;;  %v8425_v48 = vcombine.high %v9726_v51, %v9729_v52 }
 0x28d   :  { %v1031_v33 = vrot.slane %v1023_v42, %v9473_v27  ;;  %v1038_v49 = vrot.slane %v1024_v19, %v9473_v27  ;;  %v1207_v41 = vcombine.low %v1183_v8, %v1199_v24  ;;  %v1208_v36 = vcombine.high %v1183_v8, %v1199_v24 }
 0x28e   :  { %v1426_v56 = vpop.permute.xlu1 %1425  ;;  %v1274_v40 = vrot.slane %v1260_v11, %v9487_v35  ;;  %v1176_v53 = vcombine.high %v1150_v6, %v1158_v23  ;;  %v1192_v34 = vcombine.high %v1166_v4, %v1174_v5  ;;  %v9743_v54 = vrot.slane %v1347_v28, %v9473_v27 }
 0x28f   :  { %v1039_v44 = vcombine.low %v1015_v29, %v1031_v33  ;;  %v1040_v14 = vcombine.high %v1015_v29, %v1031_v33  ;;  %v1055_v13 = vcombine.low %v1022_v30, %v1038_v49  ;;  %v1056_v7 = vcombine.high %v1022_v30, %v1038_v49  ;;  %8764 = vmatprep.subr.msk.mxu1 %vm2007_vm1, %v1207_v41  ;;  %v1432_v51 = vpop.permute.xlu0 %1431 }
 0x290   :  { %8771 = vmatprep.subr.msk.mxu0 %vm2007_vm1, %v1208_v36  ;;  %8765 = vmatpush3.xpose.msk.msra.mxu1 %vm2007_vm1, %v1207_v41  ;;  %v1277_v52 = vcombine.low %v1258_v55, %v1274_v40  ;;  %v1278_v42 = vcombine.high %v1258_v55, %v1274_v40  ;;  %v1190_v11 = vrot.slane %v1176_v53, %v9487_v35 }
 0x291   :  { %v1047_v6 = vrot.slane %v1039_v44, %v9487_v35  ;;  %v1054_v23 = vrot.slane %v1040_v14, %v9487_v35  ;;  %v1063_v4 = vrot.slane %v1055_v13, %v9487_v35  ;;  %v1070_v29 = vrot.slane %v1056_v7, %v9487_v35  ;;  %8772 = vmatpush3.xpose.msk.msra.mxu0 %vm2007_vm1, %v1208_v36 }
 0x292   :  { %v1463_v30 = vcombine.low %v1416_v12, %v1432_v51  ;;  %v1464_v5 = vcombine.high %v1416_v12, %v1432_v51  ;;  %8776 = vmatprep.subr.msk.mxu1 %vm2007_vm1, %v1277_v52  ;;  %8783 = vmatprep.subr.msk.mxu0 %vm2007_vm1, %v1278_v42  ;;  %v1434_v19 = vpop.permute.xlu1 %1433  ;;  %v1206_v55 = vrot.slane %v1192_v34, %v9487_v35 }
 0x293   :  { %v1279_v8 = vcombine.low %v1047_v6, %v1054_v23  ;;  %v8422_v24 = vcombine.high %v1047_v6, %v1054_v23  ;;  %v1295_v28 = vcombine.low %v1063_v4, %v1070_v29  ;;  %v8423_v33 = vcombine.high %v1063_v4, %v1070_v29  ;;  %8767 = vmatmul.mubr.msk.f32.vlgmr.msra.gmra.mxu1 %vm2007_vm1, %v683_v46 }
 0x294   :  { %v9762_v36 = vrot.slane %v1463_v30, %v9473_v27  ;;  %v9765_v7 = vrot.slane %v1464_v5, %v9473_v27  ;;  %8774 = vmatmul.mubr.msk.f32.vlgmr.msra.gmra.mxu0 %vm2007_vm1, %v684_v47  ;;  %v1531_v34 = vcombine.low %v9716_v39, %v1434_v19  ;;  %v1532_v13 = vcombine.high %v9716_v39, %v1434_v19 }
 0x295   :  { %8777 = vmatpush3.xpose.msk.msra.mxu1 %vm2007_vm1, %v1277_v52  ;;  %8780 = vmatprep.mubr.msk.f32.mxu1 %vm2007_vm1, %v617_v3  ;;  %v1209_v46 = vcombine.low %v1190_v11, %v1206_v55  ;;  %v1210_v12 = vcombine.high %v1190_v11, %v1206_v55  ;;  %v1362_v49 = vrot.slane %v8424_v43, %v9473_v27 }
 0x296   :  { %v1539_v41 = vrot.slane %v1531_v34, %v9473_v27  ;;  %v1546_v31 = vrot.slane %v1532_v13, %v9473_v27  ;;  %8784 = vmatpush3.xpose.msk.msra.mxu0 %vm2007_vm1, %v1278_v42  ;;  %8787 = vmatprep.mubr.msk.f32.mxu0 %vm2007_vm1, %v618_v1  ;;  %v1442_v32 = vpop.permute.xlu1 %1441  ;;  %v1370_v47 = vrot.slane %v1363_v10, %v9473_v27 }
 0x297   :  { %8778 = vmatprep.subr.msk.mxu1 %vm2007_vm1, %v1209_v46  ;;  %8785 = vmatprep.subr.msk.mxu0 %vm2007_vm1, %v1210_v12  ;;  %v1547_v3 = vcombine.low %v1426_v56, %v1442_v32  ;;  %v1548_v39 = vcombine.high %v1426_v56, %v1442_v32  ;;  %v1378_v43 = vrot.slane %v8425_v48, %v9473_v27 }
 0x298   :  { %v1379_v40 = vcombine.low %v9743_v54, %v1362_v49  ;;  %v1286_v53 = vrot.slane %v1279_v8, %v9473_v27  ;;  %v1294_v44 = vrot.slane %v8422_v24, %v9473_v27  ;;  %v1302_v0 = vrot.slane %v1295_v28, %v9473_v27 }
 0x299   :  { %v1555_v2 = vrot.slane %v1547_v3, %v9473_v27  ;;  %v1562_v1 = vrot.slane %v1548_v39, %v9473_v27  ;;  %8779 = vmatpush3.xpose.msk.msra.mxu1 %vm2007_vm1, %v1209_v46  ;;  %v1395_v10 = vcombine.low %v1370_v47, %v1378_v43  ;;  %v1310_v14 = vrot.slane %v8423_v33, %v9473_v27 }
 0x29a   :  { %8786 = vmatpush3.xpose.msk.msra.mxu0 %vm2007_vm1, %v1210_v12  ;;  %v1387_v48 = vrot.slane %v1379_v40, %v9487_v35  ;;  %v1424_v56 = vpop.permute.xlu1 %1423  ;;  %v1311_v51 = vcombine.low %v1286_v53, %v1294_v44  ;;  %v1380_v52 = vcombine.high %v9743_v54, %v1362_v49  ;;  %v1396_v42 = vcombine.high %v1370_v47, %v1378_v43 }
 0x29b   :  { %v1563_v11 = vcombine.low %v1539_v41, %v1555_v2  ;;  %v1564_v6 = vcombine.high %v1539_v41, %v1555_v2  ;;  %v1579_v23 = vcombine.low %v1546_v31, %v1562_v1  ;;  %v1580_v4 = vcombine.high %v1546_v31, %v1562_v1 }
 0x29c   :  { %v1403_v29 = vrot.slane %v1395_v10, %v9487_v35  ;;  %8781 = vmatmul.mubr.msk.f32.vlgmr.msra.gmra.mxu1 %vm2007_vm1, %v685_v57  ;;  %v1319_v30 = vrot.slane %v1311_v51, %v9487_v35  ;;  %v1327_v5 = vcombine.low %v1302_v0, %v1310_v14  ;;  %v1394_v19 = vrot.slane %v1380_v52, %v9487_v35 }
 0x29d   :  { %v1571_v55 = vrot.slane %v1563_v11, %v9487_v35  ;;  %v1578_v54 = vrot.slane %v1564_v6, %v9487_v35  ;;  %v9811_v8 = vrot.slane %v1579_v23, %v9487_v35  ;;  %v9814_v24 = vrot.slane %v1580_v4, %v9487_v35  ;;  %8788 = vmatmul.mubr.msk.f32.vlgmr.msra.gmra.mxu0 %vm2007_vm1, %v686_v59 }
 0x29e   :  { %v1411_v57 = vcombine.low %v1387_v48, %v1403_v29  ;;  %v1412_v28 = vcombine.high %v1387_v48, %v1403_v29  ;;  %8794 = vmatprep.mubr.msk.f32.mxu1 %vm2007_vm1, %v751_v22  ;;  %8801 = vmatprep.mubr.msk.f32.mxu0 %vm2007_vm1, %v752_v20  ;;  %v1335_v33 = vrot.slane %v1327_v5, %v9487_v35  ;;  %v1440_v34 = vpop.permute.xlu1 %1439 }
 0x29f   :  { %v1803_v13 = vcombine.low %v1571_v55, %v1578_v54  ;;  %v8428_v46 = vcombine.high %v1571_v55, %v1578_v54  ;;  %v1819_v37 = vcombine.low %v9811_v8, %v9814_v24  ;;  %v8429_v38 = vcombine.high %v9811_v8, %v9814_v24 }
 0x2a0   :  { %8790 = vmatprep.subr.msk.mxu1 %vm2007_vm1, %v1411_v57  ;;  %8797 = vmatprep.subr.msk.mxu0 %vm2007_vm1, %v1412_v28  ;;  %v1343_v59 = vcombine.low %v1319_v30, %v1335_v33  ;;  %v1344_v22 = vcombine.high %v1319_v30, %v1335_v33  ;;  %v1479_v60 = vcombine.low %v1424_v56, %v1440_v34 }
 0x2a1   :  { %8791 = vmatpush3.xpose.msk.msra.mxu1 %vm2007_vm1, %v1411_v57  ;;  %8798 = vmatpush3.xpose.msk.msra.mxu0 %vm2007_vm1, %v1412_v28  ;;  %v1480_v15 = vcombine.high %v1424_v56, %v1440_v34  ;;  %v1410_v20 = vrot.slane %v1396_v42, %v9487_v35  ;;  %v1312_v12 = vcombine.high %v1286_v53, %v1294_v44 }
 0x2a2   :  { %8792 = vmatprep.subr.msk.mxu1 %vm2007_vm1, %v1343_v59  ;;  %8799 = vmatprep.subr.msk.mxu0 %vm2007_vm1, %v1344_v22  ;;  %v1487_v49 = vrot.slane %v1479_v60, %v9473_v27  ;;  %v1430_v41 = vpop.permute.xlu1 %1429  ;;  %v1328_v31 = vcombine.high %v1302_v0, %v1310_v14  ;;  %v1810_v32 = vrot.slane %v1803_v13, %v9473_v27  ;;  %v1422_v14 = vpop.permute.xlu0 %1421 }
 0x2a3   :  { %v1494_v47 = vrot.slane %v1480_v15, %v9473_v27  ;;  %v1413_v3 = vcombine.low %v1394_v19, %v1410_v20  ;;  %v1414_v39 = vcombine.high %v1394_v19, %v1410_v20  ;;  %v1326_v43 = vrot.slane %v1312_v12, %v9487_v35 }
 0x2a4   :  { %v1495_v40 = vcombine.low %v9762_v36, %v1487_v49  ;;  %v1496_v53 = vcombine.high %v9762_v36, %v1487_v49  ;;  %v1342_v44 = vrot.slane %v1328_v31, %v9487_v35  ;;  %v1818_v2 = vrot.slane %v8428_v46, %v9473_v27 }
 0x2a5   :  { %v1511_v1 = vcombine.low %v9765_v7, %v1494_v47  ;;  %v1512_v0 = vcombine.high %v9765_v7, %v1494_v47  ;;  %8793 = vmatpush3.xpose.msk.msra.mxu1 %vm2007_vm1, %v1343_v59  ;;  %8800 = vmatpush3.xpose.msk.msra.mxu0 %vm2007_vm1, %v1344_v22  ;;  %v1826_v10 = vrot.slane %v1819_v37, %v9473_v27 }
 0x2a6   :  { %v1503_v48 = vrot.slane %v1495_v40, %v9487_v35  ;;  %v1510_v56 = vrot.slane %v1496_v53, %v9487_v35  ;;  %8804 = vmatprep.subr.msk.mxu1 %vm2007_vm1, %v1413_v3  ;;  %8811 = vmatprep.subr.msk.mxu0 %vm2007_vm1, %v1414_v39  ;;  %v1345_v36 = vcombine.low %v1326_v43, %v1342_v44  ;;  %v1438_v51 = vpop.permute.xlu1 %1437 }
 0x2a7   :  { %v1519_v52 = vrot.slane %v1511_v1, %v9487_v35  ;;  %v1526_v7 = vrot.slane %v1512_v0, %v9487_v35  ;;  %v1346_v42 = vcombine.high %v1326_v43, %v1342_v44  ;;  %v1667_v11 = vcombine.low %v1422_v14, %v1438_v51 }
 0x2a8   :  { %v1735_v6 = vcombine.low %v1503_v48, %v1510_v56  ;;  %v8426_v23 = vcombine.high %v1503_v48, %v1510_v56  ;;  %8795 = vmatmul.mubr.msk.f32.vlgmr.msra.gmra.mxu1 %vm2007_vm1, %v819_v25  ;;  %8802 = vmatmul.mubr.msk.f32.vlgmr.msra.gmra.mxu0 %vm2007_vm1, %v820_v26  ;;  %v1668_v4 = vcombine.high %v1422_v14, %v1438_v51 }
 0x2a9   :  { %v1751_v29 = vcombine.low %v1519_v52, %v1526_v7  ;;  %v8427_v30 = vcombine.high %v1519_v52, %v1526_v7  ;;  %8805 = vmatpush3.xpose.msk.msra.mxu1 %vm2007_vm1, %v1413_v3  ;;  %v11132_v5 = vcombine.low %v9646_v63, %v9656_v16  ;;  %v1675_v19 = vrot.slane %v1667_v11, %v9473_v27 }
 0x2aa   :  { %8812 = vmatpush3.xpose.msk.msra.mxu0 %vm2007_vm1, %v1414_v39  ;;  %v11133_v25 = vcombine.high %v9646_v63, %v9656_v16  ;;  %v1682_v61 = vrot.slane %v1668_v4, %v9473_v27  ;;  %v1834_v62 = vrot.slane %v8429_v38, %v9473_v27  ;;  %v1835_v26 = vcombine.low %v1810_v32, %v1818_v2  ;;  %v1446_v55 = vpop.permute.xlu1 %1445 }
 0x2ab   :  { %8808 = vmatprep.mubr.msk.f32.mxu1 %vm2007_vm1, %v11132_v5  ;;  %8806 = vmatprep.subr.msk.mxu1 %vm2007_vm1, %v1345_v36  ;;  %v1836_v54 = vcombine.high %v1810_v32, %v1818_v2  ;;  %v1683_v8 = vcombine.low %v1430_v41, %v1446_v55  ;;  %v1684_v24 = vcombine.high %v1430_v41, %v1446_v55 }
 0x2ac   :  { %8815 = vmatprep.mubr.msk.f32.mxu0 %vm2007_vm1, %v11133_v25  ;;  %8813 = vmatprep.subr.msk.mxu0 %vm2007_vm1, %v1346_v42  ;;  %v1843_v57 = vrot.slane %v1835_v26, %v9487_v35  ;;  %v1851_v28 = vcombine.low %v1826_v10, %v1834_v62  ;;  %v1852_v33 = vcombine.high %v1826_v10, %v1834_v62 }
 0x2ad   :  { %v1742_v63 = vrot.slane %v1735_v6, %v9473_v27  ;;  %8807 = vmatpush3.xpose.msk.msra.mxu1 %vm2007_vm1, %v1345_v36  ;;  %v1850_v16 = vrot.slane %v1836_v54, %v9487_v35  ;;  %v1691_v34 = vrot.slane %v1683_v8, %v9473_v27  ;;  %v1698_v13 = vrot.slane %v1684_v24, %v9473_v27 }
 0x2ae   :  { %v1750_v46 = vrot.slane %v8426_v23, %v9473_v27  ;;  %8814 = vmatpush3.xpose.msk.msra.mxu0 %vm2007_vm1, %v1346_v42  ;;  %v1859_v37 = vrot.slane %v1851_v28, %v9487_v35  ;;  %v1866_v38 = vrot.slane %v1852_v33, %v9487_v35  ;;  %v1758_v59 = vrot.slane %v1751_v29, %v9473_v27 }
 0x2af   :  { %v1766_v22 = vrot.slane %v8427_v30, %v9473_v27  ;;  %v1699_v60 = vcombine.low %v1675_v19, %v1691_v34  ;;  %v1700_v15 = vcombine.high %v1675_v19, %v1691_v34  ;;  %v1715_v20 = vcombine.low %v1682_v61, %v1698_v13 }
 0x2b0   :  { %v1716_v12 = vcombine.high %v1682_v61, %v1698_v13  ;;  %v11134_v49 = vcombine.low %v9659_v17, %v9662_v18  ;;  %v1867_v41 = vcombine.low %v1843_v57, %v1859_v37  ;;  %v1869_v31 = vcombine.low %v1850_v16, %v1866_v38 }
 0x2b1   :  { %v1767_v32 = vcombine.low %v1742_v63, %v1750_v46  ;;  %v1783_v47 = vcombine.low %v1758_v59, %v1766_v22  ;;  %v11135_v3 = vcombine.high %v9659_v17, %v9662_v18  ;;  %v1707_v39 = vrot.slane %v1699_v60, %v9487_v35 }
 0x2b2   :  { %8809 = vmatmul.mubr.msk.f32.vlgmr.msra.gmra.mxu1 %vm2007_vm1, %v11134_v49  ;;  %v1714_v43 = vrot.slane %v1700_v15, %v9487_v35  ;;  %v1723_v40 = vrot.slane %v1715_v20, %v9487_v35  ;;  %v1730_v53 = vrot.slane %v1716_v12, %v9487_v35  ;;  %8818 = vmatprep.subr.mxu1 %v1867_v41 }
 0x2b3   :  { %8816 = vmatmul.mubr.msk.f32.vlgmr.msra.gmra.mxu0 %vm2007_vm1, %v11135_v3  ;;  %8832 = vmatprep.subr.mxu0 %v1869_v31  ;;  %v1775_v44 = vrot.slane %v1767_v32, %v9487_v35  ;;  %v1791_v2 = vrot.slane %v1783_v47, %v9487_v35  ;;  %v1768_v1 = vcombine.high %v1742_v63, %v1750_v46 }
 0x2b4   :  { %v1939_v0 = vcombine.low %v1707_v39, %v1714_v43  ;;  %v8432_v10 = vcombine.high %v1707_v39, %v1714_v43  ;;  %v1955_v17 = vcombine.low %v1723_v40, %v1730_v53  ;;  %v8433_v18 = vcombine.high %v1723_v40, %v1730_v53  ;;  %8819 = vmatpush3.msra.mxu1 %v1867_v41 }
 0x2b5   :  { %8833 = vmatpush3.msra.mxu0 %v1869_v31  ;;  %v1799_v14 = vcombine.low %v1775_v44, %v1791_v2  ;;  %v1782_v48 = vrot.slane %v1768_v1, %v9487_v35  ;;  %v1784_v56 = vcombine.high %v1758_v59, %v1766_v22  ;;  %v9914_v11 = vcombine.high %v1843_v57, %v1859_v37 }
 0x2b6   :  { %v1946_v36 = vrot.slane %v1939_v0, %v9473_v27  ;;  %v1954_v51 = vrot.slane %v8432_v10, %v9473_v27  ;;  %v1962_v52 = vrot.slane %v1955_v17, %v9473_v27  ;;  %v1970_v7 = vrot.slane %v8433_v18, %v9473_v27 }
 0x2b7   :  { %8820 = vmatprep.subr.mxu1 %v1799_v14  ;;  %v1798_v42 = vrot.slane %v1784_v56, %v9487_v35  ;;  %v9916_v6 = vcombine.high %v1775_v44, %v1791_v2  ;;  %v9918_v23 = vcombine.high %v1850_v16, %v1866_v38 }
 0x2b8   :  { %8821 = vmatpush3.msra.mxu1 %v1799_v14  ;;  %v1971_v4 = vcombine.low %v1946_v36, %v1954_v51  ;;  %v1987_v29 = vcombine.low %v1962_v52, %v1970_v7  ;;  %v1972_v30 = vcombine.high %v1946_v36, %v1954_v51  ;;  %v1988_v5 = vcombine.high %v1962_v52, %v1970_v7 }
 0x2b9   :  { %v1801_v19 = vcombine.low %v1782_v48, %v1798_v42  ;;  %8825 = vmatprep.subr.mxu1 %v9914_v11  ;;  %v9921_v25 = vcombine.high %v1782_v48, %v1798_v42 }
 0x2ba   :  { %v1979_v61 = vrot.slane %v1971_v4, %v9487_v35  ;;  %v1995_v62 = vrot.slane %v1987_v29, %v9487_v35  ;;  %v1986_v26 = vrot.slane %v1972_v30, %v9487_v35  ;;  %v2002_v55 = vrot.slane %v1988_v5, %v9487_v35 }
 0x2bb   :  { %8834 = vmatprep.subr.mxu0 %v1801_v19 }
 0x2bc   :  { %8835 = vmatpush3.msra.mxu0 %v1801_v19  ;;  %v9927_v54 = vcombine.low %v1979_v61, %v1995_v62  ;;  %v9929_v8 = vcombine.high %v1979_v61, %v1995_v62  ;;  %v9931_v24 = vcombine.low %v1986_v26, %v2002_v55  ;;  %v9933_v57 = vcombine.high %v1986_v26, %v2002_v55 }
 0x2be   :  { %8846 = vmatprep.subr.mxu0 %v9927_v54 }
 0x353   :  { %v8768_v28 = vpop.f32.mrf.mxu1 }
 0x354   :  { %v9936_v33 = vmul.f32 0.35355338, %v8768_v28  ;;  %v8775_v63 = vpop.f32.mrf.mxu0 }
 0x355   :  { %v9938_v16 = vmul.f32 0.35355338, %v8775_v63  ;;  %v2086_v34 = vpop.f32.mrf.mxu1 }
 0x356   :  { %v2724_v13 = vsel %vm2720_vm2, %v9936_v33, -inf  ;;  %v9942_v46 = vmul.f32 0.35355338, %v2086_v34  ;;  %v2173_v38 = vpop.f32.mrf.mxu0 }
 0x357   :  { %v2730_v37 = vsel %vm2720_vm2, %v9938_v16, -inf  ;;  %2725 = vmax.xlane.f32.xlu1 %v2724_v13  ;;  %v9946_v59 = vmul.f32 0.35355338, %v2173_v38 }
 0x358   :  { %2731 = vmax.xlane.f32.xlu0 %v2730_v37  ;;  %v2721_v22 = vsel %vm2720_vm2, %v9942_v46, -inf }
 0x359   :  { %v2727_v41 = vsel %vm2720_vm2, %v9946_v59, -inf }
 0x35c   :  { %2722 = vmax.xlane.f32.xlu0 %v2721_v22  ;;  %v8782_v60 = vpop.f32.mrf.mxu1 }
 0x35d   :  { %v8789_v15 = vpop.f32.mrf.mxu0  ;;  %v9952_v12 = vmul.f32 0.35355338, %v8782_v60 }
 0x35e   :  { %v9950_v20 = vmul.f32 0.35355338, %v8789_v15  ;;  %v2260_v31 = vpop.f32.mrf.mxu1 }
 0x35f   :  { %v2347_v49 = vpop.f32.mrf.mxu0  ;;  %v9960_v3 = vmul.f32 0.35355338, %v2260_v31  ;;  %v2736_v39 = vsel %vm2720_vm2, %v9952_v12, -inf }
 0x360   :  { %v9956_v32 = vmul.f32 0.35355338, %v2347_v49  ;;  %v2742_v47 = vsel %vm2720_vm2, %v9950_v20, -inf  ;;  %2728 = vmax.xlane.f32.xlu0 %v2727_v41 }
 0x361   :  { %2743 = vmax.xlane.f32.xlu1 %v2742_v47  ;;  %v2733_v40 = vsel %vm2720_vm2, %v9960_v3, -inf }
 0x362   :  { %v2739_v43 = vsel %vm2720_vm2, %v9956_v32, -inf }
 0x364   :  { %2737 = vmax.xlane.f32.xlu0 %v2736_v39 }
 0x365   :  { %2740 = vmax.xlane.f32.xlu1 %v2739_v43 }
 0x368   :  { %v8796_v53 = vpop.f32.mrf.mxu1  ;;  %v8803_v44 = vpop.f32.mrf.mxu0  ;;  %2734 = vmax.xlane.f32.xlu0 %v2733_v40 }
 0x369   :  { %v9968_v2 = vmul.f32 0.35355338, %v8796_v53  ;;  %v9970_v1 = vmul.f32 0.35355338, %v8803_v44 }
 0x36a   :  { %v2434_v0 = vpop.f32.mrf.mxu1  ;;  %v2521_v10 = vpop.f32.mrf.mxu0 }
 0x36b   :  { %v9972_v17 = vmul.f32 0.35355338, %v2434_v0  ;;  %v9974_v18 = vmul.f32 0.35355338, %v2521_v10  ;;  %v2754_v14 = vsel %vm2720_vm2, %v9970_v1, -inf  ;;  %v2748_v48 = vsel %vm2720_vm2, %v9968_v2, -inf }
 0x36c   :  { %2755 = vmax.xlane.f32.xlu1 %v2754_v14  ;;  %2749 = vmax.xlane.f32.xlu0 %v2748_v48 }
 0x36d   :  { %v2751_v56 = vsel %vm2720_vm2, %v9974_v18, -inf  ;;  %v2745_v36 = vsel %vm2720_vm2, %v9972_v17, -inf }
 0x370   :  { %2752 = vmax.xlane.f32.xlu1 %v2751_v56  ;;  %2746 = vmax.xlane.f32.xlu0 %v2745_v36 }
 0x372   :  { %v8810_v51 = vpop.f32.mrf.mxu1 }
 0x373   :  { %v8817_v52 = vpop.f32.mrf.mxu0  ;;  %v9984_v7 = vmul.f32 0.35355338, %v8810_v51 }
 0x374   :  { %v9986_v42 = vmul.f32 0.35355338, %v8817_v52  ;;  %v2608_v4 = vpop.f32.mrf.mxu1 }
 0x375   :  { %v9988_v29 = vmul.f32 0.35355338, %v2608_v4  ;;  %v2695_v30 = vpop.f32.mrf.mxu0  ;;  %v2760_v5 = vsel %vm2720_vm2, %v9984_v7, -inf }
 0x376   :  { %v9992_v19 = vmul.f32 0.35355338, %v2695_v30  ;;  %v2766_v61 = vsel %vm2720_vm2, %v9986_v42, -inf  ;;  %2761 = vmax.xlane.f32.xlu0 %v2760_v5 }
 0x377   :  { %2767 = vmax.xlane.f32.xlu1 %v2766_v61  ;;  %v2757_v62 = vsel %vm2720_vm2, %v9988_v29, -inf }
 0x378   :  { %v2763_v26 = vsel %vm2720_vm2, %v9992_v19, -inf }
 0x37a   :  { %2758 = vmax.xlane.f32.xlu0 %v2757_v62 }
 0x37b   :  { %2764 = vmax.xlane.f32.xlu1 %v2763_v26 }
 0x38c   :  { %1427 = vrot.lane.b32.xlu1 %v9503_v50, %s9305_s19 }
 0x390   :  { %1419 = vrot.lane.b32.xlu0 %v9428_v9, %s9305_s19 }
 0x3e0   :  { %v2726_v55 = vpop.xlane.xlu1 %2725 }
 0x3e1   :  { %v2770_v28 = vsub.f32 %v9936_v33, %v2726_v55  ;;  %v2732_v63 = vpop.xlane.xlu0 %2731 }
 0x3e2   :  { %v2772_v34 = vsub.f32 %v9938_v16, %v2732_v63 }
 0x3e3   :  { %v2787_v13 = vmul.f32 1.442695, %v2770_v28 }
 0x3e4   :  { %v2791_v37 = vmul.f32 1.442695, %v2772_v34 }
 0x3e5   :  { %9065 = vpow2.f32 %v2787_v13  ;;  %v2723_v38 = vpop.xlane.xlu0 %2722 }
 0x3e6   :  { %v2769_v22 = vsub.f32 %v9942_v46, %v2723_v38  ;;  %9067 = vpow2.f32 %v2791_v37 }
 0x3e8   :  { %v2785_v60 = vmul.f32 1.442695, %v2769_v22 }
 0x3e9   :  { %v2729_v15 = vpop.xlane.xlu0 %2728 }
 0x3ea   :  { %9069 = vpow2.f32 %v2785_v60  ;;  %v2744_v50 = vpop.xlane.xlu1 %2743  ;;  %v2771_v49 = vsub.f32 %v9946_v59, %v2729_v15 }
 0x3eb   :  { %v2776_v9 = vsub.f32 %v9950_v20, %v2744_v50 }
 0x3ec   :  { %v2789_v41 = vmul.f32 1.442695, %v2771_v49 }
 0x3ed   :  { %v2799_v33 = vmul.f32 1.442695, %v2776_v9  ;;  %v2738_v31 = vpop.xlane.xlu0 %2737 }
 0x3ee   :  { %9071 = vpow2.f32 %v2789_v41  ;;  %v2741_v16 = vpop.xlane.xlu1 %2740  ;;  %v2774_v47 = vsub.f32 %v9952_v12, %v2738_v31 }
 0x3ef   :  { %9073 = vpow2.f32 %v2799_v33  ;;  %v2775_v39 = vsub.f32 %v9956_v32, %v2741_v16 }
 0x3f0   :  { %v2795_v46 = vmul.f32 1.442695, %v2774_v47 }
 0x3f1   :  { %v2797_v43 = vmul.f32 1.442695, %v2775_v39  ;;  %v2735_v40 = vpop.xlane.xlu0 %2734 }
 0x3f2   :  { %v10011_v53 = vpop.eup %9065  ;;  %9075 = vpow2.f32 %v2795_v46  ;;  %v2773_v59 = vsub.f32 %v9960_v3, %v2735_v40 }
 0x3f3   :  { %9077 = vpow2.f32 %v2797_v43  ;;  %v2820_v20 = vsel %vm2720_vm2, %v10011_v53, 0.0  ;;  %v10016_v44 = vpop.eup %9067 }
 0x3f4   :  { %v2793_v0 = vmul.f32 1.442695, %v2773_v59  ;;  %2821 = vadd.xlane.f32.xlu1 %v2820_v20  ;;  %v2826_v3 = vsel %vm2720_vm2, %v10016_v44, 0.0 }
 0x3f5   :  { %v2756_v12 = vpop.xlane.xlu1 %2755  ;;  %v2750_v10 = vpop.xlane.xlu0 %2749 }
 0x3f6   :  { %v2780_v32 = vsub.f32 %v9970_v1, %v2756_v12  ;;  %9079 = vpow2.f32 %v2793_v0  ;;  %v2778_v14 = vsub.f32 %v9968_v2, %v2750_v10 }
 0x3f7   :  { %v10020_v48 = vpop.eup %9069 }
 0x3f8   :  { %v2807_v56 = vmul.f32 1.442695, %v2780_v32  ;;  %v2803_v36 = vmul.f32 1.442695, %v2778_v14  ;;  %2827 = vadd.xlane.f32.xlu1 %v2826_v3  ;;  %v2817_v51 = vsel %vm2720_vm2, %v10020_v48, 0.0 }
 0x3f9   :  { %v2753_v52 = vpop.xlane.xlu1 %2752  ;;  %2818 = vadd.xlane.f32.xlu0 %v2817_v51  ;;  %v2747_v4 = vpop.xlane.xlu0 %2746 }
 0x3fa   :  { %9081 = vpow2.f32 %v2807_v56  ;;  %v2779_v1 = vsub.f32 %v9974_v18, %v2753_v52  ;;  %v2777_v30 = vsub.f32 %v9972_v17, %v2747_v4 }
 0x3fb   :  { %v10028_v2 = vpop.eup %9071  ;;  %9083 = vpow2.f32 %v2803_v36 }
 0x3fc   :  { %v10030_v5 = vpop.eup %9073  ;;  %v2801_v61 = vmul.f32 1.442695, %v2777_v30  ;;  %v2823_v62 = vsel %vm2720_vm2, %v10028_v2, 0.0  ;;  %v2805_v26 = vmul.f32 1.442695, %v2779_v1 }
 0x3fd   :  { %v2838_v55 = vsel %vm2720_vm2, %v10030_v5, 0.0  ;;  %2824 = vadd.xlane.f32.xlu0 %v2823_v62 }
 0x3fe   :  { %2839 = vadd.xlane.f32.xlu1 %v2838_v55  ;;  %9085 = vpow2.f32 %v2801_v61 }
 0x3ff   :  { %v2762_v28 = vpop.xlane.xlu0 %2761  ;;  %v10037_v17 = vpop.eup %9075  ;;  %9087 = vpow2.f32 %v2805_v26 }
 0x400   :  { %v2768_v63 = vpop.xlane.xlu1 %2767  ;;  %v2782_v18 = vsub.f32 %v9984_v7, %v2762_v28  ;;  %v10040_v13 = vpop.eup %9077  ;;  %v2832_v37 = vsel %vm2720_vm2, %v10037_v17, 0.0 }
 0x401   :  { %v2784_v34 = vsub.f32 %v9986_v42, %v2768_v63  ;;  %v2835_v60 = vsel %vm2720_vm2, %v10040_v13, 0.0  ;;  %2833 = vadd.xlane.f32.xlu0 %v2832_v37 }
 0x402   :  { %v2811_v22 = vmul.f32 1.442695, %v2782_v18  ;;  %2836 = vadd.xlane.f32.xlu1 %v2835_v60 }
 0x403   :  { %v2815_v38 = vmul.f32 1.442695, %v2784_v34  ;;  %v2759_v15 = vpop.xlane.xlu0 %2758  ;;  %v10047_v49 = vpop.eup %9079 }
 0x404   :  { %v2765_v50 = vpop.xlane.xlu1 %2764  ;;  %v2781_v7 = vsub.f32 %v9988_v29, %v2759_v15  ;;  %v2829_v9 = vsel %vm2720_vm2, %v10047_v49, 0.0 }
 0x405   :  { %9089 = vpow2.f32 %v2815_v38  ;;  %v2783_v42 = vsub.f32 %v9992_v19, %v2765_v50  ;;  %2830 = vadd.xlane.f32.xlu0 %v2829_v9 }
 0x406   :  { %9091 = vpow2.f32 %v2811_v22  ;;  %v2809_v33 = vmul.f32 1.442695, %v2781_v7 }
 0x407   :  { %v2813_v41 = vmul.f32 1.442695, %v2783_v42  ;;  %v10052_v31 = vpop.eup %9081  ;;  %v10090_v36 = vpop.permute.xlu0 %1419 }
 0x408   :  { %v10054_v16 = vpop.eup %9083  ;;  %v2850_v29 = vsel %vm2720_vm2, %v10052_v31, 0.0  ;;  %v10088_v3 = vpop.permute.xlu1 %1427 }
 0x409   :  { %9093 = vpow2.f32 %v2813_v41  ;;  %2851 = vadd.xlane.f32.xlu1 %v2850_v29  ;;  %v2844_v19 = vsel %vm2720_vm2, %v10054_v16, 0.0 }
 0x40a   :  { %9095 = vpow2.f32 %v2809_v33  ;;  %2845 = vadd.xlane.f32.xlu0 %v2844_v19 }
 0x40b   :  { %v10060_v47 = vpop.eup %9085 }
 0x40c   :  { %v2841_v39 = vsel %vm2720_vm2, %v10060_v47, 0.0  ;;  %v10064_v46 = vpop.eup %9087 }
 0x40d   :  { %v2847_v59 = vsel %vm2720_vm2, %v10064_v46, 0.0 }
 0x40e   :  { %2842 = vadd.xlane.f32.xlu0 %v2841_v39 }
 0x412   :  { %v10066_v43 = vpop.eup %9089  ;;  %2848 = vadd.xlane.f32.xlu0 %v2847_v59 }
 0x413   :  { %v2862_v40 = vsel %vm2720_vm2, %v10066_v43, 0.0  ;;  %v10072_v20 = vpop.eup %9091 }
 0x414   :  { %2863 = vadd.xlane.f32.xlu1 %v2862_v40  ;;  %v2856_v10 = vsel %vm2720_vm2, %v10072_v20, 0.0 }
 0x416   :  { %v10074_v0 = vpop.eup %9093  ;;  %2857 = vadd.xlane.f32.xlu0 %v2856_v10 }
 0x417   :  { %v2859_v12 = vsel %vm2720_vm2, %v10074_v0, 0.0  ;;  %v10080_v32 = vpop.eup %9095 }
 0x418   :  { %2860 = vadd.xlane.f32.xlu1 %v2859_v12  ;;  %v2853_v14 = vsel %vm2720_vm2, %v10080_v32, 0.0 }
 0x41a   :  { %2854 = vadd.xlane.f32.xlu0 %v2853_v14 }
 0x429   :  { %1443 = vrot.lane.b32.xlu1 %v9515_v58, %s9305_s19 }
 0x430   :  { %1435 = vrot.lane.b32.xlu0 %v9499_v45, %s9305_s19 }
 0x47d   :  { %v2822_v56 = vpop.xlane.xlu1 %2821 }
 0x47e   :  { %9097 = vrcp.f32 %v2822_v56 }
 0x481   :  { %v2828_v51 = vpop.xlane.xlu1 %2827 }
 0x482   :  { %v2819_v52 = vpop.xlane.xlu0 %2818 }
 0x483   :  { %9099 = vrcp.f32 %v2819_v52 }
 0x484   :  { %9101 = vrcp.f32 %v2828_v51 }
 0x486   :  { %v2825_v4 = vpop.xlane.xlu0 %2824 }
 0x487   :  { %v2840_v1 = vpop.xlane.xlu1 %2839  ;;  %9103 = vrcp.f32 %v2825_v4 }
 0x488   :  { %9105 = vrcp.f32 %v2840_v1 }
 0x48a   :  { %v2834_v30 = vpop.xlane.xlu0 %2833 }
 0x48b   :  { %v2837_v61 = vpop.xlane.xlu1 %2836  ;;  %v9098_v45 = vpop.eup %9097 }
 0x48c   :  { %9107 = vrcp.f32 %v2837_v61  ;;  %v2868_v55 = vmul.f32 %v9098_v45, %v10011_v53 }
 0x48d   :  { %9109 = vrcp.f32 %v2834_v30 }
 0x48e   :  { %v2831_v58 = vpop.xlane.xlu0 %2830 }
 0x48f   :  { %9111 = vrcp.f32 %v2831_v58 }
 0x490   :  { %v9100_v62 = vpop.eup %9099 }
 0x491   :  { %v2866_v26 = vmul.f32 %v9100_v62, %v10020_v48  ;;  %v9102_v28 = vpop.eup %9101 }
 0x492   :  { %v2872_v37 = vmul.f32 %v9102_v28, %v10016_v44  ;;  %v2852_v38 = vpop.xlane.xlu1 %2851 }
 0x493   :  { %v2846_v63 = vpop.xlane.xlu0 %2845  ;;  %8822 = vmatprep.mubr.msk.f32.mxu1 %vm2720_vm2, %v2866_v26 }
 0x494   :  { %v9104_v18 = vpop.eup %9103  ;;  %8823 = vmatmul.mubr.msk.f32.vlgmr.msra.gmra.mxu1 %vm2720_vm2, %v2868_v55 }
 0x495   :  { %8826 = vmatpush3.msra.mxu1 %v9914_v11  ;;  %v2870_v34 = vmul.f32 %v9104_v18, %v10028_v2  ;;  %v9106_v53 = vpop.eup %9105 }
 0x496   :  { %8827 = vmatprep.subr.mxu1 %v9916_v6  ;;  %v2880_v60 = vmul.f32 %v9106_v53, %v10030_v5 }
 0x497   :  { %8828 = vmatpush3.msra.mxu1 %v9916_v6  ;;  %v2843_v48 = vpop.xlane.xlu0 %2842  ;;  %8829 = vmatprep.mubr.msk.f32.mxu1 %vm2720_vm2, %v2870_v34 }
 0x498   :  { %9113 = vrcp.f32 %v2843_v48  ;;  %8839 = vmatprep.subr.mxu1 %v9918_v23  ;;  %8830 = vmatmul.mubr.msk.f32.vlgmr.msra.gmra.mxu1 %vm2720_vm2, %v2872_v37 }
 0x499   :  { %v9108_v22 = vpop.eup %9107  ;;  %8840 = vmatpush3.msra.mxu1 %v9918_v23 }
 0x49a   :  { %8841 = vmatprep.subr.mxu1 %v9921_v25  ;;  %v2878_v11 = vmul.f32 %v9108_v22, %v10040_v13  ;;  %v9110_v44 = vpop.eup %9109 }
 0x49b   :  { %8842 = vmatpush3.msra.mxu1 %v9921_v25  ;;  %v2849_v6 = vpop.xlane.xlu0 %2848  ;;  %v2876_v13 = vmul.f32 %v9110_v44, %v10037_v17 }
 0x49c   :  { %v9112_v15 = vpop.eup %9111  ;;  %8843 = vmatprep.mubr.msk.f32.mxu1 %vm2720_vm2, %v2878_v11  ;;  %8853 = vmatprep.subr.mxu1 %v9929_v8  ;;  %9115 = vrcp.f32 %v2849_v6 }
 0x49d   :  { %v2864_v2 = vpop.xlane.xlu1 %2863  ;;  %8844 = vmatmul.mubr.msk.f32.vlgmr.msra.gmra.mxu1 %vm2720_vm2, %v2880_v60  ;;  %v2874_v23 = vmul.f32 %v9112_v15, %v10047_v49  ;;  %9117 = vrcp.f32 %v2852_v38 }
 0x49e   :  { %8854 = vmatpush3.msra.mxu1 %v9929_v8  ;;  %9119 = vrcp.f32 %v2846_v63 }
 0x49f   :  { %v2858_v7 = vpop.xlane.xlu0 %2857  ;;  %8836 = vmatprep.mubr.msk.f32.mxu0 %vm2720_vm2, %v2874_v23  ;;  %9121 = vrcp.f32 %v2864_v2 }
 0x4a0   :  { %8837 = vmatmul.mubr.msk.f32.vlgmr.msra.gmra.mxu0 %vm2720_vm2, %v2876_v13 }
 0x4a1   :  { %v2861_v50 = vpop.xlane.xlu1 %2860  ;;  %8847 = vmatpush3.msra.mxu0 %v9927_v54 }
 0x4a3   :  { %v2855_v5 = vpop.xlane.xlu0 %2854 }
 0x4a4   :  { %9123 = vrcp.f32 %v2855_v5 }
 0x4a5   :  { %v1444_v25 = vpop.permute.xlu1 %1443  ;;  %v9114_v42 = vpop.eup %9113  ;;  %9125 = vrcp.f32 %v2861_v50 }
 0x4a6   :  { %v1615_v9 = vcombine.low %v10088_v3, %v1444_v25  ;;  %v1616_v41 = vcombine.high %v10088_v3, %v1444_v25  ;;  %v2882_v49 = vmul.f32 %v9114_v42, %v10060_v47  ;;  %9127 = vrcp.f32 %v2858_v7 }
 0x4a7   :  { %v1436_v8 = vpop.permute.xlu0 %1435 }
 0x4a8   :  { %v1599_v17 = vcombine.low %v10090_v36, %v1436_v8  ;;  %v1600_v33 = vcombine.high %v10090_v36, %v1436_v8  ;;  %8850 = vmatprep.mubr.msk.f32.mxu0 %vm2720_vm2, %v2882_v49  ;;  %v1623_v29 = vrot.slane %v1615_v9, %v9473_v27  ;;  %v1630_v19 = vrot.slane %v1616_v41, %v9473_v27 }
 0x4a9   :  { %v9116_v54 = vpop.eup %9115 }
 0x4aa   :  { %v1607_v39 = vrot.slane %v1599_v17, %v9473_v27  ;;  %v1614_v40 = vrot.slane %v1600_v33, %v9473_v27  ;;  %v2886_v47 = vmul.f32 %v9116_v54, %v10064_v46  ;;  %v9118_v62 = vpop.eup %9117 }
 0x4ab   :  { %v9120_v28 = vpop.eup %9119  ;;  %v2888_v11 = vmul.f32 %v9118_v62, %v10052_v31 }
 0x4ac   :  { %v1631_v59 = vcombine.low %v1607_v39, %v1623_v29  ;;  %v1632_v12 = vcombine.high %v1607_v39, %v1623_v29  ;;  %v1647_v10 = vcombine.low %v1614_v40, %v1630_v19  ;;  %v1648_v14 = vcombine.high %v1614_v40, %v1630_v19  ;;  %8857 = vmatprep.mubr.msk.f32.mxu1 %vm2720_vm2, %v2886_v47  ;;  %v9122_v63 = vpop.eup %9121 }
 0x4ad   :  { %v2884_v2 = vmul.f32 %v9120_v28, %v10054_v16  ;;  %v2896_v50 = vmul.f32 %v9122_v63, %v10066_v43  ;;  %v4151_v43 = vld [vmem:[%s11128_s3 + $0x8] sm:$0xff] }
 0x4ae   :  { %v1639_v3 = vrot.slane %v1631_v59, %v9487_v35  ;;  %v1646_v56 = vrot.slane %v1632_v12, %v9487_v35  ;;  %v1655_v36 = vrot.slane %v1647_v10, %v9487_v35  ;;  %v1662_v51 = vrot.slane %v1648_v14, %v9487_v35 }
 0x4b0   :  { %v1871_v52 = vcombine.low %v1639_v3, %v1646_v56  ;;  %v8430_v4 = vcombine.high %v1639_v3, %v1646_v56  ;;  %v1887_v1 = vcombine.low %v1655_v36, %v1662_v51  ;;  %v8431_v46 = vcombine.high %v1655_v36, %v1662_v51 }
 0x4b1   :  { %v9124_v48 = vpop.eup %9123 }
 0x4b2   :  { %v1878_v30 = vrot.slane %v1871_v52, %v9473_v27  ;;  %v1886_v61 = vrot.slane %v8430_v4, %v9473_v27  ;;  %v1894_v58 = vrot.slane %v1887_v1, %v9473_v27  ;;  %v1902_v45 = vrot.slane %v8431_v46, %v9473_v27  ;;  %v9126_v44 = vpop.eup %9125 }
 0x4b3   :  { %v9128_v15 = vpop.eup %9127  ;;  %v2890_v23 = vmul.f32 %v9124_v48, %v10080_v32  ;;  %v2894_v31 = vmul.f32 %v9126_v44, %v10074_v0 }
 0x4b4   :  { %v1903_v26 = vcombine.low %v1878_v30, %v1886_v61  ;;  %v1919_v55 = vcombine.low %v1894_v58, %v1902_v45  ;;  %v1904_v37 = vcombine.high %v1878_v30, %v1886_v61  ;;  %v1920_v38 = vcombine.high %v1894_v58, %v1902_v45 }
 0x4b5   :  { %v2892_v32 = vmul.f32 %v9128_v15, %v10072_v20  ;;  %v4150_v20 = vld [vmem:[%s11128_s3] sm:$0xff] }
 0x4b6   :  { %v1911_v18 = vrot.slane %v1903_v26, %v9487_v35  ;;  %v1927_v34 = vrot.slane %v1919_v55, %v9487_v35  ;;  %v1918_v6 = vrot.slane %v1904_v37, %v9487_v35  ;;  %v1934_v60 = vrot.slane %v1920_v38, %v9487_v35 }
 0x4b8   :  { %v1935_v53 = vcombine.low %v1911_v18, %v1927_v34  ;;  %v1936_v22 = vcombine.high %v1911_v18, %v1927_v34  ;;  %v1937_v16 = vcombine.low %v1918_v6, %v1934_v60  ;;  %v1938_v13 = vcombine.high %v1918_v6, %v1934_v60 }
 0x4ba   :  { %8848 = vmatprep.subr.mxu0 %v1935_v53  ;;  %8855 = vmatprep.subr.mxu1 %v1936_v22 }
 0x4bb   :  { %8849 = vmatpush3.msra.mxu0 %v1935_v53  ;;  %8856 = vmatpush3.msra.mxu1 %v1936_v22 }
 0x4bc   :  { %8851 = vmatmul.mubr.msk.f32.vlgmr.msra.gmra.mxu0 %vm2720_vm2, %v2884_v2  ;;  %8858 = vmatmul.mubr.msk.f32.vlgmr.msra.gmra.mxu1 %vm2720_vm2, %v2888_v11 }
 0x4bd   :  { %8860 = vmatprep.subr.mxu0 %v9931_v24  ;;  %8867 = vmatprep.subr.mxu1 %v9933_v57 }
 0x4be   :  { %8861 = vmatpush3.msra.mxu0 %v9931_v24  ;;  %8864 = vmatprep.mubr.msk.f32.mxu0 %vm2720_vm2, %v2890_v23  ;;  %v4152_v24 = vld [vmem:[%s11128_s3 + $0x10] sm:$0xff] }
 0x4bf   :  { %8868 = vmatpush3.msra.mxu1 %v9933_v57  ;;  %8871 = vmatprep.mubr.msk.f32.mxu1 %vm2720_vm2, %v2894_v31  ;;  %v4153_v57 = vld [vmem:[%s11128_s3 + $0x18] sm:$0xff] }
 0x4c0   :  { %8862 = vmatprep.subr.mxu0 %v1937_v16  ;;  %8869 = vmatprep.subr.mxu1 %v1938_v13 }
 0x4c1   :  { %8863 = vmatpush3.msra.mxu0 %v1937_v16  ;;  %8870 = vmatpush3.msra.mxu1 %v1938_v13 }
 0x4c2   :  { %8865 = vmatmul.mubr.msk.f32.vlgmr.msra.gmra.mxu0 %vm2720_vm2, %v2892_v32  ;;  %8872 = vmatmul.mubr.msk.f32.vlgmr.msra.gmra.mxu1 %vm2720_vm2, %v2896_v50 }
 0x4c3   :  { %4167 = vrot.lane.b32.xlu1 %v4152_v24, %s9306_s26  ;;  %4169 = vrot.lane.b32.xlu0 %v4153_v57, %s9306_s26 }
 0x4c7   :  { %4165 = vrot.lane.b32.xlu1 %v4151_v43, %s9306_s26  ;;  %4163 = vrot.lane.b32.xlu0 %v4150_v20, %s9306_s26 }
 0x535   :  { %v4168_v8 = vpop.permute.xlu1 %4167  ;;  %v4170_v33 = vpop.permute.xlu0 %4169 }
 0x536   :  { %8874 = vmatprep.subr.mxu0 %v4170_v33 }
 0x537   :  { %8875 = vmatpush3.msra.mxu0 %v4170_v33 }
 0x538   :  { %8876 = vmatprep.subr.mxu0 %v4168_v8 }
 0x539   :  { %v4166_v56 = vpop.permute.xlu1 %4165  ;;  %8877 = vmatpush3.msra.mxu0 %v4168_v8  ;;  %v4164_v58 = vpop.permute.xlu0 %4163 }
 0x53a   :  { %8878 = vmatprep.subr.mxu0 %v4166_v56 }
 0x53b   :  { %8879 = vmatpush3.msra.mxu0 %v4166_v56 }
 0x53c   :  { %8880 = vmatprep.subr.mxu0 %v4164_v58 }
 0x53d   :  { %8881 = vmatpush3.msra.mxu0 %v4164_v58 }
 0x554   :  { %v8824_v0 = vpop.f32.mrf.mxu1 }
 0x556   :  { %v2969_v7 = vpop.f32.mrf.mxu1 }
 0x558   :  { %v8831_v25 = vpop.f32.mrf.mxu1 }
 0x55a   :  { %v3050_v5 = vpop.f32.mrf.mxu1 }
 0x55d   :  { %v8845_v42 = vpop.f32.mrf.mxu1 }
 0x55e   :  { %v3629_v9 = vcombine.low %v8831_v25, %v8845_v42  ;;  %v3630_v41 = vcombine.high %v8831_v25, %v8845_v42 }
 0x55f   :  { %v3212_v49 = vpop.f32.mrf.mxu1 }
 0x560   :  { %v8838_v17 = vpop.f32.mrf.mxu0  ;;  %v3637_v19 = vrot.slane %v3629_v9, %v9473_v27  ;;  %v3644_v39 = vrot.slane %v3630_v41, %v9473_v27  ;;  %v3561_v40 = vcombine.low %v3050_v5, %v3212_v49  ;;  %v3562_v47 = vcombine.high %v3050_v5, %v3212_v49 }
 0x561   :  { %v3613_v54 = vcombine.low %v8824_v0, %v8838_v17  ;;  %v3614_v29 = vcombine.high %v8824_v0, %v8838_v17 }
 0x562   :  { %v3131_v59 = vpop.f32.mrf.mxu0  ;;  %v3569_v1 = vrot.slane %v3561_v40, %v9473_v27  ;;  %v3576_v46 = vrot.slane %v3562_v47, %v9473_v27 }
 0x563   :  { %v3621_v12 = vrot.slane %v3613_v54, %v9473_v27  ;;  %v3628_v10 = vrot.slane %v3614_v29, %v9473_v27  ;;  %v3545_v14 = vcombine.low %v2969_v7, %v3131_v59  ;;  %v3546_v3 = vcombine.high %v2969_v7, %v3131_v59 }
 0x565   :  { %v3645_v36 = vcombine.low %v3621_v12, %v3637_v19  ;;  %v3646_v51 = vcombine.high %v3621_v12, %v3637_v19  ;;  %v3661_v52 = vcombine.low %v3628_v10, %v3644_v39  ;;  %v3662_v4 = vcombine.high %v3628_v10, %v3644_v39 }
 0x566   :  { %v3553_v30 = vrot.slane %v3545_v14, %v9473_v27  ;;  %v3560_v61 = vrot.slane %v3546_v3, %v9473_v27 }
 0x567   :  { %v3653_v45 = vrot.slane %v3645_v36, %v9487_v35  ;;  %v3660_v62 = vrot.slane %v3646_v51, %v9487_v35  ;;  %v3669_v26 = vrot.slane %v3661_v52, %v9487_v35  ;;  %v3676_v55 = vrot.slane %v3662_v4, %v9487_v35 }
 0x568   :  { %v3577_v28 = vcombine.low %v3553_v30, %v3569_v1  ;;  %v3578_v63 = vcombine.high %v3553_v30, %v3569_v1  ;;  %v3593_v18 = vcombine.low %v3560_v61, %v3576_v46  ;;  %v3594_v34 = vcombine.high %v3560_v61, %v3576_v46 }
 0x569   :  { %v3885_v37 = vcombine.low %v3653_v45, %v3660_v62  ;;  %v8484_v38 = vcombine.high %v3653_v45, %v3660_v62  ;;  %v3901_v48 = vcombine.low %v3669_v26, %v3676_v55  ;;  %v8485_v53 = vcombine.high %v3669_v26, %v3676_v55 }
 0x56a   :  { %v3585_v22 = vrot.slane %v3577_v28, %v9487_v35  ;;  %v3592_v11 = vrot.slane %v3578_v63, %v9487_v35  ;;  %v3601_v44 = vrot.slane %v3593_v18, %v9487_v35  ;;  %v3608_v2 = vrot.slane %v3594_v34, %v9487_v35 }
 0x56b   :  { %v3892_v6 = vrot.slane %v3885_v37, %v9473_v27  ;;  %v3900_v60 = vrot.slane %v8484_v38, %v9473_v27  ;;  %v3908_v15 = vrot.slane %v3901_v48, %v9473_v27  ;;  %v3916_v23 = vrot.slane %v8485_v53, %v9473_v27 }
 0x56c   :  { %v3817_v31 = vcombine.low %v3585_v22, %v3592_v11  ;;  %v8482_v16 = vcombine.high %v3585_v22, %v3592_v11  ;;  %v3833_v13 = vcombine.low %v3601_v44, %v3608_v2  ;;  %v8483_v32 = vcombine.high %v3601_v44, %v3608_v2 }
 0x56d   :  { %v3918_v50 = vcombine.high %v3892_v6, %v3900_v60  ;;  %v3934_v24 = vcombine.high %v3908_v15, %v3916_v23  ;;  %v3917_v57 = vcombine.low %v3892_v6, %v3900_v60  ;;  %v3933_v43 = vcombine.low %v3908_v15, %v3916_v23 }
 0x56e   :  { %v3824_v20 = vrot.slane %v3817_v31, %v9473_v27  ;;  %v3832_v0 = vrot.slane %v8482_v16, %v9473_v27  ;;  %v3840_v7 = vrot.slane %v3833_v13, %v9473_v27  ;;  %v3848_v25 = vrot.slane %v8483_v32, %v9473_v27 }
 0x56f   :  { %v3932_v5 = vrot.slane %v3918_v50, %v9487_v35  ;;  %v3948_v42 = vrot.slane %v3934_v24, %v9487_v35  ;;  %v10197_v9 = vrot.slane %v3917_v57, %v9487_v35  ;;  %v10200_v41 = vrot.slane %v3933_v43, %v9487_v35 }
 0x570   :  { %v3850_v49 = vcombine.high %v3824_v20, %v3832_v0  ;;  %v3866_v8 = vcombine.high %v3840_v7, %v3848_v25  ;;  %v3849_v17 = vcombine.low %v3824_v20, %v3832_v0  ;;  %v3865_v33 = vcombine.low %v3840_v7, %v3848_v25 }
 0x571   :  { %v3952_v54 = vcombine.high %v3932_v5, %v3948_v42  ;;  %v3950_v29 = vcombine.high %v10197_v9, %v10200_v41  ;;  %v3949_v19 = vcombine.low %v10197_v9, %v10200_v41  ;;  %v3951_v10 = vcombine.low %v3932_v5, %v3948_v42 }
 0x572   :  { %v3864_v39 = vrot.slane %v3850_v49, %v9487_v35  ;;  %v3880_v40 = vrot.slane %v3866_v8, %v9487_v35  ;;  %v10209_v47 = vrot.slane %v3849_v17, %v9487_v35  ;;  %v10212_v59 = vrot.slane %v3865_v33, %v9487_v35 }
 0x573   :  { %4127 = vrot.lane.b32.xlu1 %v3952_v54, %s9307_s7  ;;  %4095 = vrot.lane.b32.xlu0 %v3950_v29, %s9297_s25 }
 0x574   :  { %v3881_v12 = vcombine.low %v10209_v47, %v10212_v59  ;;  %v3883_v14 = vcombine.low %v3864_v39, %v3880_v40  ;;  %v3884_v3 = vcombine.high %v3864_v39, %v3880_v40  ;;  %v3882_v56 = vcombine.high %v10209_v47, %v10212_v59 }
 0x577   :  { %4111 = vrot.lane.b32.xlu0 %v3951_v10, %s9308_s8  ;;  %4109 = vrot.lane.b32.xlu1 %v3883_v14, %s9308_s8 }
 0x57b   :  { %4125 = vrot.lane.b32.xlu1 %v3884_v3, %s9307_s7  ;;  %4093 = vrot.lane.b32.xlu0 %v3882_v56, %s9297_s25 }
 0x57c   :  { %v8852_v36 = vpop.f32.mrf.mxu0  ;;  %v8859_v51 = vpop.f32.mrf.mxu1 }
 0x57e   :  { %v3293_v52 = vpop.f32.mrf.mxu0  ;;  %v3374_v4 = vpop.f32.mrf.mxu1 }
 0x582   :  { %v8866_v1 = vpop.f32.mrf.mxu0  ;;  %v8873_v46 = vpop.f32.mrf.mxu1 }
 0x583   :  { %v3749_v30 = vcombine.low %v8852_v36, %v8866_v1  ;;  %v3750_v61 = vcombine.high %v8852_v36, %v8866_v1  ;;  %v3765_v58 = vcombine.low %v8859_v51, %v8873_v46  ;;  %v3766_v45 = vcombine.high %v8859_v51, %v8873_v46 }
 0x584   :  { %v3455_v62 = vpop.f32.mrf.mxu0  ;;  %v3536_v26 = vpop.f32.mrf.mxu1 }
 0x585   :  { %v3757_v55 = vrot.slane %v3749_v30, %v9473_v27  ;;  %v3764_v28 = vrot.slane %v3750_v61, %v9473_v27  ;;  %v3773_v63 = vrot.slane %v3765_v58, %v9473_v27  ;;  %v3780_v18 = vrot.slane %v3766_v45, %v9473_v27 }
 0x586   :  { %v3681_v34 = vcombine.low %v3293_v52, %v3455_v62  ;;  %v3682_v37 = vcombine.high %v3293_v52, %v3455_v62  ;;  %v3697_v38 = vcombine.low %v3374_v4, %v3536_v26  ;;  %v3698_v48 = vcombine.high %v3374_v4, %v3536_v26 }
 0x587   :  { %v3781_v53 = vcombine.low %v3757_v55, %v3773_v63  ;;  %v3782_v22 = vcombine.high %v3757_v55, %v3773_v63  ;;  %v3797_v11 = vcombine.low %v3764_v28, %v3780_v18  ;;  %v3798_v44 = vcombine.high %v3764_v28, %v3780_v18 }
 0x588   :  { %v3689_v2 = vrot.slane %v3681_v34, %v9473_v27  ;;  %v3696_v6 = vrot.slane %v3682_v37, %v9473_v27  ;;  %v3705_v60 = vrot.slane %v3697_v38, %v9473_v27  ;;  %v3712_v15 = vrot.slane %v3698_v48, %v9473_v27 }
 0x589   :  { %v3789_v23 = vrot.slane %v3781_v53, %v9487_v35  ;;  %v3796_v31 = vrot.slane %v3782_v22, %v9487_v35  ;;  %v3805_v16 = vrot.slane %v3797_v11, %v9487_v35  ;;  %v3812_v13 = vrot.slane %v3798_v44, %v9487_v35 }
 0x58a   :  { %v3713_v32 = vcombine.low %v3689_v2, %v3705_v60  ;;  %v3714_v50 = vcombine.high %v3689_v2, %v3705_v60  ;;  %v3729_v24 = vcombine.low %v3696_v6, %v3712_v15  ;;  %v3730_v57 = vcombine.high %v3696_v6, %v3712_v15 }
 0x58b   :  { %v4021_v43 = vcombine.low %v3789_v23, %v3796_v31  ;;  %v8488_v20 = vcombine.high %v3789_v23, %v3796_v31  ;;  %v4037_v0 = vcombine.low %v3805_v16, %v3812_v13  ;;  %v8489_v7 = vcombine.high %v3805_v16, %v3812_v13 }
 0x58c   :  { %v3721_v25 = vrot.slane %v3713_v32, %v9487_v35  ;;  %v3728_v5 = vrot.slane %v3714_v50, %v9487_v35  ;;  %v3737_v42 = vrot.slane %v3729_v24, %v9487_v35  ;;  %v3744_v49 = vrot.slane %v3730_v57, %v9487_v35 }
 0x58d   :  { %v4028_v8 = vrot.slane %v4021_v43, %v9473_v27  ;;  %v4036_v17 = vrot.slane %v8488_v20, %v9473_v27  ;;  %v4044_v33 = vrot.slane %v4037_v0, %v9473_v27  ;;  %v4052_v54 = vrot.slane %v8489_v7, %v9473_v27 }
 0x58e   :  { %v3953_v29 = vcombine.low %v3721_v25, %v3728_v5  ;;  %v8486_v39 = vcombine.high %v3721_v25, %v3728_v5  ;;  %v3969_v40 = vcombine.low %v3737_v42, %v3744_v49  ;;  %v8487_v10 = vcombine.high %v3737_v42, %v3744_v49  ;;  %v8490_v49 = vld [vmem:[#allocation5 + $0x6] ss:$0 sm:$0xff] }
 0x58f   :  { %v4053_v14 = vcombine.low %v4028_v8, %v4036_v17  ;;  %v4054_v3 = vcombine.high %v4028_v8, %v4036_v17  ;;  %v4069_v56 = vcombine.low %v4044_v33, %v4052_v54  ;;  %v4070_v36 = vcombine.high %v4044_v33, %v4052_v54  ;;  %v9225_v54 = vld [vmem:[#allocation2 + $0x8] sm:$0xff] }
 0x590   :  { %v3960_v51 = vrot.slane %v3953_v29, %v9473_v27  ;;  %v3968_v52 = vrot.slane %v8486_v39, %v9473_v27  ;;  %v3976_v4 = vrot.slane %v3969_v40, %v9473_v27  ;;  %v3984_v1 = vrot.slane %v8487_v10, %v9473_v27  ;;  %v9226_v40 = vld [vmem:[#allocation2] sm:$0xff] }
 0x591   :  { %v4061_v46 = vrot.slane %v4053_v14, %v9487_v35  ;;  %v4077_v30 = vrot.slane %v4069_v56, %v9487_v35  ;;  %v4068_v28 = vrot.slane %v4054_v3, %v9487_v35  ;;  %v4084_v63 = vrot.slane %v4070_v36, %v9487_v35 }
 0x592   :  { %v3985_v61 = vcombine.low %v3960_v51, %v3968_v52  ;;  %v4001_v58 = vcombine.low %v3976_v4, %v3984_v1  ;;  %v3986_v45 = vcombine.high %v3960_v51, %v3968_v52  ;;  %v4002_v62 = vcombine.high %v3976_v4, %v3984_v1 }
 0x593   :  { %v4086_v26 = vcombine.high %v4061_v46, %v4077_v30  ;;  %v4085_v55 = vcombine.low %v4061_v46, %v4077_v30  ;;  %v4087_v22 = vcombine.low %v4068_v28, %v4084_v63  ;;  %v4088_v44 = vcombine.high %v4068_v28, %v4084_v63  ;;  %v9227_v30 = vld [vmem:[#allocation2 + $0x18] sm:$0xff] }
 0x594   :  { %v3993_v18 = vrot.slane %v3985_v61, %v9487_v35  ;;  %v4009_v34 = vrot.slane %v4001_v58, %v9487_v35  ;;  %v4000_v48 = vrot.slane %v3986_v45, %v9487_v35  ;;  %v4016_v53 = vrot.slane %v4002_v62, %v9487_v35  ;;  %v9228_v45 = vld [vmem:[#allocation2 + $0x10] sm:$0xff] }
 0x595   :  { %4099 = vrot.lane.b32.xlu1 %v4086_v26, %s9297_s25 }
 0x596   :  { %v4018_v37 = vcombine.high %v3993_v18, %v4009_v34  ;;  %v4017_v38 = vcombine.low %v3993_v18, %v4009_v34  ;;  %v4019_v11 = vcombine.low %v4000_v48, %v4016_v53  ;;  %v4020_v2 = vcombine.high %v4000_v48, %v4016_v53  ;;  %v4357_v18 = vld [vmem:[%s11128_s3 + $0x38] sm:$0xff]  ;;  %v4456_v48 = vld [vmem:[%s11128_s3 + $0x28] sm:$0xff]  ;;  %v4455_v53 = vld [vmem:[%s11128_s3 + $0x20] sm:$0xff] }
 0x597   :  { %8888 = vmatprep.subr.mxu0 %v4357_v18 }
 0x598   :  { %4097 = vrot.lane.b32.xlu0 %v4018_v37, %s9297_s25 }
 0x599   :  { %4115 = vrot.lane.b32.xlu1 %v4087_v22, %s9308_s8 }
 0x59c   :  { %4113 = vrot.lane.b32.xlu0 %v4019_v11, %s9308_s8 }
 0x59d   :  { %4131 = vrot.lane.b32.xlu1 %v4088_v44, %s9307_s7 }
 0x5a0   :  { %4129 = vrot.lane.b32.xlu0 %v4020_v2, %s9307_s7 }
 0x5e5   :  { %v4128_v6 = vpop.permute.xlu1 %4127  ;;  %v4096_v60 = vpop.permute.xlu0 %4095 }
 0x5e6   :  { %v4138_v31 = vsel %vm2007_vm1, %v3949_v19, %v4096_v60 }
 0x5e9   :  { %v4110_v15 = vpop.permute.xlu1 %4109  ;;  %v4112_v23 = vpop.permute.xlu0 %4111 }
 0x5ea   :  { %v4142_v13 = vsel %vm2720_vm2, %v4138_v31, %v4112_v23 }
 0x5eb   :  { %v4147_v43 = vsel %vm4145_vm3, %v4142_v13, %v4128_v6 }
 0x5ed   :  { %v4094_v16 = vpop.permute.xlu0 %4093  ;;  %v4126_v50 = vpop.permute.xlu1 %4125 }
 0x5ee   :  { %v4137_v32 = vsel %vm2007_vm1, %v3881_v12, %v4094_v16 }
 0x5ef   :  { %v4141_v24 = vsel %vm2720_vm2, %v4137_v32, %v4110_v15 }
 0x5f0   :  { %v4146_v57 = vsel %vm4145_vm3, %v4141_v24, %v4126_v50 }
 0x5f1   :  { %8882 = vmatprep.mubr.msk.f32.mxu0 %vm60_vm0, %v4146_v57 }
 0x5f2   :  { %8883 = vmatmul.mubr.msk.f32.vlgmr.msra.gmra.mxu0 %vm60_vm0, %v4147_v43 }
 0x5f3   :  { %8889 = vmatpush3.msra.mxu0 %v4357_v18 }
 0x607   :  { %v4100_v9 = vpop.permute.xlu1 %4099 }
 0x608   :  { %v4140_v59 = vsel %vm2007_vm1, %v4085_v55, %v4100_v9 }
 0x60a   :  { %v4098_v41 = vpop.permute.xlu0 %4097 }
 0x60b   :  { %v4116_v19 = vpop.permute.xlu1 %4115  ;;  %v4139_v0 = vsel %vm2007_vm1, %v4017_v38, %v4098_v41  ;;  %v4356_v38 = vld [vmem:[%s11128_s3 + $0x30] sm:$0xff] }
 0x60c   :  { %v4144_v25 = vsel %vm2720_vm2, %v4140_v59, %v4116_v19  ;;  %8890 = vmatprep.subr.mxu0 %v4356_v38  ;;  %v8495_v19 = vld [vmem:[#allocation5 + $0x2] ss:$0 sm:$0xff]  ;;  %v8496_v59 = vld [vmem:[#allocation5 + $0x3] ss:$0 sm:$0xff] }
 0x60d   :  { %8891 = vmatpush3.msra.mxu0 %v4356_v38 }
 0x60e   :  { %v4114_v20 = vpop.permute.xlu0 %4113  ;;  %8892 = vmatprep.subr.mxu0 %v4456_v48 }
 0x60f   :  { %v4132_v47 = vpop.permute.xlu1 %4131  ;;  %v4143_v12 = vsel %vm2720_vm2, %v4139_v0, %v4114_v20  ;;  %8893 = vmatpush3.msra.mxu0 %v4456_v48 }
 0x610   :  { %v4149_v42 = vsel %vm4145_vm3, %v4144_v25, %v4132_v47  ;;  %8894 = vmatprep.subr.mxu0 %v4455_v53 }
 0x611   :  { %8895 = vmatpush3.msra.mxu0 %v4455_v53 }
 0x612   :  { %v4130_v7 = vpop.permute.xlu0 %4129 }
 0x613   :  { %v4148_v5 = vsel %vm4145_vm3, %v4143_v12, %v4130_v7 }
 0x614   :  { %8885 = vmatprep.mubr.msk.f32.mxu0 %vm60_vm0, %v4148_v5 }
 0x615   :  { %8886 = vmatmul.mubr.msk.f32.gmra.mxu0 %vm60_vm0, %v4149_v42 }
 0x6b2   :  { %v8884_v8 = vpop.f32.mrf.mxu0 }
 0x6b3   :  { %v4259_v17 = vadd.f32 %v8884_v8, %v8490_v49 }
 0x6b4   :  { %v4253_v33 = vpop.f32.mrf.mxu0 }
 0x6b5   :  { %v10284_v29 = vadd.f32 %v9225_v54, %v4259_v17  ;;  %v4254_v39 = vadd.f32 %v8490_v49, %v4253_v33 }
 0x6b7   :  { %v10286_v10 = vadd.f32 %v9226_v40, %v4254_v39  ;;  %v4281_v14 = vsel %vm60_vm0, %v10284_v29, 0.0  ;;  %v4295_v56 = vmul.f32 %v10284_v29, %v10284_v29 }
 0x6b8   :  { %4282 = vadd.xlane.f32.xlu1 %v4281_v14 }
 0x6b9   :  { %v4278_v3 = vsel %vm60_vm0, %v10286_v10, 0.0  ;;  %v4301_v36 = vsel %vm60_vm0, %v4295_v56, 0.0  ;;  %v4294_v51 = vmul.f32 %v10286_v10, %v10286_v10 }
 0x6ba   :  { %4279 = vadd.xlane.f32.xlu0 %v4278_v3 }
 0x6bb   :  { %v4298_v52 = vsel %vm60_vm0, %v4294_v51, 0.0 }
 0x6be   :  { %4302 = vadd.xlane.f32.xlu0 %v4301_v36 }
 0x6c2   :  { %4299 = vadd.xlane.f32.xlu0 %v4298_v52 }
 0x6d5   :  { %v8887_v4 = vpop.f32.mrf.mxu0 }
 0x6d6   :  { %v4269_v1 = vadd.f32 %v8887_v4, %v8490_v49 }
 0x6d7   :  { %v4263_v46 = vpop.f32.mrf.mxu0 }
 0x6d8   :  { %v10298_v61 = vadd.f32 %v9227_v30, %v4269_v1  ;;  %v4264_v58 = vadd.f32 %v8490_v49, %v4263_v46 }
 0x6da   :  { %v10300_v62 = vadd.f32 %v9228_v45, %v4264_v58  ;;  %v4287_v26 = vsel %vm60_vm0, %v10298_v61, 0.0  ;;  %v4297_v55 = vmul.f32 %v10298_v61, %v10298_v61 }
 0x6db   :  { %4288 = vadd.xlane.f32.xlu1 %v4287_v26 }
 0x6dc   :  { %v4284_v28 = vsel %vm60_vm0, %v10300_v62, 0.0  ;;  %v4296_v63 = vmul.f32 %v10300_v62, %v10300_v62  ;;  %v4307_v34 = vsel %vm60_vm0, %v4297_v55, 0.0 }
 0x6dd   :  { %4285 = vadd.xlane.f32.xlu0 %v4284_v28 }
 0x6de   :  { %v4304_v37 = vsel %vm60_vm0, %v4296_v63, 0.0 }
 0x6df   :  { %4308 = vadd.xlane.f32.xlu1 %v4307_v34  ;;  %v56_v34 = vld [vmem:[%s11126_s1] sm:$0xff] }
 0x6e1   :  { %4305 = vadd.xlane.f32.xlu0 %v4304_v37  ;;  %v57_v37 = vld [vmem:[%s11126_s1 + $0x8] sm:$0xff] }
 0x6f0   :  { %4459 = vrot.lane.b32.xlu1 %v4455_v53, %s9305_s19 }
 0x6f7   :  { %4461 = vrot.lane.b32.xlu0 %v4456_v48, %s9305_s19 }
 0x741   :  { %v4283_v22 = vpop.xlane.xlu1 %4282 }
 0x742   :  { %v4291_v44 = vmul.f32 0.03125, %v4283_v22 }
 0x743   :  { %v4280_v11 = vpop.xlane.xlu0 %4279 }
 0x744   :  { %v4315_v6 = vmul.f32 %v4291_v44, %v4291_v44  ;;  %v4290_v60 = vmul.f32 0.03125, %v4280_v11  ;;  %v4323_v43 = vsub.f32 %v10284_v29, %v4291_v44 }
 0x746   :  { %v4314_v16 = vmul.f32 %v4290_v60, %v4290_v60  ;;  %v4322_v41 = vsub.f32 %v10286_v10, %v4290_v60 }
 0x747   :  { %v4303_v2 = vpop.xlane.xlu0 %4302 }
 0x748   :  { %v4311_v15 = vmul.f32 0.03125, %v4303_v2 }
 0x74a   :  { %v4319_v23 = vsub.f32 %v4311_v15, %v4315_v6 }
 0x74b   :  { %v4300_v31 = vpop.xlane.xlu0 %4299 }
 0x74c   :  { %v4327_v13 = vadd.f32 1e-05, %v4319_v23  ;;  %v4310_v32 = vmul.f32 0.03125, %v4300_v31 }
 0x74e   :  { %9129 = vrsqrt.f32 %v4327_v13  ;;  %v4318_v50 = vsub.f32 %v4310_v32, %v4314_v16 }
 0x750   :  { %v4326_v24 = vadd.f32 1e-05, %v4318_v50 }
 0x752   :  { %9131 = vrsqrt.f32 %v4326_v24 }
 0x75b   :  { %v9130_v57 = vpop.eup %9129 }
 0x75c   :  { %v4335_v9 = vmul.f32 %v9130_v57, %v4323_v43 }
 0x75e   :  { %v4343_v47 = vmul.f32 %v8495_v19, %v4335_v9 }
 0x75f   :  { %v9132_v20 = vpop.eup %9131 }
 0x760   :  { %v4334_v0 = vmul.f32 %v9132_v20, %v4322_v41  ;;  %v4351_v42 = vadd.f32 %v8496_v59, %v4343_v47 }
 0x762   :  { %v4342_v12 = vmul.f32 %v8495_v19, %v4334_v0 }
 0x764   :  { %v4289_v7 = vpop.xlane.xlu1 %4288  ;;  %v4350_v25 = vadd.f32 %v8496_v59, %v4342_v12 }
 0x765   :  { %v4293_v5 = vmul.f32 0.03125, %v4289_v7 }
 0x766   :  { %v4286_v49 = vpop.xlane.xlu0 %4285  ;;  %8896 = vmatprep.mubr.msk.f32.mxu0 %vm60_vm0, %v4350_v25 }
 0x767   :  { %v4292_v8 = vmul.f32 0.03125, %v4286_v49  ;;  %8897 = vmatmul.mubr.msk.f32.vlgmr.msra.gmra.mxu0 %vm60_vm0, %v4351_v42  ;;  %v4317_v33 = vmul.f32 %v4293_v5, %v4293_v5  ;;  %v4325_v1 = vsub.f32 %v10298_v61, %v4293_v5 }
 0x768   :  { %v4309_v17 = vpop.xlane.xlu1 %4308 }
 0x769   :  { %v4313_v54 = vmul.f32 0.03125, %v4309_v17  ;;  %v4316_v40 = vmul.f32 %v4292_v8, %v4292_v8  ;;  %v4324_v30 = vsub.f32 %v10300_v62, %v4292_v8 }
 0x76a   :  { %v4306_v39 = vpop.xlane.xlu0 %4305 }
 0x76b   :  { %v4321_v14 = vsub.f32 %v4313_v54, %v4317_v33  ;;  %v4312_v3 = vmul.f32 0.03125, %v4306_v39 }
 0x76c   :  { %v4460_v52 = vpop.permute.xlu1 %4459 }
 0x76d   :  { %v4329_v56 = vadd.f32 1e-05, %v4321_v14  ;;  %v4320_v36 = vsub.f32 %v4312_v3, %v4316_v40 }
 0x76e   :  { %v4462_v51 = vpop.permute.xlu0 %4461 }
 0x76f   :  { %9133 = vrsqrt.f32 %v4329_v56  ;;  %v4328_v4 = vadd.f32 1e-05, %v4320_v36  ;;  %8902 = vmatprep.subr.mxu0 %v4462_v51 }
 0x770   :  { %8903 = vmatpush3.msra.mxu0 %v4462_v51 }
 0x771   :  { %9135 = vrsqrt.f32 %v4328_v4  ;;  %8904 = vmatprep.subr.mxu0 %v4460_v52 }
 0x772   :  { %8905 = vmatpush3.msra.mxu0 %v4460_v52 }
 0x77c   :  { %v9134_v46 = vpop.eup %9133 }
 0x77d   :  { %v4337_v58 = vmul.f32 %v9134_v46, %v4325_v1 }
 0x77e   :  { %v9136_v45 = vpop.eup %9135 }
 0x77f   :  { %v4336_v26 = vmul.f32 %v9136_v45, %v4324_v30  ;;  %v4345_v55 = vmul.f32 %v8495_v19, %v4337_v58 }
 0x781   :  { %v4344_v28 = vmul.f32 %v8495_v19, %v4336_v26  ;;  %v4353_v18 = vadd.f32 %v8496_v59, %v4345_v55 }
 0x783   :  { %v4352_v63 = vadd.f32 %v8496_v59, %v4344_v28 }
 0x785   :  { %8899 = vmatprep.mubr.msk.f32.mxu0 %vm60_vm0, %v4352_v63 }
 0x786   :  { %8900 = vmatmul.mubr.msk.f32.gmra.mxu0 %vm60_vm0, %v4353_v18 }
 0x787   :  { %8906 = vmatprep.mubr.msk.f32.mxu0 %vm2720_vm2, %v56_v34 }
 0x78a   :  { %8907 = vmatmul.mubr.msk.f32.vlgmr.msra.gmra.mxu0 %vm2720_vm2, %v57_v37 }
 0x827   :  { %v8898_v38 = vpop.f32.mrf.mxu0 }
 0x828   :  { %4564 = vrot.lane.b32.xlu1 %v8898_v38, %s9299_s15  ;;  %4552 = vrot.lane.b32.xlu0 %v8898_v38, %s9300_s16 }
 0x829   :  { %v4436_v48 = vpop.f32.mrf.mxu0 }
 0x82c   :  { %4576 = vrot.lane.b32.xlu0 %v8898_v38, %s9301_s17  ;;  %4550 = vrot.lane.b32.xlu1 %v4436_v48, %s9300_s16 }
 0x830   :  { %4562 = vrot.lane.b32.xlu0 %v4436_v48, %s9299_s15  ;;  %4574 = vrot.lane.b32.xlu1 %v4436_v48, %s9301_s17 }
 0x846   :  { %v10348_v53 = vpop.f32.mrf.mxu0 }
 0x848   :  { %v10350_v22 = vpop.f32.mrf.mxu0 }
 0x84a   :  { %v10352_v11 = vpop.f32.mrf.mxu0 }
 0x84b   :  { %5140 = vrot.lane.b32.xlu0 %v10352_v11, %s9299_s15  ;;  %5134 = vrot.lane.b32.xlu1 %v10352_v11, %s9300_s16 }
 0x84c   :  { %v10358_v44 = vpop.f32.mrf.mxu0 }
 0x84f   :  { %5146 = vrot.lane.b32.xlu1 %v10352_v11, %s9301_s17  ;;  %5144 = vrot.lane.b32.xlu0 %v10358_v44, %s9301_s17 }
 0x853   :  { %4554 = vrot.lane.b32.xlu0 %v10350_v22, %s9300_s16  ;;  %5132 = vrot.lane.b32.xlu1 %v10358_v44, %s9300_s16 }
 0x857   :  { %4578 = vrot.lane.b32.xlu0 %v10350_v22, %s9301_s17  ;;  %5138 = vrot.lane.b32.xlu1 %v10358_v44, %s9299_s15 }
 0x85b   :  { %4568 = vrot.lane.b32.xlu0 %v10348_v53, %s9299_s15  ;;  %4566 = vrot.lane.b32.xlu1 %v10350_v22, %s9299_s15 }
 0x85f   :  { %4556 = vrot.lane.b32.xlu1 %v10348_v53, %s9300_s16 }
 0x863   :  { %4580 = vrot.lane.b32.xlu1 %v10348_v53, %s9301_s17 }
 0x89a   :  { %v4565_v2 = vpop.permute.xlu1 %4564  ;;  %v4553_v6 = vpop.permute.xlu0 %4552 }
 0x89b   :  { %v4654_v20 = vcombine.low %v8898_v38, %v4565_v2  ;;  %v4655_v0 = vcombine.high %v8898_v38, %v4565_v2 }
 0x89d   :  { %v4662_v33 = vrot.slane %v4654_v20, %v9473_v27  ;;  %v4669_v54 = vrot.slane %v4655_v0, %v9473_v27 }
 0x89e   :  { %v4551_v60 = vpop.permute.xlu1 %4550  ;;  %v4577_v15 = vpop.permute.xlu0 %4576 }
 0x89f   :  { %v4670_v24 = vcombine.low %v4553_v6, %v4577_v15  ;;  %v4671_v57 = vcombine.high %v4553_v6, %v4577_v15 }
 0x8a1   :  { %v4678_v25 = vrot.slane %v4670_v24, %v9473_v27  ;;  %v4685_v5 = vrot.slane %v4671_v57, %v9473_v27 }
 0x8a2   :  { %v4575_v23 = vpop.permute.xlu1 %4574  ;;  %v4563_v31 = vpop.permute.xlu0 %4562 }
 0x8a3   :  { %v4602_v16 = vcombine.low %v4551_v60, %v4575_v23  ;;  %v4603_v13 = vcombine.high %v4551_v60, %v4575_v23  ;;  %v4586_v32 = vcombine.low %v4436_v48, %v4563_v31  ;;  %v4587_v50 = vcombine.high %v4436_v48, %v4563_v31 }
 0x8a4   :  { %v4686_v56 = vcombine.low %v4662_v33, %v4678_v25  ;;  %v4687_v36 = vcombine.high %v4662_v33, %v4678_v25  ;;  %v4702_v51 = vcombine.low %v4669_v54, %v4685_v5  ;;  %v4703_v52 = vcombine.high %v4669_v54, %v4685_v5 }
 0x8a5   :  { %v4610_v43 = vrot.slane %v4602_v16, %v9473_v27  ;;  %v4617_v9 = vrot.slane %v4603_v13, %v9473_v27  ;;  %v4594_v41 = vrot.slane %v4586_v32, %v9473_v27  ;;  %v4601_v19 = vrot.slane %v4587_v50, %v9473_v27 }
 0x8a6   :  { %v4694_v26 = vrot.slane %v4686_v56, %v9487_v35  ;;  %v4701_v55 = vrot.slane %v4687_v36, %v9487_v35  ;;  %v4710_v28 = vrot.slane %v4702_v51, %v9487_v35  ;;  %v4717_v63 = vrot.slane %v4703_v52, %v9487_v35 }
 0x8a7   :  { %v4618_v47 = vcombine.low %v4594_v41, %v4610_v43  ;;  %v4619_v59 = vcombine.high %v4594_v41, %v4610_v43  ;;  %v4634_v12 = vcombine.low %v4601_v19, %v4617_v9  ;;  %v4635_v7 = vcombine.high %v4601_v19, %v4617_v9 }
 0x8a8   :  { %v4926_v48 = vcombine.low %v4694_v26, %v4701_v55  ;;  %v8505_v2 = vcombine.high %v4694_v26, %v4701_v55  ;;  %v4942_v6 = vcombine.low %v4710_v28, %v4717_v63  ;;  %v8506_v60 = vcombine.high %v4710_v28, %v4717_v63 }
 0x8a9   :  { %v4626_v42 = vrot.slane %v4618_v47, %v9487_v35  ;;  %v4633_v49 = vrot.slane %v4619_v59, %v9487_v35  ;;  %v4642_v8 = vrot.slane %v4634_v12, %v9487_v35  ;;  %v4649_v17 = vrot.slane %v4635_v7, %v9487_v35 }
 0x8aa   :  { %v4933_v15 = vrot.slane %v4926_v48, %v9473_v27  ;;  %v4941_v23 = vrot.slane %v8505_v2, %v9473_v27  ;;  %v4949_v31 = vrot.slane %v4942_v6, %v9473_v27  ;;  %v4957_v16 = vrot.slane %v8506_v60, %v9473_v27 }
 0x8ab   :  { %v4858_v39 = vcombine.low %v4626_v42, %v4633_v49  ;;  %v8503_v40 = vcombine.high %v4626_v42, %v4633_v49  ;;  %v4874_v14 = vcombine.low %v4642_v8, %v4649_v17  ;;  %v8504_v3 = vcombine.high %v4642_v8, %v4649_v17 }
 0x8ac   :  { %v4958_v13 = vcombine.low %v4933_v15, %v4941_v23  ;;  %v4974_v32 = vcombine.low %v4949_v31, %v4957_v16  ;;  %v4959_v57 = vcombine.high %v4933_v15, %v4941_v23  ;;  %v4975_v43 = vcombine.high %v4949_v31, %v4957_v16 }
 0x8ad   :  { %v10393_v4 = vrot.slane %v4858_v39, %v9473_v27  ;;  %v10396_v1 = vrot.slane %v8503_v40, %v9473_v27  ;;  %v10399_v46 = vrot.slane %v4874_v14, %v9473_v27  ;;  %v10402_v30 = vrot.slane %v8504_v3, %v9473_v27 }
 0x8ae   :  { %v10433_v0 = vrot.slane %v4958_v13, %v9487_v35  ;;  %v10436_v47 = vrot.slane %v4974_v32, %v9487_v35  ;;  %v10443_v7 = vrot.slane %v4959_v57, %v9487_v35  ;;  %v10446_v25 = vrot.slane %v4975_v43, %v9487_v35 }
 0x8af   :  { %v4890_v58 = vcombine.low %v10393_v4, %v10396_v1  ;;  %v4906_v45 = vcombine.low %v10399_v46, %v10402_v30  ;;  %v4891_v40 = vcombine.high %v10393_v4, %v10396_v1  ;;  %v4907_v14 = vcombine.high %v10399_v46, %v10402_v30 }
 0x8b0   :  { %v4990_v54 = vcombine.low %v10433_v0, %v10436_v47  ;;  %v4991_v39 = vcombine.high %v10433_v0, %v10436_v47  ;;  %v4993_v26 = vcombine.high %v10443_v7, %v10446_v25 }
 0x8b1   :  { %v4898_v18 = vrot.slane %v4890_v58, %v9487_v35  ;;  %v4914_v34 = vrot.slane %v4906_v45, %v9487_v35  ;;  %v4992_v45 = vcombine.low %v10443_v7, %v10446_v25 }
 0x8b3   :  { %v4922_v37 = vcombine.low %v4898_v18, %v4914_v34  ;;  %v4923_v38 = vcombine.high %v4898_v18, %v4914_v34  ;;  %v10479_v34 = vrot.slane %v4891_v40, %v9487_v35 }
 0x8b5   :  { %8911 = vmatprep.mubr.msk.f32.mxu1 %vm2007_vm1, %v4922_v37  ;;  %8916 = vmatprep.mubr.msk.f32.mxu0 %vm2007_vm1, %v4923_v38  ;;  %v10482_v37 = vrot.slane %v4907_v14, %v9487_v35 }
 0x8bd   :  { %v10420_v50 = vpop.permute.xlu1 %5134  ;;  %v10422_v24 = vpop.permute.xlu0 %5140 }
 0x8be   :  { %v5218_v9 = vcombine.low %v10352_v11, %v10422_v24  ;;  %v5219_v41 = vcombine.high %v10352_v11, %v10422_v24 }
 0x8c0   :  { %v5226_v5 = vrot.slane %v5218_v9, %v9473_v27  ;;  %v5233_v42 = vrot.slane %v5219_v41, %v9473_v27 }
 0x8c1   :  { %v10428_v19 = vpop.permute.xlu1 %5146  ;;  %v10430_v20 = vpop.permute.xlu0 %5144 }
 0x8c2   :  { %v5234_v59 = vcombine.low %v10420_v50, %v10428_v19  ;;  %v5235_v12 = vcombine.high %v10420_v50, %v10428_v19 }
 0x8c4   :  { %v5242_v49 = vrot.slane %v5234_v59, %v9473_v27  ;;  %v5249_v8 = vrot.slane %v5235_v12, %v9473_v27 }
 0x8c5   :  { %v10452_v17 = vpop.permute.xlu1 %5132  ;;  %v4555_v33 = vpop.permute.xlu0 %4554 }
 0x8c6   :  { %v5250_v3 = vcombine.low %v5226_v5, %v5242_v49  ;;  %v5251_v56 = vcombine.high %v5226_v5, %v5242_v49  ;;  %v5266_v36 = vcombine.low %v5233_v42, %v5249_v8  ;;  %v5267_v51 = vcombine.high %v5233_v42, %v5249_v8 }
 0x8c7   :  { %v5166_v52 = vcombine.low %v10452_v17, %v10430_v20  ;;  %v5167_v58 = vcombine.high %v10452_v17, %v10430_v20 }
 0x8c8   :  { %v5258_v4 = vrot.slane %v5250_v3, %v9487_v35  ;;  %v5265_v1 = vrot.slane %v5251_v56, %v9487_v35  ;;  %v5274_v46 = vrot.slane %v5266_v36, %v9487_v35  ;;  %v5281_v30 = vrot.slane %v5267_v51, %v9487_v35 }
 0x8c9   :  { %v5174_v55 = vrot.slane %v5166_v52, %v9473_v27  ;;  %v5181_v28 = vrot.slane %v5167_v58, %v9473_v27  ;;  %v10476_v63 = vpop.permute.xlu1 %5138  ;;  %v4579_v18 = vpop.permute.xlu0 %4578 }
 0x8ca   :  { %v5354_v38 = vcombine.low %v5258_v4, %v5265_v1  ;;  %v8513_v48 = vcombine.high %v5258_v4, %v5265_v1  ;;  %v5370_v2 = vcombine.low %v5274_v46, %v5281_v30  ;;  %v8514_v6 = vcombine.high %v5274_v46, %v5281_v30 }
 0x8cb   :  { %v5150_v60 = vcombine.low %v10358_v44, %v10476_v63  ;;  %v5151_v15 = vcombine.high %v10358_v44, %v10476_v63  ;;  %v4738_v23 = vcombine.low %v4555_v33, %v4579_v18  ;;  %v4739_v31 = vcombine.high %v4555_v33, %v4579_v18 }
 0x8cc   :  { %v10489_v16 = vrot.slane %v5354_v38, %v9473_v27  ;;  %v10492_v13 = vrot.slane %v8513_v48, %v9473_v27  ;;  %v10495_v32 = vrot.slane %v5370_v2, %v9473_v27  ;;  %v10498_v57 = vrot.slane %v8514_v6, %v9473_v27 }
 0x8cd   :  { %v5158_v43 = vrot.slane %v5150_v60, %v9473_v27  ;;  %v5165_v9 = vrot.slane %v5151_v15, %v9473_v27  ;;  %v4746_v41 = vrot.slane %v4738_v23, %v9473_v27  ;;  %v4753_v59 = vrot.slane %v4739_v31, %v9473_v27  ;;  %v4567_v12 = vpop.permute.xlu1 %4566  ;;  %v4569_v5 = vpop.permute.xlu0 %4568 }
 0x8ce   :  { %v4722_v42 = vcombine.low %v10350_v22, %v4567_v12  ;;  %v4723_v49 = vcombine.high %v10350_v22, %v4567_v12  ;;  %v4790_v8 = vcombine.low %v10348_v53, %v4569_v5  ;;  %v4791_v33 = vcombine.high %v10348_v53, %v4569_v5 }
 0x8cf   :  { %v5182_v40 = vcombine.low %v5158_v43, %v5174_v55  ;;  %v5183_v14 = vcombine.high %v5158_v43, %v5174_v55  ;;  %v5198_v3 = vcombine.low %v5165_v9, %v5181_v28  ;;  %v5199_v56 = vcombine.high %v5165_v9, %v5181_v28 }
 0x8d0   :  { %v4730_v36 = vrot.slane %v4722_v42, %v9473_v27  ;;  %v4737_v51 = vrot.slane %v4723_v49, %v9473_v27  ;;  %v4798_v52 = vrot.slane %v4790_v8, %v9473_v27  ;;  %v4805_v58 = vrot.slane %v4791_v33, %v9473_v27 }
 0x8d1   :  { %v5190_v4 = vrot.slane %v5182_v40, %v9487_v35  ;;  %v5197_v22 = vrot.slane %v5183_v14, %v9487_v35  ;;  %v5206_v1 = vrot.slane %v5198_v3, %v9487_v35  ;;  %v5213_v53 = vrot.slane %v5199_v56, %v9487_v35  ;;  %v4557_v46 = vpop.permute.xlu1 %4556 }
 0x8d2   :  { %v4754_v30 = vcombine.low %v4730_v36, %v4746_v41  ;;  %v4755_v55 = vcombine.high %v4730_v36, %v4746_v41  ;;  %v4770_v28 = vcombine.low %v4737_v51, %v4753_v59  ;;  %v4771_v18 = vcombine.high %v4737_v51, %v4753_v59 }
 0x8d3   :  { %v5286_v38 = vcombine.low %v5190_v4, %v5197_v22  ;;  %v8511_v48 = vcombine.high %v5190_v4, %v5197_v22  ;;  %v5302_v2 = vcombine.low %v5206_v1, %v5213_v53  ;;  %v8512_v6 = vcombine.high %v5206_v1, %v5213_v53 }
 0x8d4   :  { %v4762_v60 = vrot.slane %v4754_v30, %v9487_v35  ;;  %v4769_v15 = vrot.slane %v4755_v55, %v9487_v35  ;;  %v4778_v23 = vrot.slane %v4770_v28, %v9487_v35  ;;  %v4785_v31 = vrot.slane %v4771_v18, %v9487_v35 }
 0x8d5   :  { %v4581_v43 = vpop.permute.xlu1 %4580  ;;  %v5293_v9 = vrot.slane %v5286_v38, %v9473_v27  ;;  %v5301_v12 = vrot.slane %v8511_v48, %v9473_v27  ;;  %v5309_v41 = vrot.slane %v5302_v2, %v9473_v27  ;;  %v5317_v59 = vrot.slane %v8512_v6, %v9473_v27 }
 0x8d6   :  { %v4994_v5 = vcombine.low %v4762_v60, %v4769_v15  ;;  %v8507_v42 = vcombine.high %v4762_v60, %v4769_v15  ;;  %v5010_v49 = vcombine.low %v4778_v23, %v4785_v31  ;;  %v8508_v8 = vcombine.high %v4778_v23, %v4785_v31 }
 0x8d7   :  { %v4806_v33 = vcombine.low %v4557_v46, %v4581_v43  ;;  %v4807_v40 = vcombine.high %v4557_v46, %v4581_v43  ;;  %v5318_v14 = vcombine.low %v5293_v9, %v5301_v12  ;;  %v5334_v3 = vcombine.low %v5309_v41, %v5317_v59 }
 0x8d8   :  { %v10525_v56 = vrot.slane %v4994_v5, %v9473_v27  ;;  %v10528_v36 = vrot.slane %v8507_v42, %v9473_v27  ;;  %v10531_v51 = vrot.slane %v5010_v49, %v9473_v27  ;;  %v10534_v4 = vrot.slane %v8508_v8, %v9473_v27 }
 0x8d9   :  { %v4814_v22 = vrot.slane %v4806_v33, %v9473_v27  ;;  %v4821_v1 = vrot.slane %v4807_v40, %v9473_v27  ;;  %v5326_v53 = vrot.slane %v5318_v14, %v9487_v35  ;;  %v5342_v46 = vrot.slane %v5334_v3, %v9487_v35 }
 0x8da   :  { %v5319_v30 = vcombine.high %v5293_v9, %v5301_v12  ;;  %v5335_v55 = vcombine.high %v5309_v41, %v5317_v59  ;;  %v5386_v28 = vcombine.low %v10489_v16, %v10492_v13  ;;  %v5402_v18 = vcombine.low %v10495_v32, %v10498_v57 }
 0x8db   :  { %v4822_v38 = vcombine.low %v4798_v52, %v4814_v22  ;;  %v4823_v48 = vcombine.high %v4798_v52, %v4814_v22  ;;  %v4838_v2 = vcombine.low %v4805_v58, %v4821_v1  ;;  %v4839_v6 = vcombine.high %v4805_v58, %v4821_v1 }
 0x8dc   :  { %v5350_v60 = vcombine.low %v5326_v53, %v5342_v46  ;;  %v5351_v15 = vcombine.high %v5326_v53, %v5342_v46  ;;  %v5333_v23 = vrot.slane %v5319_v30, %v9487_v35  ;;  %v5349_v31 = vrot.slane %v5335_v55, %v9487_v35 }
 0x8dd   :  { %v4830_v43 = vrot.slane %v4822_v38, %v9487_v35  ;;  %v4837_v9 = vrot.slane %v4823_v48, %v9487_v35  ;;  %v4846_v12 = vrot.slane %v4838_v2, %v9487_v35  ;;  %v4853_v41 = vrot.slane %v4839_v6, %v9487_v35 }
 0x8de   :  { %8909 = vmatprep.subr.msk.mxu1 %vm2007_vm1, %v5350_v60  ;;  %8914 = vmatprep.subr.msk.mxu0 %vm2007_vm1, %v5351_v15  ;;  %v5352_v52 = vcombine.low %v5333_v23, %v5349_v31  ;;  %v5353_v58 = vcombine.high %v5333_v23, %v5349_v31  ;;  %v5394_v59 = vrot.slane %v5386_v28, %v9487_v35 }
 0x8df   :  { %v5062_v5 = vcombine.low %v4830_v43, %v4837_v9  ;;  %v8509_v42 = vcombine.high %v4830_v43, %v4837_v9  ;;  %v5078_v49 = vcombine.low %v4846_v12, %v4853_v41  ;;  %v8510_v8 = vcombine.high %v4846_v12, %v4853_v41  ;;  %8910 = vmatpush3.xpose.msk.msra.mxu1 %vm2007_vm1, %v5350_v60 }
 0x8e0   :  { %8915 = vmatpush3.xpose.msk.msra.mxu0 %vm2007_vm1, %v5351_v15  ;;  %8919 = vmatprep.subr.msk.mxu1 %vm2007_vm1, %v5352_v52  ;;  %v5410_v33 = vrot.slane %v5402_v18, %v9487_v35  ;;  %v5026_v40 = vcombine.low %v10525_v56, %v10528_v36  ;;  %v5042_v14 = vcombine.low %v10531_v51, %v10534_v4 }
 0x8e1   :  { %v5069_v3 = vrot.slane %v5062_v5, %v9473_v27  ;;  %v5077_v22 = vrot.slane %v8509_v42, %v9473_v27  ;;  %v5085_v1 = vrot.slane %v5078_v49, %v9473_v27  ;;  %v5093_v53 = vrot.slane %v8510_v8, %v9473_v27  ;;  %8924 = vmatprep.subr.msk.mxu0 %vm2007_vm1, %v5353_v58 }
 0x8e2   :  { %8912 = vmatmul.mubr.msk.f32.vlgmr.msra.gmra.mxu1 %vm2007_vm1, %v4990_v54  ;;  %v4924_v46 = vcombine.low %v10479_v34, %v10482_v37  ;;  %v4925_v30 = vcombine.high %v10479_v34, %v10482_v37  ;;  %v5418_v55 = vcombine.low %v5394_v59, %v5410_v33  ;;  %v5419_v28 = vcombine.high %v5394_v59, %v5410_v33 }
 0x8e3   :  { %v5094_v18 = vcombine.low %v5069_v3, %v5077_v22  ;;  %v5110_v38 = vcombine.low %v5085_v1, %v5093_v53  ;;  %8917 = vmatmul.mubr.msk.f32.vlgmr.msra.gmra.mxu0 %vm2007_vm1, %v4991_v39  ;;  %v5034_v48 = vrot.slane %v5026_v40, %v9487_v35  ;;  %v5050_v2 = vrot.slane %v5042_v14, %v9487_v35 }
 0x8e4   :  { %v5095_v54 = vcombine.high %v5069_v3, %v5077_v22  ;;  %v5111_v6 = vcombine.high %v5085_v1, %v5093_v53  ;;  %8920 = vmatpush3.xpose.msk.msra.mxu1 %vm2007_vm1, %v5352_v52  ;;  %8921 = vmatprep.mubr.msk.f32.mxu1 %vm2007_vm1, %v4924_v46  ;;  %v5387_v34 = vcombine.high %v10489_v16, %v10492_v13 }
 0x8e5   :  { %8925 = vmatpush3.xpose.msk.msra.mxu0 %vm2007_vm1, %v5353_v58  ;;  %8926 = vmatprep.mubr.msk.f32.mxu0 %vm2007_vm1, %v4925_v30  ;;  %v5403_v0 = vcombine.high %v10495_v32, %v10498_v57  ;;  %v5102_v47 = vrot.slane %v5094_v18, %v9487_v35  ;;  %v5118_v39 = vrot.slane %v5110_v38, %v9487_v35 }
 0x8e6   :  { %8929 = vmatprep.subr.msk.mxu1 %vm2007_vm1, %v5418_v55  ;;  %8934 = vmatprep.subr.msk.mxu0 %vm2007_vm1, %v5419_v28  ;;  %v5401_v37 = vrot.slane %v5387_v34, %v9487_v35  ;;  %v5027_v16 = vcombine.high %v10525_v56, %v10528_v36  ;;  %v5043_v13 = vcombine.high %v10531_v51, %v10534_v4 }
 0x8e7   :  { %8922 = vmatmul.mubr.msk.f32.vlgmr.msra.gmra.mxu1 %vm2007_vm1, %v4992_v45  ;;  %v5058_v32 = vcombine.low %v5034_v48, %v5050_v2  ;;  %v5059_v57 = vcombine.high %v5034_v48, %v5050_v2  ;;  %v5417_v60 = vrot.slane %v5403_v0, %v9487_v35  ;;  %v5126_v15 = vcombine.low %v5102_v47, %v5118_v39 }
 0x8e8   :  { %8927 = vmatmul.mubr.msk.f32.vlgmr.msra.gmra.mxu0 %vm2007_vm1, %v4993_v26  ;;  %8930 = vmatpush3.xpose.msk.msra.mxu1 %vm2007_vm1, %v5418_v55  ;;  %v5127_v56 = vcombine.high %v5102_v47, %v5118_v39  ;;  %v5041_v36 = vrot.slane %v5027_v16, %v9487_v35  ;;  %v5057_v51 = vrot.slane %v5043_v13, %v9487_v35 }
 0x8e9   :  { %8931 = vmatprep.mubr.msk.f32.mxu1 %vm2007_vm1, %v5058_v32  ;;  %8935 = vmatpush3.xpose.msk.msra.mxu0 %vm2007_vm1, %v5419_v28  ;;  %v5420_v45 = vcombine.low %v5401_v37, %v5417_v60  ;;  %v5421_v4 = vcombine.high %v5401_v37, %v5417_v60  ;;  %v5109_v23 = vrot.slane %v5095_v54, %v9487_v35 }
 0x8ea   :  { %8936 = vmatprep.mubr.msk.f32.mxu0 %vm2007_vm1, %v5059_v57  ;;  %v5125_v7 = vrot.slane %v5111_v6, %v9487_v35  ;;  %v5060_v25 = vcombine.low %v5041_v36, %v5057_v51  ;;  %v5061_v26 = vcombine.high %v5041_v36, %v5057_v51 }
 0x8eb   :  { %8939 = vmatprep.subr.msk.mxu1 %vm2007_vm1, %v5420_v45  ;;  %8944 = vmatprep.subr.msk.mxu0 %vm2007_vm1, %v5421_v4 }
 0x8ec   :  { %8932 = vmatmul.mubr.msk.f32.vlgmr.msra.gmra.mxu1 %vm2007_vm1, %v5126_v15  ;;  %8937 = vmatmul.mubr.msk.f32.vlgmr.msra.gmra.mxu0 %vm2007_vm1, %v5127_v56  ;;  %v5128_v31 = vcombine.low %v5109_v23, %v5125_v7  ;;  %v5129_v43 = vcombine.high %v5109_v23, %v5125_v7 }
 0x8ed   :  { %8940 = vmatpush3.xpose.msk.msra.mxu1 %vm2007_vm1, %v5420_v45  ;;  %8941 = vmatprep.mubr.msk.f32.mxu1 %vm2007_vm1, %v5060_v25 }
 0x8ee   :  { %8945 = vmatpush3.xpose.msk.msra.mxu0 %vm2007_vm1, %v5421_v4  ;;  %8946 = vmatprep.mubr.msk.f32.mxu0 %vm2007_vm1, %v5061_v26 }
 0x8f0   :  { %8942 = vmatmul.mubr.msk.f32.vlgmr.msra.gmra.mxu1 %vm2007_vm1, %v5128_v31 }
 0x8f1   :  { %8947 = vmatmul.mubr.msk.f32.vlgmr.msra.gmra.mxu0 %vm2007_vm1, %v5129_v43 }
 0x9a2   :  { %v8913_v9 = vpop.f32.mrf.mxu1 }
 0x9a3   :  { %v10624_v12 = vmul.f32 0.35355338, %v8913_v9  ;;  %v8918_v41 = vpop.f32.mrf.mxu0 }
 0x9a4   :  { %v10626_v52 = vmul.f32 0.35355338, %v8918_v41  ;;  %v5793_v5 = vpop.f32.mrf.mxu1 }
 0x9a5   :  { %v5877_v58 = vpop.f32.mrf.mxu0  ;;  %v6409_v59 = vsel %vm2007_vm1, %v10624_v12, -inf  ;;  %v10634_v33 = vmul.f32 0.35355338, %v5793_v5 }
 0x9a6   :  { %v10630_v42 = vmul.f32 0.35355338, %v5877_v58  ;;  %6410 = vmax.xlane.f32.xlu0 %v6409_v59  ;;  %v6415_v14 = vsel %vm2007_vm1, %v10626_v52, -inf }
 0x9a7   :  { %v8923_v3 = vpop.f32.mrf.mxu1  ;;  %v6406_v55 = vsel %vm2007_vm1, %v10634_v33, -inf }
 0x9a8   :  { %v8928_v49 = vpop.f32.mrf.mxu0  ;;  %v6412_v8 = vsel %vm2007_vm1, %v10630_v42, -inf  ;;  %v10644_v46 = vmul.f32 0.35355338, %v8923_v3 }
 0x9a9   :  { %v10636_v40 = vmul.f32 0.35355338, %v8928_v49  ;;  %6413 = vmax.xlane.f32.xlu1 %v6412_v8  ;;  %v5961_v28 = vpop.f32.mrf.mxu1 }
 0x9aa   :  { %v6045_v22 = vpop.f32.mrf.mxu0  ;;  %6416 = vmax.xlane.f32.xlu0 %v6415_v14  ;;  %v10652_v48 = vmul.f32 0.35355338, %v5961_v28  ;;  %v6421_v54 = vsel %vm2007_vm1, %v10644_v46, -inf }
 0x9ab   :  { %v10640_v1 = vmul.f32 0.35355338, %v6045_v22  ;;  %v6427_v53 = vsel %vm2007_vm1, %v10636_v40, -inf }
 0x9ac   :  { %v8938_v30 = vpop.f32.mrf.mxu0  ;;  %v8933_v6 = vpop.f32.mrf.mxu1  ;;  %v6418_v37 = vsel %vm2007_vm1, %v10652_v48, -inf }
 0x9ad   :  { %6428 = vmax.xlane.f32.xlu1 %v6427_v53  ;;  %v10648_v18 = vmul.f32 0.35355338, %v8938_v30  ;;  %v6424_v38 = vsel %vm2007_vm1, %v10640_v1, -inf  ;;  %v10660_v47 = vmul.f32 0.35355338, %v8933_v6 }
 0x9ae   :  { %6407 = vmax.xlane.f32.xlu0 %v6406_v55  ;;  %v6213_v2 = vpop.f32.mrf.mxu0  ;;  %v6129_v16 = vpop.f32.mrf.mxu1 }
 0x9af   :  { %v10656_v34 = vmul.f32 0.35355338, %v6213_v2  ;;  %v6439_v0 = vsel %vm2007_vm1, %v10648_v18, -inf  ;;  %v10668_v57 = vmul.f32 0.35355338, %v6129_v16  ;;  %v6433_v60 = vsel %vm2007_vm1, %v10660_v47, -inf }
 0x9b0   :  { %v8943_v15 = vpop.f32.mrf.mxu1 }
 0x9b1   :  { %6425 = vmax.xlane.f32.xlu1 %v6424_v38  ;;  %v8948_v39 = vpop.f32.mrf.mxu0  ;;  %v6436_v32 = vsel %vm2007_vm1, %v10656_v34, -inf  ;;  %v10674_v36 = vmul.f32 0.35355338, %v8943_v15  ;;  %v6430_v51 = vsel %vm2007_vm1, %v10668_v57, -inf }
 0x9b2   :  { %6422 = vmax.xlane.f32.xlu0 %v6421_v54  ;;  %v10664_v13 = vmul.f32 0.35355338, %v8948_v39  ;;  %v6297_v45 = vpop.f32.mrf.mxu1 }
 0x9b3   :  { %v10678_v4 = vmul.f32 0.35355338, %v6297_v45  ;;  %v6445_v23 = vsel %vm2007_vm1, %v10674_v36, -inf  ;;  %v6381_v25 = vpop.f32.mrf.mxu0 }
 0x9b4   :  { %v6451_v56 = vsel %vm2007_vm1, %v10664_v13, -inf  ;;  %v10690_v26 = vmul.f32 0.35355338, %v6381_v25 }
 0x9b5   :  { %6440 = vmax.xlane.f32.xlu1 %v6439_v0  ;;  %v6442_v7 = vsel %vm2007_vm1, %v10678_v4, -inf }
 0x9b6   :  { %6419 = vmax.xlane.f32.xlu0 %v6418_v37  ;;  %v6448_v31 = vsel %vm2007_vm1, %v10690_v26, -inf }
 0x9b9   :  { %6437 = vmax.xlane.f32.xlu1 %v6436_v32 }
 0x9ba   :  { %6434 = vmax.xlane.f32.xlu0 %v6433_v60 }
 0x9bd   :  { %6452 = vmax.xlane.f32.xlu1 %v6451_v56 }
 0x9be   :  { %6431 = vmax.xlane.f32.xlu0 %v6430_v51 }
 0x9c2   :  { %6446 = vmax.xlane.f32.xlu0 %v6445_v23 }
 0x9c6   :  { %6443 = vmax.xlane.f32.xlu0 %v6442_v7 }
 0x9ce   :  { %5426 = vrot.lane.b32.xlu1 %v10452_v17, %s9302_s18 }
 0x9d2   :  { %5430 = vrot.lane.b32.xlu1 %v10476_v63, %s9302_s18 }
 0x9dc   :  { %5422 = vrot.lane.b32.xlu0 %v10358_v44, %s9302_s18 }
 0x9f6   :  { %6449 = vmax.xlane.f32.xlu1 %v6448_v31 }
 0xa07   :  { %5434 = vrot.lane.b32.xlu1 %v10430_v20, %s9302_s18 }
 0xa2f   :  { %v6411_v43 = vpop.xlane.xlu0 %6410 }
 0xa30   :  { %v6455_v9 = vsub.f32 %v10624_v12, %v6411_v43 }
 0xa32   :  { %v6472_v17 = vmul.f32 1.442695, %v6455_v9  ;;  %v6414_v41 = vpop.xlane.xlu1 %6413 }
 0xa33   :  { %v6456_v63 = vsub.f32 %v10630_v42, %v6414_v41  ;;  %v6417_v58 = vpop.xlane.xlu0 %6416 }
 0xa34   :  { %9137 = vpow2.f32 %v6472_v17  ;;  %v6457_v44 = vsub.f32 %v10626_v52, %v6417_v58 }
 0xa35   :  { %v6474_v59 = vmul.f32 1.442695, %v6456_v63 }
 0xa36   :  { %v6476_v5 = vmul.f32 1.442695, %v6457_v44  ;;  %v6429_v49 = vpop.xlane.xlu1 %6428 }
 0xa37   :  { %v6461_v8 = vsub.f32 %v10636_v40, %v6429_v49  ;;  %v6408_v14 = vpop.xlane.xlu0 %6407 }
 0xa38   :  { %9139 = vpow2.f32 %v6476_v5  ;;  %v6454_v20 = vsub.f32 %v10634_v33, %v6408_v14 }
 0xa39   :  { %9141 = vpow2.f32 %v6474_v59  ;;  %v6484_v3 = vmul.f32 1.442695, %v6461_v8 }
 0xa3a   :  { %v6470_v12 = vmul.f32 1.442695, %v6454_v20  ;;  %v6426_v22 = vpop.xlane.xlu1 %6425 }
 0xa3b   :  { %v6460_v53 = vsub.f32 %v10640_v1, %v6426_v22  ;;  %v6423_v42 = vpop.xlane.xlu0 %6422 }
 0xa3c   :  { %9143 = vpow2.f32 %v6470_v12  ;;  %v6459_v30 = vsub.f32 %v10644_v46, %v6423_v42 }
 0xa3d   :  { %9145 = vpow2.f32 %v6484_v3  ;;  %v6482_v52 = vmul.f32 1.442695, %v6460_v53 }
 0xa3e   :  { %v6480_v55 = vmul.f32 1.442695, %v6459_v30  ;;  %v6441_v28 = vpop.xlane.xlu1 %6440 }
 0xa3f   :  { %v6465_v40 = vsub.f32 %v10648_v18, %v6441_v28  ;;  %v6420_v38 = vpop.xlane.xlu0 %6419 }
 0xa40   :  { %9147 = vpow2.f32 %v6480_v55  ;;  %v6458_v33 = vsub.f32 %v10652_v48, %v6420_v38 }
 0xa41   :  { %v10705_v2 = vpop.eup %9137  ;;  %9149 = vpow2.f32 %v6482_v52  ;;  %v6492_v54 = vmul.f32 1.442695, %v6465_v40 }
 0xa42   :  { %v6478_v6 = vmul.f32 1.442695, %v6458_v33  ;;  %v6438_v1 = vpop.xlane.xlu1 %6437  ;;  %v6505_v0 = vsel %vm2007_vm1, %v10705_v2, 0.0 }
 0xa43   :  { %v6464_v46 = vsub.f32 %v10656_v34, %v6438_v1  ;;  %6506 = vadd.xlane.f32.xlu0 %v6505_v0  ;;  %v6435_v39 = vpop.xlane.xlu0 %6434 }
 0xa44   :  { %9151 = vpow2.f32 %v6478_v6  ;;  %v6463_v18 = vsub.f32 %v10660_v47, %v6435_v39 }
 0xa45   :  { %v10711_v37 = vpop.eup %9139  ;;  %9153 = vpow2.f32 %v6492_v54  ;;  %v6490_v48 = vmul.f32 1.442695, %v6464_v46 }
 0xa46   :  { %v10713_v16 = vpop.eup %9141  ;;  %v6488_v32 = vmul.f32 1.442695, %v6463_v18  ;;  %v6453_v60 = vpop.xlane.xlu1 %6452  ;;  %v6511_v15 = vsel %vm2007_vm1, %v10711_v37, 0.0 }
 0xa47   :  { %v6469_v56 = vsub.f32 %v10664_v13, %v6453_v60  ;;  %6512 = vadd.xlane.f32.xlu1 %v6511_v15  ;;  %v6432_v34 = vpop.xlane.xlu0 %6431  ;;  %v6508_v47 = vsel %vm2007_vm1, %v10713_v16, 0.0 }
 0xa48   :  { %9155 = vpow2.f32 %v6488_v32  ;;  %v6462_v51 = vsub.f32 %v10668_v57, %v6432_v34 }
 0xa49   :  { %v10719_v45 = vpop.eup %9143  ;;  %9157 = vpow2.f32 %v6490_v48  ;;  %v6500_v23 = vmul.f32 1.442695, %v6469_v56 }
 0xa4a   :  { %v6486_v7 = vmul.f32 1.442695, %v6462_v51  ;;  %v6502_v25 = vsel %vm2007_vm1, %v10719_v45, 0.0  ;;  %v10725_v31 = vpop.eup %9145  ;;  %v5427_v38 = vpop.permute.xlu1 %5426 }
 0xa4b   :  { %6509 = vadd.xlane.f32.xlu1 %v6508_v47  ;;  %6503 = vadd.xlane.f32.xlu0 %v6502_v25  ;;  %v6447_v13 = vpop.xlane.xlu0 %6446  ;;  %v6523_v17 = vsel %vm2007_vm1, %v10725_v31, 0.0 }
 0xa4c   :  { %9159 = vpow2.f32 %v6486_v7  ;;  %v6467_v43 = vsub.f32 %v10674_v36, %v6447_v13 }
 0xa4d   :  { %v10728_v57 = vpop.eup %9147  ;;  %9161 = vpow2.f32 %v6500_v23 }
 0xa4e   :  { %v6496_v9 = vmul.f32 1.442695, %v6467_v43  ;;  %v6517_v41 = vsel %vm2007_vm1, %v10728_v57, 0.0  ;;  %v10734_v63 = vpop.eup %9149  ;;  %v5431_v33 = vpop.permute.xlu1 %5430 }
 0xa4f   :  { %6524 = vadd.xlane.f32.xlu1 %v6523_v17  ;;  %6518 = vadd.xlane.f32.xlu0 %v6517_v41  ;;  %v6444_v58 = vpop.xlane.xlu0 %6443  ;;  %v6520_v5 = vsel %vm2007_vm1, %v10734_v63, 0.0 }
 0xa50   :  { %9163 = vpow2.f32 %v6496_v9  ;;  %v6466_v44 = vsub.f32 %v10678_v4, %v6444_v58 }
 0xa51   :  { %v10737_v59 = vpop.eup %9151 }
 0xa52   :  { %v6494_v36 = vmul.f32 1.442695, %v6466_v44  ;;  %v6514_v49 = vsel %vm2007_vm1, %v10737_v59, 0.0  ;;  %v10743_v8 = vpop.eup %9153 }
 0xa53   :  { %6521 = vadd.xlane.f32.xlu1 %v6520_v5  ;;  %6515 = vadd.xlane.f32.xlu0 %v6514_v49  ;;  %v6535_v20 = vsel %vm2007_vm1, %v10743_v8, 0.0  ;;  %v5423_v54 = vpop.permute.xlu0 %5422 }
 0xa54   :  { %9165 = vpow2.f32 %v6494_v36  ;;  %v5446_v0 = vcombine.low %v5423_v54, %v5431_v33  ;;  %v5447_v46 = vcombine.high %v5423_v54, %v5431_v33 }
 0xa55   :  { %v10745_v14 = vpop.eup %9155 }
 0xa56   :  { %v6529_v4 = vsel %vm2007_vm1, %v10745_v14, 0.0  ;;  %v10751_v3 = vpop.eup %9157 }
 0xa57   :  { %6536 = vadd.xlane.f32.xlu1 %v6535_v20  ;;  %6530 = vadd.xlane.f32.xlu0 %v6529_v4  ;;  %v6532_v22 = vsel %vm2007_vm1, %v10751_v3, 0.0 }
 0xa59   :  { %v10753_v12 = vpop.eup %9159 }
 0xa5a   :  { %v6526_v53 = vsel %vm2007_vm1, %v10753_v12, 0.0  ;;  %v10759_v42 = vpop.eup %9161 }
 0xa5b   :  { %6533 = vadd.xlane.f32.xlu1 %v6532_v22  ;;  %6527 = vadd.xlane.f32.xlu0 %v6526_v53  ;;  %v6547_v52 = vsel %vm2007_vm1, %v10759_v42, 0.0 }
 0xa5d   :  { %v10761_v30 = vpop.eup %9163 }
 0xa5e   :  { %v6541_v55 = vsel %vm2007_vm1, %v10761_v30, 0.0 }
 0xa5f   :  { %6548 = vadd.xlane.f32.xlu1 %v6547_v52  ;;  %6542 = vadd.xlane.f32.xlu0 %v6541_v55 }
 0xa61   :  { %v10767_v28 = vpop.eup %9165 }
 0xa62   :  { %v6538_v40 = vsel %vm2007_vm1, %v10767_v28, 0.0 }
 0xa63   :  { %6539 = vadd.xlane.f32.xlu0 %v6538_v40 }
 0xa70   :  { %5428 = vrot.lane.b32.xlu1 %v10420_v50, %s9302_s18  ;;  %v5454_v50 = vrot.slane %v5446_v0, %v9473_v27 }
 0xa74   :  { %5432 = vrot.lane.b32.xlu1 %v10422_v24, %s9302_s18  ;;  %v5461_v24 = vrot.slane %v5447_v46, %v9473_v27 }
 0xa78   :  { %5436 = vrot.lane.b32.xlu1 %v10428_v19, %s9302_s18 }
 0xa7f   :  { %v6450_v6 = vpop.xlane.xlu1 %6449 }
 0xa80   :  { %v6468_v1 = vsub.f32 %v10690_v26, %v6450_v6 }
 0xa82   :  { %v6498_v39 = vmul.f32 1.442695, %v6468_v1 }
 0xa83   :  { %v5435_v18 = vpop.permute.xlu1 %5434 }
 0xa84   :  { %9167 = vpow2.f32 %v6498_v39  ;;  %v5462_v48 = vcombine.low %v5427_v38, %v5435_v18  ;;  %v5463_v32 = vcombine.high %v5427_v38, %v5435_v18 }
 0xa86   :  { %v5470_v60 = vrot.slane %v5462_v48, %v9473_v27  ;;  %v5477_v19 = vrot.slane %v5463_v32, %v9473_v27 }
 0xa88   :  { %v5478_v15 = vcombine.low %v5454_v50, %v5470_v60  ;;  %v5479_v56 = vcombine.high %v5454_v50, %v5470_v60  ;;  %v5494_v34 = vcombine.low %v5461_v24, %v5477_v19  ;;  %v5495_v51 = vcombine.high %v5461_v24, %v5477_v19 }
 0xa8a   :  { %v5486_v26 = vrot.slane %v5478_v15, %v9487_v35  ;;  %v5493_v47 = vrot.slane %v5479_v56, %v9487_v35  ;;  %v5502_v23 = vrot.slane %v5494_v34, %v9487_v35  ;;  %v5509_v7 = vrot.slane %v5495_v51, %v9487_v35 }
 0xa8c   :  { %v5582_v25 = vcombine.low %v5486_v26, %v5493_v47  ;;  %v8515_v13 = vcombine.high %v5486_v26, %v5493_v47  ;;  %v5598_v43 = vcombine.low %v5502_v23, %v5509_v7  ;;  %v8516_v9 = vcombine.high %v5502_v23, %v5509_v7 }
 0xa8e   :  { %v5589_v17 = vrot.slane %v5582_v25, %v9473_v27  ;;  %v5597_v41 = vrot.slane %v8515_v13, %v9473_v27  ;;  %v5605_v58 = vrot.slane %v5598_v43, %v9473_v27  ;;  %v5613_v44 = vrot.slane %v8516_v9, %v9473_v27 }
 0xa90   :  { %v5614_v36 = vcombine.low %v5589_v17, %v5597_v41  ;;  %v5630_v5 = vcombine.low %v5605_v58, %v5613_v44  ;;  %v5615_v49 = vcombine.high %v5589_v17, %v5597_v41  ;;  %v5631_v20 = vcombine.high %v5605_v58, %v5613_v44 }
 0xa91   :  { %v10790_v4 = vpop.eup %9167 }
 0xa92   :  { %v6544_v22 = vsel %vm2007_vm1, %v10790_v4, 0.0  ;;  %v5622_v53 = vrot.slane %v5614_v36, %v9487_v35  ;;  %v5638_v52 = vrot.slane %v5630_v5, %v9487_v35  ;;  %v5629_v55 = vrot.slane %v5615_v49, %v9487_v35 }
 0xa93   :  { %6545 = vadd.xlane.f32.xlu0 %v6544_v22  ;;  %v5645_v40 = vrot.slane %v5631_v20, %v9487_v35 }
 0xa94   :  { %v5646_v38 = vcombine.low %v5622_v53, %v5638_v52  ;;  %v5647_v33 = vcombine.high %v5622_v53, %v5638_v52 }
 0xa95   :  { %v5648_v54 = vcombine.low %v5629_v55, %v5645_v40  ;;  %v5649_v6 = vcombine.high %v5629_v55, %v5645_v40 }
 0xa96   :  { %8949 = vmatprep.subr.mxu1 %v5646_v38  ;;  %8954 = vmatprep.subr.mxu0 %v5647_v33 }
 0xa97   :  { %8950 = vmatpush3.msra.mxu1 %v5646_v38  ;;  %8955 = vmatpush3.msra.mxu0 %v5647_v33 }
 0xa98   :  { %8959 = vmatprep.subr.mxu1 %v5648_v54  ;;  %8964 = vmatprep.subr.mxu0 %v5649_v6 }
 0xaa9   :  { %5424 = vrot.lane.b32.xlu0 %v10352_v11, %s9302_s18 }
 0xacc   :  { %v6507_v1 = vpop.xlane.xlu0 %6506 }
 0xacd   :  { %9169 = vrcp.f32 %v6507_v1 }
 0xad0   :  { %v6513_v0 = vpop.xlane.xlu1 %6512 }
 0xad1   :  { %9171 = vrcp.f32 %v6513_v0 }
 0xad4   :  { %v6510_v46 = vpop.xlane.xlu1 %6509  ;;  %v6504_v39 = vpop.xlane.xlu0 %6503 }
 0xad5   :  { %9173 = vrcp.f32 %v6510_v46 }
 0xad6   :  { %9175 = vrcp.f32 %v6504_v39 }
 0xad8   :  { %v6525_v18 = vpop.xlane.xlu1 %6524  ;;  %v6519_v48 = vpop.xlane.xlu0 %6518 }
 0xad9   :  { %9177 = vrcp.f32 %v6525_v18 }
 0xada   :  { %9179 = vrcp.f32 %v6519_v48  ;;  %v9170_v24 = vpop.eup %9169 }
 0xadb   :  { %v6553_v7 = vmul.f32 %v9170_v24, %v10705_v2 }
 0xadc   :  { %v6522_v32 = vpop.xlane.xlu1 %6521  ;;  %v6516_v50 = vpop.xlane.xlu0 %6515 }
 0xadd   :  { %9181 = vrcp.f32 %v6522_v32 }
 0xade   :  { %9183 = vrcp.f32 %v6516_v50  ;;  %v9172_v11 = vpop.eup %9171 }
 0xadf   :  { %v6557_v23 = vmul.f32 %v9172_v11, %v10711_v37 }
 0xae0   :  { %v6537_v60 = vpop.xlane.xlu1 %6536  ;;  %v6531_v19 = vpop.xlane.xlu0 %6530 }
 0xae2   :  { %v9174_v15 = vpop.eup %9173 }
 0xae3   :  { %v9176_v56 = vpop.eup %9175  ;;  %v6555_v34 = vmul.f32 %v9174_v15, %v10713_v16 }
 0xae4   :  { %v6534_v51 = vpop.xlane.xlu1 %6533  ;;  %v6528_v26 = vpop.xlane.xlu0 %6527  ;;  %v6551_v47 = vmul.f32 %v9176_v56, %v10719_v45 }
 0xae5   :  { %9185 = vrcp.f32 %v6534_v51  ;;  %8956 = vmatprep.mubr.msk.f32.mxu0 %vm2007_vm1, %v6555_v34 }
 0xae6   :  { %9187 = vrcp.f32 %v6528_v26  ;;  %8951 = vmatprep.mubr.msk.f32.mxu1 %vm2007_vm1, %v6551_v47  ;;  %8957 = vmatmul.mubr.msk.f32.vlgmr.msra.gmra.mxu0 %vm2007_vm1, %v6557_v23  ;;  %v9178_v16 = vpop.eup %9177 }
 0xae7   :  { %8952 = vmatmul.mubr.msk.f32.vlgmr.msra.gmra.mxu1 %vm2007_vm1, %v6553_v7  ;;  %8965 = vmatpush3.msra.mxu0 %v5649_v6  ;;  %v9180_v25 = vpop.eup %9179  ;;  %v6565_v9 = vmul.f32 %v9178_v16, %v10725_v31  ;;  %9189 = vrcp.f32 %v6537_v60 }
 0xae8   :  { %8960 = vmatpush3.msra.mxu1 %v5648_v54  ;;  %v6561_v2 = vmul.f32 %v9180_v25, %v10728_v57  ;;  %v6549_v31 = vpop.xlane.xlu1 %6548  ;;  %v6543_v44 = vpop.xlane.xlu0 %6542  ;;  %9191 = vrcp.f32 %v6531_v19 }
 0xae9   :  { %9193 = vrcp.f32 %v6549_v31 }
 0xaea   :  { %v9182_v13 = vpop.eup %9181  ;;  %9195 = vrcp.f32 %v6543_v44 }
 0xaeb   :  { %v9184_v45 = vpop.eup %9183  ;;  %v6563_v37 = vmul.f32 %v9182_v13, %v10734_v63 }
 0xaec   :  { %v6559_v43 = vmul.f32 %v9184_v45, %v10737_v59  ;;  %v5429_v59 = vpop.permute.xlu1 %5428  ;;  %v6540_v36 = vpop.xlane.xlu0 %6539 }
 0xaed   :  { %8966 = vmatprep.mubr.msk.f32.mxu0 %vm2007_vm1, %v6563_v37  ;;  %9197 = vrcp.f32 %v6540_v36 }
 0xaee   :  { %8961 = vmatprep.mubr.msk.f32.mxu1 %vm2007_vm1, %v6559_v43  ;;  %8967 = vmatmul.mubr.msk.f32.vlgmr.msra.gmra.mxu0 %vm2007_vm1, %v6565_v9 }
 0xaef   :  { %8962 = vmatmul.mubr.msk.f32.vlgmr.msra.gmra.mxu1 %vm2007_vm1, %v6561_v2 }
 0xaf0   :  { %v5433_v57 = vpop.permute.xlu1 %5432 }
 0xaf2   :  { %v9186_v17 = vpop.eup %9185 }
 0xaf3   :  { %v9188_v41 = vpop.eup %9187  ;;  %v6571_v58 = vmul.f32 %v9186_v17, %v10751_v3 }
 0xaf4   :  { %v6567_v63 = vmul.f32 %v9188_v41, %v10753_v12  ;;  %v5437_v5 = vpop.permute.xlu1 %5436  ;;  %v9190_v56 = vpop.eup %9189 }
 0xaf5   :  { %8976 = vmatprep.mubr.msk.f32.mxu0 %vm2007_vm1, %v6571_v58  ;;  %v5530_v20 = vcombine.low %v5429_v59, %v5437_v5  ;;  %v5531_v22 = vcombine.high %v5429_v59, %v5437_v5  ;;  %v9192_v34 = vpop.eup %9191  ;;  %v6573_v58 = vmul.f32 %v9190_v56, %v10743_v8 }
 0xaf6   :  { %8971 = vmatprep.mubr.msk.f32.mxu1 %vm2007_vm1, %v6567_v63  ;;  %v9194_v7 = vpop.eup %9193  ;;  %v6569_v41 = vmul.f32 %v9192_v34, %v10745_v14 }
 0xaf7   :  { %v5538_v12 = vrot.slane %v5530_v20, %v9473_v27  ;;  %v5545_v55 = vrot.slane %v5531_v22, %v9473_v27  ;;  %v9196_v16 = vpop.eup %9195  ;;  %v6581_v8 = vmul.f32 %v9194_v7, %v10759_v42  ;;  %v7835_v42 = vld [vmem:[%s11128_s3 + $0x28] sm:$0xff] }
 0xaf8   :  { %v6577_v14 = vmul.f32 %v9196_v16, %v10761_v30  ;;  %v7834_v30 = vld [vmem:[%s11128_s3 + $0x20] sm:$0xff] }
 0xafa   :  { %v9198_v43 = vpop.eup %9197 }
 0xafb   :  { %v6575_v59 = vmul.f32 %v9198_v43, %v10767_v28  ;;  %v7836_v28 = vld [vmem:[%s11128_s3 + $0x30] sm:$0xff] }
 0xafc   :  { %7851 = vrot.lane.b32.xlu1 %v7836_v28, %s9302_s18 }
 0xb00   :  { %7849 = vrot.lane.b32.xlu1 %v7835_v42, %s9302_s18 }
 0xb1c   :  { %v6546_v49 = vpop.xlane.xlu0 %6545 }
 0xb1d   :  { %9199 = vrcp.f32 %v6546_v49 }
 0xb20   :  { %v5425_v53 = vpop.permute.xlu0 %5424 }
 0xb21   :  { %v5514_v3 = vcombine.low %v5425_v53, %v5433_v57  ;;  %v5515_v52 = vcombine.high %v5425_v53, %v5433_v57 }
 0xb23   :  { %v5522_v40 = vrot.slane %v5514_v3, %v9473_v27  ;;  %v5529_v38 = vrot.slane %v5515_v52, %v9473_v27 }
 0xb25   :  { %v5546_v33 = vcombine.low %v5522_v40, %v5538_v12  ;;  %v5547_v54 = vcombine.high %v5522_v40, %v5538_v12  ;;  %v5562_v6 = vcombine.low %v5529_v38, %v5545_v55  ;;  %v5563_v1 = vcombine.high %v5529_v38, %v5545_v55 }
 0xb27   :  { %v5554_v0 = vrot.slane %v5546_v33, %v9487_v35  ;;  %v5561_v46 = vrot.slane %v5547_v54, %v9487_v35  ;;  %v5570_v39 = vrot.slane %v5562_v6, %v9487_v35  ;;  %v5577_v18 = vrot.slane %v5563_v1, %v9487_v35 }
 0xb29   :  { %v5650_v48 = vcombine.low %v5554_v0, %v5561_v46  ;;  %v8517_v32 = vcombine.high %v5554_v0, %v5561_v46  ;;  %v5666_v50 = vcombine.low %v5570_v39, %v5577_v18  ;;  %v8518_v24 = vcombine.high %v5570_v39, %v5577_v18 }
 0xb2a   :  { %v9200_v17 = vpop.eup %9199 }
 0xb2b   :  { %v5657_v60 = vrot.slane %v5650_v48, %v9473_v27  ;;  %v5665_v19 = vrot.slane %v8517_v32, %v9473_v27  ;;  %v5673_v11 = vrot.slane %v5666_v50, %v9473_v27  ;;  %v5681_v15 = vrot.slane %v8518_v24, %v9473_v27 }
 0xb2c   :  { %v6579_v44 = vmul.f32 %v9200_v17, %v10790_v4  ;;  %v7837_v4 = vld [vmem:[%s11128_s3 + $0x38] sm:$0xff] }
 0xb2d   :  { %v5682_v51 = vcombine.low %v5657_v60, %v5665_v19  ;;  %v5698_v26 = vcombine.low %v5673_v11, %v5681_v15  ;;  %v5683_v47 = vcombine.high %v5657_v60, %v5665_v19  ;;  %v5699_v23 = vcombine.high %v5673_v11, %v5681_v15  ;;  %7853 = vrot.lane.b32.xlu0 %v7837_v4, %s9302_s18 }
 0xb2f   :  { %v5690_v25 = vrot.slane %v5682_v51, %v9487_v35  ;;  %v5706_v13 = vrot.slane %v5698_v26, %v9487_v35  ;;  %v5697_v45 = vrot.slane %v5683_v47, %v9487_v35  ;;  %v5713_v37 = vrot.slane %v5699_v23, %v9487_v35 }
 0xb31   :  { %v5714_v9 = vcombine.low %v5690_v25, %v5706_v13  ;;  %v5715_v2 = vcombine.high %v5690_v25, %v5706_v13  ;;  %v5716_v63 = vcombine.low %v5697_v45, %v5713_v37  ;;  %v5717_v31 = vcombine.high %v5697_v45, %v5713_v37  ;;  %7847 = vrot.lane.b32.xlu0 %v7834_v30, %s9302_s18 }
 0xb33   :  { %8969 = vmatprep.subr.mxu1 %v5714_v9  ;;  %8974 = vmatprep.subr.mxu0 %v5715_v2 }
 0xb34   :  { %8970 = vmatpush3.msra.mxu1 %v5714_v9  ;;  %8975 = vmatpush3.msra.mxu0 %v5715_v2 }
 0xb35   :  { %8972 = vmatmul.mubr.msk.f32.vlgmr.msra.gmra.mxu1 %vm2007_vm1, %v6569_v41  ;;  %8977 = vmatmul.mubr.msk.f32.vlgmr.msra.gmra.mxu0 %vm2007_vm1, %v6573_v58 }
 0xb36   :  { %8979 = vmatprep.subr.mxu1 %v5716_v63  ;;  %8984 = vmatprep.subr.mxu0 %v5717_v31 }
 0xb37   :  { %8980 = vmatpush3.msra.mxu1 %v5716_v63  ;;  %8981 = vmatprep.mubr.msk.f32.mxu1 %vm2007_vm1, %v6575_v59 }
 0xb38   :  { %8985 = vmatpush3.msra.mxu0 %v5717_v31  ;;  %8986 = vmatprep.mubr.msk.f32.mxu0 %vm2007_vm1, %v6579_v44 }
 0xb39   :  { %8982 = vmatmul.mubr.msk.f32.vlgmr.msra.gmra.mxu1 %vm2007_vm1, %v6577_v14  ;;  %8987 = vmatmul.mubr.msk.f32.vlgmr.msra.gmra.mxu0 %vm2007_vm1, %v6581_v8 }
 0xb6e   :  { %v7852_v40 = vpop.permute.xlu1 %7851 }
 0xb72   :  { %v7850_v34 = vpop.permute.xlu1 %7849 }
 0xb9f   :  { %v7854_v0 = vpop.permute.xlu0 %7853 }
 0xba0   :  { %8989 = vmatprep.subr.mxu1 %v7854_v0 }
 0xba1   :  { %8990 = vmatpush3.msra.mxu1 %v7854_v0 }
 0xba2   :  { %8991 = vmatprep.subr.mxu1 %v7852_v40 }
 0xba3   :  { %8992 = vmatpush3.msra.mxu1 %v7852_v40  ;;  %v7848_v45 = vpop.permute.xlu0 %7847 }
 0xba4   :  { %8993 = vmatprep.subr.mxu1 %v7850_v34 }
 0xba5   :  { %8994 = vmatpush3.msra.mxu1 %v7850_v34 }
 0xba6   :  { %v8958_v57 = vpop.f32.mrf.mxu0  ;;  %8995 = vmatprep.subr.mxu1 %v7848_v45 }
 0xba7   :  { %v8953_v36 = vpop.f32.mrf.mxu1  ;;  %8996 = vmatpush3.msra.mxu1 %v7848_v45 }
 0xba8   :  { %v6735_v5 = vpop.f32.mrf.mxu0 }
 0xba9   :  { %v6654_v49 = vpop.f32.mrf.mxu1 }
 0xbae   :  { %v8968_v20 = vpop.f32.mrf.mxu0 }
 0xbaf   :  { %v8963_v22 = vpop.f32.mrf.mxu1  ;;  %v7314_v53 = vcombine.low %v8958_v57, %v8968_v20  ;;  %v7315_v3 = vcombine.high %v8958_v57, %v8968_v20 }
 0xbb0   :  { %v7298_v52 = vcombine.low %v8953_v36, %v8963_v22  ;;  %v7299_v12 = vcombine.high %v8953_v36, %v8963_v22  ;;  %v6897_v55 = vpop.f32.mrf.mxu0 }
 0xbb1   :  { %v7322_v38 = vrot.slane %v7314_v53, %v9473_v27  ;;  %v7329_v33 = vrot.slane %v7315_v3, %v9473_v27  ;;  %v6816_v54 = vpop.f32.mrf.mxu1  ;;  %v7246_v6 = vcombine.low %v6735_v5, %v6897_v55  ;;  %v7247_v1 = vcombine.high %v6735_v5, %v6897_v55 }
 0xbb2   :  { %v7306_v46 = vrot.slane %v7298_v52, %v9473_v27  ;;  %v7313_v39 = vrot.slane %v7299_v12, %v9473_v27  ;;  %v7230_v18 = vcombine.low %v6654_v49, %v6816_v54  ;;  %v7231_v48 = vcombine.high %v6654_v49, %v6816_v54 }
 0xbb3   :  { %v7254_v32 = vrot.slane %v7246_v6, %v9473_v27  ;;  %v7261_v50 = vrot.slane %v7247_v1, %v9473_v27 }
 0xbb4   :  { %v7330_v24 = vcombine.low %v7306_v46, %v7322_v38  ;;  %v7331_v60 = vcombine.high %v7306_v46, %v7322_v38  ;;  %v7346_v19 = vcombine.low %v7313_v39, %v7329_v33  ;;  %v7347_v11 = vcombine.high %v7313_v39, %v7329_v33 }
 0xbb5   :  { %v7238_v15 = vrot.slane %v7230_v18, %v9473_v27  ;;  %v7245_v56 = vrot.slane %v7231_v48, %v9473_v27 }
 0xbb6   :  { %v7338_v51 = vrot.slane %v7330_v24, %v9487_v35  ;;  %v7345_v26 = vrot.slane %v7331_v60, %v9487_v35  ;;  %v7354_v47 = vrot.slane %v7346_v19, %v9487_v35  ;;  %v7361_v23 = vrot.slane %v7347_v11, %v9487_v35 }
 0xbb7   :  { %v7262_v7 = vcombine.low %v7238_v15, %v7254_v32  ;;  %v7263_v16 = vcombine.high %v7238_v15, %v7254_v32  ;;  %v7278_v25 = vcombine.low %v7245_v56, %v7261_v50  ;;  %v7279_v13 = vcombine.high %v7245_v56, %v7261_v50 }
 0xbb8   :  { %v7570_v37 = vcombine.low %v7338_v51, %v7345_v26  ;;  %v8561_v43 = vcombine.high %v7338_v51, %v7345_v26  ;;  %v7586_v9 = vcombine.low %v7354_v47, %v7361_v23  ;;  %v8562_v2 = vcombine.high %v7354_v47, %v7361_v23 }
 0xbb9   :  { %v7270_v17 = vrot.slane %v7262_v7, %v9487_v35  ;;  %v7277_v41 = vrot.slane %v7263_v16, %v9487_v35  ;;  %v7286_v58 = vrot.slane %v7278_v25, %v9487_v35  ;;  %v7293_v63 = vrot.slane %v7279_v13, %v9487_v35 }
 0xbba   :  { %v7577_v31 = vrot.slane %v7570_v37, %v9473_v27  ;;  %v7585_v59 = vrot.slane %v8561_v43, %v9473_v27  ;;  %v7593_v44 = vrot.slane %v7586_v9, %v9473_v27  ;;  %v7601_v14 = vrot.slane %v8562_v2, %v9473_v27 }
 0xbbb   :  { %v7502_v8 = vcombine.low %v7270_v17, %v7277_v41  ;;  %v8559_v28 = vcombine.high %v7270_v17, %v7277_v41  ;;  %v7518_v4 = vcombine.low %v7286_v58, %v7293_v63  ;;  %v8560_v42 = vcombine.high %v7286_v58, %v7293_v63 }
 0xbbc   :  { %v7603_v30 = vcombine.high %v7577_v31, %v7585_v59  ;;  %v7619_v57 = vcombine.high %v7593_v44, %v7601_v14  ;;  %v7602_v36 = vcombine.low %v7577_v31, %v7585_v59  ;;  %v7618_v5 = vcombine.low %v7593_v44, %v7601_v14 }
 0xbbd   :  { %v7509_v49 = vrot.slane %v7502_v8, %v9473_v27  ;;  %v7517_v20 = vrot.slane %v8559_v28, %v9473_v27  ;;  %v7525_v22 = vrot.slane %v7518_v4, %v9473_v27  ;;  %v7533_v53 = vrot.slane %v8560_v42, %v9473_v27 }
 0xbbe   :  { %v7617_v3 = vrot.slane %v7603_v30, %v9487_v35  ;;  %v7633_v52 = vrot.slane %v7619_v57, %v9487_v35  ;;  %v10891_v12 = vrot.slane %v7602_v36, %v9487_v35  ;;  %v10894_v55 = vrot.slane %v7618_v5, %v9487_v35 }
 0xbbf   :  { %v7535_v40 = vcombine.high %v7509_v49, %v7517_v20  ;;  %v7551_v38 = vcombine.high %v7525_v22, %v7533_v53  ;;  %v7534_v33 = vcombine.low %v7509_v49, %v7517_v20  ;;  %v7550_v54 = vcombine.low %v7525_v22, %v7533_v53 }
 0xbc0   :  { %v7637_v6 = vcombine.high %v7617_v3, %v7633_v52  ;;  %v7635_v1 = vcombine.high %v10891_v12, %v10894_v55  ;;  %v7634_v0 = vcombine.low %v10891_v12, %v10894_v55  ;;  %v7636_v50 = vcombine.low %v7617_v3, %v7633_v52 }
 0xbc1   :  { %v7549_v46 = vrot.slane %v7535_v40, %v9487_v35  ;;  %v7565_v39 = vrot.slane %v7551_v38, %v9487_v35  ;;  %v10903_v18 = vrot.slane %v7534_v33, %v9487_v35  ;;  %v10906_v48 = vrot.slane %v7550_v54, %v9487_v35 }
 0xbc2   :  { %7812 = vrot.lane.b32.xlu1 %v7637_v6, %s9307_s7  ;;  %7780 = vrot.lane.b32.xlu0 %v7635_v1, %s9297_s25 }
 0xbc3   :  { %v7566_v32 = vcombine.low %v10903_v18, %v10906_v48  ;;  %v7568_v24 = vcombine.low %v7549_v46, %v7565_v39  ;;  %v7569_v60 = vcombine.high %v7549_v46, %v7565_v39  ;;  %v7567_v19 = vcombine.high %v10903_v18, %v10906_v48 }
 0xbc6   :  { %7796 = vrot.lane.b32.xlu0 %v7636_v50, %s9308_s8  ;;  %7794 = vrot.lane.b32.xlu1 %v7568_v24, %s9308_s8 }
 0xbca   :  { %7810 = vrot.lane.b32.xlu1 %v7569_v60, %s9307_s7  ;;  %7778 = vrot.lane.b32.xlu0 %v7567_v19, %s9297_s25 }
 0xbf5   :  { %v8973_v11 = vpop.f32.mrf.mxu1  ;;  %v8978_v15 = vpop.f32.mrf.mxu0 }
 0xbf7   :  { %v6978_v56 = vpop.f32.mrf.mxu1  ;;  %v7059_v34 = vpop.f32.mrf.mxu0 }
 0xbf9   :  { %v8983_v51 = vpop.f32.mrf.mxu1  ;;  %v8988_v26 = vpop.f32.mrf.mxu0 }
 0xbfa   :  { %v7434_v47 = vcombine.low %v8973_v11, %v8983_v51  ;;  %v7435_v23 = vcombine.high %v8973_v11, %v8983_v51  ;;  %v7450_v7 = vcombine.low %v8978_v15, %v8988_v26  ;;  %v7451_v16 = vcombine.high %v8978_v15, %v8988_v26 }
 0xbfb   :  { %v7140_v25 = vpop.f32.mrf.mxu1  ;;  %v7221_v13 = vpop.f32.mrf.mxu0 }
 0xbfc   :  { %v7442_v45 = vrot.slane %v7434_v47, %v9473_v27  ;;  %v7449_v37 = vrot.slane %v7435_v23, %v9473_v27  ;;  %v7458_v43 = vrot.slane %v7450_v7, %v9473_v27  ;;  %v7465_v9 = vrot.slane %v7451_v16, %v9473_v27 }
 0xbfd   :  { %v7366_v2 = vcombine.low %v6978_v56, %v7140_v25  ;;  %v7367_v17 = vcombine.high %v6978_v56, %v7140_v25  ;;  %v7382_v41 = vcombine.low %v7059_v34, %v7221_v13  ;;  %v7383_v58 = vcombine.high %v7059_v34, %v7221_v13 }
 0xbfe   :  { %v7466_v63 = vcombine.low %v7442_v45, %v7458_v43  ;;  %v7467_v31 = vcombine.high %v7442_v45, %v7458_v43  ;;  %v7482_v59 = vcombine.low %v7449_v37, %v7465_v9  ;;  %v7483_v44 = vcombine.high %v7449_v37, %v7465_v9 }
 0xbff   :  { %v7374_v14 = vrot.slane %v7366_v2, %v9473_v27  ;;  %v7381_v8 = vrot.slane %v7367_v17, %v9473_v27  ;;  %v7390_v28 = vrot.slane %v7382_v41, %v9473_v27  ;;  %v7397_v4 = vrot.slane %v7383_v58, %v9473_v27 }
 0xc00   :  { %v7474_v42 = vrot.slane %v7466_v63, %v9487_v35  ;;  %v7481_v30 = vrot.slane %v7467_v31, %v9487_v35  ;;  %v7490_v57 = vrot.slane %v7482_v59, %v9487_v35  ;;  %v7497_v36 = vrot.slane %v7483_v44, %v9487_v35 }
 0xc01   :  { %v7398_v5 = vcombine.low %v7374_v14, %v7390_v28  ;;  %v7399_v49 = vcombine.high %v7374_v14, %v7390_v28  ;;  %v7414_v20 = vcombine.low %v7381_v8, %v7397_v4  ;;  %v7415_v22 = vcombine.high %v7381_v8, %v7397_v4 }
 0xc02   :  { %v7706_v53 = vcombine.low %v7474_v42, %v7481_v30  ;;  %v8565_v3 = vcombine.high %v7474_v42, %v7481_v30  ;;  %v7722_v52 = vcombine.low %v7490_v57, %v7497_v36  ;;  %v8566_v40 = vcombine.high %v7490_v57, %v7497_v36 }
 0xc03   :  { %v7406_v38 = vrot.slane %v7398_v5, %v9487_v35  ;;  %v7413_v33 = vrot.slane %v7399_v49, %v9487_v35  ;;  %v7422_v54 = vrot.slane %v7414_v20, %v9487_v35  ;;  %v7429_v6 = vrot.slane %v7415_v22, %v9487_v35 }
 0xc04   :  { %v7713_v1 = vrot.slane %v7706_v53, %v9473_v27  ;;  %v7721_v46 = vrot.slane %v8565_v3, %v9473_v27  ;;  %v7729_v39 = vrot.slane %v7722_v52, %v9473_v27  ;;  %v7737_v50 = vrot.slane %v8566_v40, %v9473_v27 }
 0xc05   :  { %v7638_v24 = vcombine.low %v7406_v38, %v7413_v33  ;;  %v8563_v60 = vcombine.high %v7406_v38, %v7413_v33  ;;  %v7654_v19 = vcombine.low %v7422_v54, %v7429_v6  ;;  %v8564_v11 = vcombine.high %v7422_v54, %v7429_v6 }
 0xc06   :  { %v7738_v15 = vcombine.low %v7713_v1, %v7721_v46  ;;  %v7754_v56 = vcombine.low %v7729_v39, %v7737_v50  ;;  %v7739_v34 = vcombine.high %v7713_v1, %v7721_v46  ;;  %v7755_v51 = vcombine.high %v7729_v39, %v7737_v50  ;;  %v8567_v39 = vld [vmem:[#allocation5 + $0x7] ss:$0 sm:$0xff] }
 0xc07   :  { %v7645_v26 = vrot.slane %v7638_v24, %v9473_v27  ;;  %v7653_v47 = vrot.slane %v8563_v60, %v9473_v27  ;;  %v7661_v23 = vrot.slane %v7654_v19, %v9473_v27  ;;  %v7669_v7 = vrot.slane %v8564_v11, %v9473_v27 }
 0xc08   :  { %v7746_v16 = vrot.slane %v7738_v15, %v9487_v35  ;;  %v7762_v25 = vrot.slane %v7754_v56, %v9487_v35  ;;  %v7753_v2 = vrot.slane %v7739_v34, %v9487_v35  ;;  %v7769_v17 = vrot.slane %v7755_v51, %v9487_v35 }
 0xc09   :  { %v7670_v13 = vcombine.low %v7645_v26, %v7653_v47  ;;  %v7686_v45 = vcombine.low %v7661_v23, %v7669_v7  ;;  %v7671_v37 = vcombine.high %v7645_v26, %v7653_v47  ;;  %v7687_v43 = vcombine.high %v7661_v23, %v7669_v7  ;;  %v8045_v26 = vld [vmem:[%s11129_s4 + $0x38] sm:$0xff]  ;;  %v8044_v47 = vld [vmem:[%s11129_s4 + $0x30] sm:$0xff]  ;;  %v8043_v23 = vld [vmem:[%s11129_s4 + $0x28] sm:$0xff] }
 0xc0a   :  { %v7771_v9 = vcombine.high %v7746_v16, %v7762_v25  ;;  %v7770_v41 = vcombine.low %v7746_v16, %v7762_v25  ;;  %v7772_v14 = vcombine.low %v7753_v2, %v7769_v17  ;;  %v7773_v28 = vcombine.high %v7753_v2, %v7769_v17  ;;  %8095 = vmatprep.subr.mxu0 %v8045_v26  ;;  %v8042_v7 = vld [vmem:[%s11129_s4 + $0x20] sm:$0xff]  ;;  %v8041_v25 = vld [vmem:[%s11129_s4 + $0x18] sm:$0xff] }
 0xc0b   :  { %v7678_v58 = vrot.slane %v7670_v13, %v9487_v35  ;;  %v7694_v63 = vrot.slane %v7686_v45, %v9487_v35  ;;  %v7685_v31 = vrot.slane %v7671_v37, %v9487_v35  ;;  %v7701_v59 = vrot.slane %v7687_v43, %v9487_v35  ;;  %8096 = vmatpush1.msra.mxu0 %v8044_v47  ;;  %v8040_v13 = vld [vmem:[%s11129_s4 + $0x10] sm:$0xff]  ;;  %v8039_v45 = vld [vmem:[%s11129_s4 + $0x8] sm:$0xff]  ;;  %v8038_v37 = vld [vmem:[%s11129_s4] sm:$0xff] }
 0xc0c   :  { %7784 = vrot.lane.b32.xlu1 %v7771_v9, %s9297_s25  ;;  %v9309_v16 = vmov 0.0   ;;  %8097 = vmatprep.subr.mxu0 %v8043_v23 }
 0xc0d   :  { %v7703_v27 = vcombine.high %v7678_v58, %v7694_v63  ;;  %v7702_v44 = vcombine.low %v7678_v58, %v7694_v63  ;;  %v7704_v8 = vcombine.low %v7685_v31, %v7701_v59  ;;  %v7705_v4 = vcombine.high %v7685_v31, %v7701_v59  ;;  %8135 = vmatprep.mubr.f32.mxu0 %v9309_v16 }
 0xc0e   :  { %8098 = vmatpush1.msra.mxu0 %v8042_v7 }
 0xc0f   :  { %7782 = vrot.lane.b32.xlu0 %v7703_v27, %s9297_s25  ;;  %8099 = vmatprep.subr.mxu0 %v8041_v25 }
 0xc10   :  { %7800 = vrot.lane.b32.xlu1 %v7772_v14, %s9308_s8  ;;  %8100 = vmatpush1.msra.mxu0 %v8040_v13 }
 0xc11   :  { %8101 = vmatprep.subr.mxu0 %v8039_v45 }
 0xc12   :  { %8102 = vmatpush1.msra.mxu0 %v8038_v37 }
 0xc13   :  { %7798 = vrot.lane.b32.xlu0 %v7704_v8, %s9308_s8 }
 0xc14   :  { %7816 = vrot.lane.b32.xlu1 %v7773_v28, %s9307_s7 }
 0xc17   :  { %7814 = vrot.lane.b32.xlu0 %v7705_v4, %s9307_s7 }
 0xc34   :  { %v7813_v42 = vpop.permute.xlu1 %7812  ;;  %v7781_v30 = vpop.permute.xlu0 %7780 }
 0xc35   :  { %v7823_v35 = vsel %vm2007_vm1, %v7634_v0, %v7781_v30 }
 0xc38   :  { %v7795_v57 = vpop.permute.xlu1 %7794  ;;  %v7797_v36 = vpop.permute.xlu0 %7796 }
 0xc39   :  { %v7827_v49 = vsel %vm2720_vm2, %v7823_v35, %v7797_v36 }
 0xc3a   :  { %v7831_v52 = vsel %vm4145_vm3, %v7827_v49, %v7813_v42 }
 0xc3c   :  { %v7779_v5 = vpop.permute.xlu0 %7778  ;;  %v7811_v22 = vpop.permute.xlu1 %7810 }
 0xc3d   :  { %v7822_v20 = vsel %vm2007_vm1, %v7566_v32, %v7779_v5 }
 0xc3e   :  { %v7826_v53 = vsel %vm2720_vm2, %v7822_v20, %v7795_v57 }
 0xc3f   :  { %v7830_v3 = vsel %vm4145_vm3, %v7826_v53, %v7811_v22 }
 0xc40   :  { %8997 = vmatprep.mubr.msk.f32.mxu1 %vm60_vm0, %v7830_v3 }
 0xc41   :  { %8998 = vmatmul.mubr.msk.f32.vlgmr.msra.gmra.mxu1 %vm60_vm0, %v7831_v52  ;;  %v8572_v52 = vld [vmem:[#allocation5 + $0x4] ss:$0 sm:$0xff] }
 0xc7e   :  { %v7785_v12 = vpop.permute.xlu1 %7784 }
 0xc7f   :  { %v7825_v48 = vsel %vm2007_vm1, %v7770_v41, %v7785_v12 }
 0xc81   :  { %v7783_v55 = vpop.permute.xlu0 %7782 }
 0xc82   :  { %v7801_v0 = vpop.permute.xlu1 %7800  ;;  %v7824_v38 = vsel %vm2007_vm1, %v7702_v44, %v7783_v55  ;;  %v8573_v55 = vld [vmem:[#allocation5 + $0x5] ss:$0 sm:$0xff] }
 0xc83   :  { %v7829_v54 = vsel %vm2720_vm2, %v7825_v48, %v7801_v0 }
 0xc85   :  { %v7799_v40 = vpop.permute.xlu0 %7798 }
 0xc86   :  { %v7817_v18 = vpop.permute.xlu1 %7816  ;;  %v7828_v32 = vsel %vm2720_vm2, %v7824_v38, %v7799_v40 }
 0xc87   :  { %v7833_v1 = vsel %vm4145_vm3, %v7829_v54, %v7817_v18 }
 0xc89   :  { %v7815_v33 = vpop.permute.xlu0 %7814 }
 0xc8a   :  { %v7832_v6 = vsel %vm4145_vm3, %v7828_v32, %v7815_v33 }
 0xc8b   :  { %9000 = vmatprep.mubr.msk.f32.mxu1 %vm60_vm0, %v7832_v6 }
 0xc8c   :  { %9001 = vmatmul.mubr.msk.f32.gmra.mxu1 %vm60_vm0, %v7833_v1 }
 0xd01   :  { %v8999_v46 = vpop.f32.mrf.mxu1 }
 0xd02   :  { %v7943_v24 = vadd.f32 %v8999_v46, %v8567_v39 }
 0xd03   :  { %v7937_v50 = vpop.f32.mrf.mxu1 }
 0xd04   :  { %v7938_v60 = vadd.f32 %v8567_v39, %v7937_v50  ;;  %v10982_v11 = vadd.f32 %v7943_v24, %v10284_v29 }
 0xd06   :  { %v10979_v19 = vadd.f32 %v7938_v60, %v10286_v10  ;;  %v7965_v51 = vsel %vm60_vm0, %v10982_v11, 0.0  ;;  %v7979_v10 = vmul.f32 %v10982_v11, %v10982_v11 }
 0xd08   :  { %v7962_v15 = vsel %vm60_vm0, %v10979_v19, 0.0  ;;  %v7978_v56 = vmul.f32 %v10979_v19, %v10979_v19  ;;  %v7985_v29 = vsel %vm60_vm0, %v7979_v10, 0.0 }
 0xd09   :  { %7963 = vadd.xlane.f32.xlu0 %v7962_v15 }
 0xd0a   :  { %v7982_v34 = vsel %vm60_vm0, %v7978_v56, 0.0 }
 0xd0b   :  { %7983 = vadd.xlane.f32.xlu1 %v7982_v34 }
 0xd0d   :  { %7966 = vadd.xlane.f32.xlu0 %v7965_v51 }
 0xd11   :  { %7986 = vadd.xlane.f32.xlu0 %v7985_v29 }
 0xd4c   :  { %v9002_v43 = vpop.f32.mrf.mxu1 }
 0xd4d   :  { %v7953_v9 = vadd.f32 %v9002_v43, %v8567_v39 }
 0xd4e   :  { %v7947_v2 = vpop.f32.mrf.mxu1 }
 0xd4f   :  { %v7948_v17 = vadd.f32 %v8567_v39, %v7947_v2  ;;  %v11020_v41 = vadd.f32 %v7953_v9, %v10298_v61  ;;  %v8287_v2 = vld [vmem:[%s11130_s5 + $0x78] sm:$0xff] }
 0xd50   :  { %9003 = vmatprep.subr.mxu1 %v8287_v2 }
 0xd51   :  { %v11023_v58 = vadd.f32 %v7948_v17, %v10300_v62  ;;  %v7981_v59 = vmul.f32 %v11020_v41, %v11020_v41  ;;  %v7971_v61 = vsel %vm60_vm0, %v11020_v41, 0.0  ;;  %9004 = vmatpush3.msra.mxu1 %v8287_v2  ;;  %v8286_v17 = vld [vmem:[%s11130_s5 + $0x70] sm:$0xff]  ;;  %v8051_v2 = vsub.s32 0, %v9460_v21 }
 0xd52   :  { %9005 = vmatprep.subr.mxu1 %v8286_v17 }
 0xd53   :  { %v7968_v63 = vsel %vm60_vm0, %v11023_v58, 0.0  ;;  %v7980_v27 = vmul.f32 %v11023_v58, %v11023_v58  ;;  %v7991_v62 = vsel %vm60_vm0, %v7981_v59, 0.0  ;;  %9006 = vmatpush3.msra.mxu1 %v8286_v17  ;;  %v8281_v59 = vld [vmem:[%s11130_s5 + $0x48] sm:$0xff] }
 0xd54   :  { %7969 = vadd.xlane.f32.xlu0 %v7968_v63  ;;  %v8285_v63 = vld [vmem:[%s11130_s5 + $0x68] sm:$0xff] }
 0xd55   :  { %v7988_v31 = vsel %vm60_vm0, %v7980_v27, 0.0  ;;  %9007 = vmatprep.subr.mxu1 %v8285_v63  ;;  %v8283_v27 = vld [vmem:[%s11130_s5 + $0x58] sm:$0xff] }
 0xd56   :  { %7989 = vadd.xlane.f32.xlu1 %v7988_v31  ;;  %9008 = vmatpush3.msra.mxu1 %v8285_v63  ;;  %v8282_v31 = vld [vmem:[%s11130_s5 + $0x50] sm:$0xff] }
 0xd58   :  { %7972 = vadd.xlane.f32.xlu0 %v7971_v61  ;;  %v8280_v61 = vld [vmem:[%s11130_s5 + $0x40] sm:$0xff] }
 0xd5a   :  { %7992 = vadd.xlane.f32.xlu1 %v7991_v62  ;;  %v8279_v62 = vld [vmem:[%s11130_s5 + $0x38] sm:$0xff] }
 0xd92   :  { %v7964_v44 = vpop.xlane.xlu0 %7963 }
 0xd93   :  { %v7974_v14 = vmul.f32 0.03125, %v7964_v44  ;;  %v8278_v44 = vld [vmem:[%s11130_s5 + $0x30] sm:$0xff] }
 0xd94   :  { %v7984_v8 = vpop.xlane.xlu1 %7983 }
 0xd95   :  { %v7998_v28 = vmul.f32 %v7974_v14, %v7974_v14  ;;  %v7994_v4 = vmul.f32 0.03125, %v7984_v8  ;;  %v8006_v53 = vsub.f32 %v10979_v19, %v7974_v14  ;;  %v8277_v14 = vld [vmem:[%s11130_s5 + $0x28] sm:$0xff]  ;;  %v8276_v8 = vld [vmem:[%s11130_s5 + $0x20] sm:$0xff] }
 0xd96   :  { %v7967_v42 = vpop.xlane.xlu0 %7966 }
 0xd97   :  { %v8002_v30 = vsub.f32 %v7994_v4, %v7998_v28  ;;  %v7975_v57 = vmul.f32 0.03125, %v7967_v42  ;;  %v8275_v28 = vld [vmem:[%s11130_s5 + $0x18] sm:$0xff]  ;;  %v8274_v4 = vld [vmem:[%s11130_s5 + $0x10] sm:$0xff]  ;;  %v8273_v42 = vld [vmem:[%s11130_s5 + $0x8] sm:$0xff] }
 0xd99   :  { %v8010_v36 = vadd.f32 1e-05, %v8002_v30  ;;  %v7999_v5 = vmul.f32 %v7975_v57, %v7975_v57  ;;  %v8007_v40 = vsub.f32 %v10982_v11, %v7975_v57  ;;  %v8272_v30 = vld [vmem:[%s11130_s5] sm:$0xff]  ;;  %v8055_v57 = vsub.s32 1, %v9460_v21 }
 0xd9a   :  { %v7987_v35 = vpop.xlane.xlu0 %7986 }
 0xd9b   :  { %9201 = vrsqrt.f32 %v8010_v36  ;;  %v7995_v49 = vmul.f32 0.03125, %v7987_v35  ;;  %v8574_v36 = vld [vmem:[%s11129_s4 + $0x40] ss:$8 sm:$0x3]  ;;  %s9310_s4 = smov [#allocation7]  }
 0xd9c   :  { %v11098_v35 = vrot.slane %v8574_v36, %v8055_v57 }
 0xd9d   :  { %v8003_v20 = vsub.f32 %v7995_v49, %v7999_v5 }
 0xd9f   :  { %v8011_v22 = vadd.f32 1e-05, %v8003_v20 }
 0xda1   :  { %9203 = vrsqrt.f32 %v8011_v22 }
 0xda8   :  { %v9202_v3 = vpop.eup %9201 }
 0xda9   :  { %v8018_v12 = vmul.f32 %v9202_v3, %v8006_v53 }
 0xdab   :  { %v8026_v0 = vmul.f32 %v8572_v52, %v8018_v12 }
 0xdad   :  { %v8034_v38 = vadd.f32 %v8573_v55, %v8026_v0 }
 0xdae   :  { %v9204_v18 = vpop.eup %9203 }
 0xdaf   :  { %8575 = vmatmul.mubr.msk.f32.vlgmr.msra.gmra.mxu0 %vm60_vm0, %v8034_v38  ;;  %v8019_v48 = vmul.f32 %v9204_v18, %v8007_v40 }
 0xdb0   :  { %8141 = vmatprep.mubr.f32.mxu0 %v9309_v16 }
 0xdb1   :  { %v8027_v32 = vmul.f32 %v8572_v52, %v8019_v48 }
 0xdb3   :  { %v8035_v33 = vadd.f32 %v8573_v55, %v8027_v32 }
 0xdb5   :  { %8576 = vmatmul.mubr.msk.f32.gmra.mxu0 %vm60_vm0, %v8035_v33 }
 0xdb6   :  { %8147 = vmatprep.mubr.f32.mxu0 %v9309_v16 }
 0xddd   :  { %v7970_v54 = vpop.xlane.xlu0 %7969 }
 0xdde   :  { %v7976_v6 = vmul.f32 0.03125, %v7970_v54 }
 0xddf   :  { %v7990_v1 = vpop.xlane.xlu1 %7989 }
 0xde0   :  { %v8000_v46 = vmul.f32 %v7976_v6, %v7976_v6  ;;  %v7996_v39 = vmul.f32 0.03125, %v7990_v1  ;;  %v8008_v26 = vsub.f32 %v11023_v58, %v7976_v6 }
 0xde1   :  { %v7973_v50 = vpop.xlane.xlu0 %7972 }
 0xde2   :  { %v8004_v24 = vsub.f32 %v7996_v39, %v8000_v46  ;;  %v7977_v60 = vmul.f32 0.03125, %v7973_v50 }
 0xde3   :  { %v7993_v15 = vpop.xlane.xlu1 %7992 }
 0xde4   :  { %v8012_v56 = vadd.f32 1e-05, %v8004_v24  ;;  %v8001_v34 = vmul.f32 %v7977_v60, %v7977_v60  ;;  %v7997_v51 = vmul.f32 0.03125, %v7993_v15  ;;  %v8009_v7 = vsub.f32 %v11020_v41, %v7977_v60 }
 0xde6   :  { %9205 = vrsqrt.f32 %v8012_v56  ;;  %v8005_v10 = vsub.f32 %v7997_v51, %v8001_v34 }
 0xde8   :  { %v8013_v29 = vadd.f32 1e-05, %v8005_v10 }
 0xdea   :  { %9207 = vrsqrt.f32 %v8013_v29 }
 0xdf3   :  { %v9206_v47 = vpop.eup %9205 }
 0xdf4   :  { %v8020_v23 = vmul.f32 %v9206_v47, %v8008_v26 }
 0xdf6   :  { %v8028_v25 = vmul.f32 %v8572_v52, %v8020_v23 }
 0xdf7   :  { %v9208_v13 = vpop.eup %9207 }
 0xdf8   :  { %v8036_v45 = vadd.f32 %v8573_v55, %v8028_v25  ;;  %v8021_v37 = vmul.f32 %v9208_v13, %v8009_v7 }
 0xdfa   :  { %8577 = vmatmul.mubr.msk.f32.gmra.mxu0 %vm60_vm0, %v8036_v45  ;;  %v8029_v43 = vmul.f32 %v8572_v52, %v8021_v37 }
 0xdfb   :  { %8153 = vmatprep.mubr.f32.mxu0 %v9309_v16  ;;  %v8284_v16 = vld [vmem:[%s11130_s5 + $0x60] sm:$0xff]  ;;  %s8391_s5 = sshll.u32 %s9310_s4, 4  ;;  %s8392_s5 = int_to_ptr.vmem [resolvable:$true] %s8391_s5 }
 0xdfc   :  { %v8037_v9 = vadd.f32 %v8573_v55, %v8029_v43  ;;  %9009 = vmatprep.subr.mxu1 %v8284_v16  ;;  %s9269_s27 = scalar_lea.vmem %s8392_s5, 512  ;;  %p9274_p11 = scmp.lt.s32.totalorder %s8392_s5, %s8392_s5 }
 0xdfd   :  { %9010 = vmatpush3.msra.mxu1 %v8284_v16  ;;  %p9270_p10 = scmp.ne.s32.totalorder %s8392_s5, %s9269_s27  ;;  %p9275_p12 = scmp.lt.s32.totalorder %s9269_s27, %s9269_s27 }
 0xdfe   :  { %8578 = vmatmul.mubr.msk.f32.gmra.mxu0 %vm60_vm0, %v8037_v9  ;;  %9011 = vmatprep.subr.mxu1 %v8283_v27 }
 0xdff   :  { %9012 = vmatpush3.msra.mxu1 %v8283_v27  ;;  %p9276_p13 = por %p9275_p12, %p9274_p11 }
 0xe00   :  { %9013 = vmatprep.subr.mxu1 %v8282_v31 }
 0xe01   :  { %9014 = vmatpush3.msra.mxu1 %v8282_v31  ;;  %p9277_p0 = pnand %p9276_p13, %p9270_p10 }
 0xe02   :  { %9015 = vmatprep.subr.mxu1 %v8281_v59 }
 0xe03   :  { %9016 = vmatpush3.msra.mxu1 %v8281_v59  ;;  %v11103_v59 = vrot.slane %v8574_v36, %v8051_v2 }
 0xe04   :  { %9017 = vmatprep.subr.mxu1 %v8280_v61 }
 0xe05   :  { %9018 = vmatpush3.msra.mxu1 %v8280_v61 }
 0xe06   :  { %9019 = vmatprep.subr.mxu1 %v8279_v62 }
 0xe07   :  { %9020 = vmatpush3.msra.mxu1 %v8279_v62 }
 0xe08   :  { %9021 = vmatprep.subr.mxu1 %v8278_v44 }
 0xe09   :  { %9022 = vmatpush3.msra.mxu1 %v8278_v44 }
 0xe0a   :  { %9023 = vmatprep.subr.mxu1 %v8277_v14 }
 0xe0b   :  { %9024 = vmatpush3.msra.mxu1 %v8277_v14 }
 0xe0c   :  { %9025 = vmatprep.subr.mxu1 %v8276_v8 }
 0xe0d   :  { %9026 = vmatpush3.msra.mxu1 %v8276_v8 }
 0xe0e   :  { %9027 = vmatprep.subr.mxu1 %v8275_v28 }
 0xe0f   :  { %9028 = vmatpush3.msra.mxu1 %v8275_v28 }
 0xe10   :  { %9029 = vmatprep.subr.mxu1 %v8274_v4 }
 0xe11   :  { %9030 = vmatpush3.msra.mxu1 %v8274_v4 }
 0xe12   :  { %9031 = vmatprep.subr.mxu1 %v8273_v42 }
 0xe13   :  { %9032 = vmatpush3.msra.mxu1 %v8273_v42 }
 0xe14   :  { %9033 = vmatprep.subr.mxu1 %v8272_v30 }
 0xe15   :  { %9034 = vmatpush3.msra.mxu1 %v8272_v30 }
 0xe6f   :  { %v8137_v5 = vpop.f32.mrf.mxu0 }
 0xe70   :  { %v8138_v28 = vadd.f32 %v8137_v5, %v11103_v59 }
 0xe71   :  { %v8139_v49 = vpop.f32.mrf.mxu0 }
 0xe72   :  { %v8140_v20 = vadd.f32 %v8139_v49, %v11098_v35 }
 0xe74   :  { %v8164_v22 = vmul.f32 0.70710677, %v8140_v20  ;;  %v8160_v44 = vmul.f32 0.5, %v8140_v20 }
 0xe75   :  { %v8143_v53 = vpop.f32.mrf.mxu0 }
 0xe76   :  { %v8168_v3 = vand.u32 2147483647, %v8164_v22  ;;  %vm8248_vm4 = vcmp.ge.f32.partialorder %v8164_v22, 0.0 }
 0xe77   :  { %v8145_v52 = vpop.f32.mrf.mxu0 }
 0xe78   :  { %v8172_v12 = vmul.f32 0.3275911, %v8168_v3  ;;  %v8146_v55 = vadd.f32 %v8145_v52, %v11098_v35  ;;  %v8224_v32 = vsub.f32 0.0, %v8168_v3 }
 0xe7a   :  { %v8176_v0 = vadd.f32 1.0, %v8172_v12  ;;  %v8165_v40 = vmul.f32 0.70710677, %v8146_v55  ;;  %v8228_v33 = vmul.f32 %v8224_v32, %v8168_v3  ;;  %v8161_v57 = vmul.f32 0.5, %v8146_v55 }
 0xe7b   :  { %v8144_v3 = vadd.f32 %v8143_v53, %v11103_v59 }
 0xe7c   :  { %9209 = vrcp.f32 %v8176_v0  ;;  %v8169_v38 = vand.u32 2147483647, %v8165_v40  ;;  %v8232_v46 = vmul.f32 1.442695, %v8228_v33  ;;  %vm8249_vm5 = vcmp.ge.f32.partialorder %v8165_v40, 0.0 }
 0xe7e   :  { %v8173_v18 = vmul.f32 0.3275911, %v8169_v38  ;;  %v8225_v54 = vsub.f32 0.0, %v8169_v38 }
 0xe80   :  { %v8177_v48 = vadd.f32 1.0, %v8173_v18  ;;  %v8229_v50 = vmul.f32 %v8225_v54, %v8169_v38 }
 0xe82   :  { %9211 = vrcp.f32 %v8177_v48  ;;  %v8234_v34 = vmul.f32 1.442695, %v8229_v50 }
 0xe83   :  { %9213 = vpow2.f32 %v8232_v46 }
 0xe84   :  { %9215 = vpow2.f32 %v8234_v34 }
 0xe89   :  { %v9210_v6 = vpop.eup %9209 }
 0xe8a   :  { %v8188_v1 = vmul.f32 1.0614054, %v9210_v6 }
 0xe8c   :  { %v8192_v39 = vadd.f32 -1.4531521, %v8188_v1 }
 0xe8e   :  { %v8196_v24 = vmul.f32 %v9210_v6, %v8192_v39 }
 0xe8f   :  { %v9212_v60 = vpop.eup %9211 }
 0xe90   :  { %v8200_v15 = vadd.f32 1.4214138, %v8196_v24  ;;  %v8189_v56 = vmul.f32 1.0614054, %v9212_v60  ;;  %v9214_v37 = vpop.eup %9213 }
 0xe91   :  { %v9216_v31 = vpop.eup %9215 }
 0xe92   :  { %v8204_v51 = vmul.f32 %v9210_v6, %v8200_v15  ;;  %v8193_v10 = vadd.f32 -1.4531521, %v8189_v56 }
 0xe94   :  { %v8208_v29 = vadd.f32 -0.28449672, %v8204_v51  ;;  %v8197_v26 = vmul.f32 %v9212_v60, %v8193_v10 }
 0xe96   :  { %v8212_v47 = vmul.f32 %v9210_v6, %v8208_v29  ;;  %v8201_v23 = vadd.f32 1.4214138, %v8197_v26 }
 0xe98   :  { %v8216_v7 = vadd.f32 0.2548296, %v8212_v47  ;;  %v8205_v25 = vmul.f32 %v9212_v60, %v8201_v23 }
 0xe9a   :  { %v8220_v13 = vmul.f32 %v9210_v6, %v8216_v7  ;;  %v8209_v45 = vadd.f32 -0.28449672, %v8205_v25 }
 0xe9c   :  { %v8240_v43 = vmul.f32 %v9214_v37, %v8220_v13  ;;  %v8213_v9 = vmul.f32 %v9212_v60, %v8209_v45 }
 0xe9e   :  { %v8244_v17 = vsub.f32 1.0, %v8240_v43  ;;  %v8217_v63 = vadd.f32 0.2548296, %v8213_v9 }
 0xea0   :  { %v8252_v16 = vsub.f32 0.0, %v8244_v17  ;;  %v8221_v27 = vmul.f32 %v9212_v60, %v8217_v63 }
 0xea2   :  { %v8256_v61 = vsel %vm8248_vm4, %v8244_v17, %v8252_v16  ;;  %v8241_v62 = vmul.f32 %v9216_v31, %v8221_v27 }
 0xea3   :  { %v8260_v14 = vadd.f32 1.0, %v8256_v61 }
 0xea4   :  { %v8245_v8 = vsub.f32 1.0, %v8241_v62 }
 0xea5   :  { %v8264_v4 = vmul.f32 %v8260_v14, %v8160_v44 }
 0xea6   :  { %v8253_v42 = vsub.f32 0.0, %v8245_v8 }
 0xea7   :  { %v8268_v30 = vmul.f32 %v8264_v4, %v8138_v28 }
 0xea8   :  { %v8257_v21 = vsel %vm8249_vm5, %v8245_v8, %v8253_v42 }
 0xea9   :  { %v8261_v49 = vadd.f32 1.0, %v8257_v21  ;;  %9035 = vmatprep.mubr.f32.mxu1 %v8268_v30 }
 0xeab   :  { %v8265_v36 = vmul.f32 %v8261_v49, %v8161_v57 }
 0xead   :  { %v8269_v52 = vmul.f32 %v8265_v36, %v8144_v3 }
 0xeaf   :  { %9036 = vmatmul.mubr.f32.vlgmr.msra.gmra.mxu1 %v8269_v52 }
 0xeba   :  { %v8149_v22 = vpop.f32.mrf.mxu0 }
 0xebb   :  { %v8150_v42 = vadd.f32 %v8149_v22, %v11103_v59 }
 0xebc   :  { %v8151_v12 = vpop.f32.mrf.mxu0 }
 0xebd   :  { %v8152_v20 = vadd.f32 %v8151_v12, %v11098_v35 }
 0xebe   :  { %v8155_v0 = vpop.f32.mrf.mxu0 }
 0xebf   :  { %v8166_v38 = vmul.f32 0.70710677, %v8152_v20  ;;  %v8162_v8 = vmul.f32 0.5, %v8152_v20  ;;  %v8156_v36 = vadd.f32 %v8155_v0, %v11103_v59 }
 0xec0   :  { %v8157_v5 = vpop.f32.mrf.mxu0 }
 0xec1   :  { %v8170_v18 = vand.u32 2147483647, %v8166_v38  ;;  %v8158_v40 = vadd.f32 %v8157_v5, %v11098_v35  ;;  %vm8250_vm6 = vcmp.ge.f32.partialorder %v8166_v38, 0.0  ;;  %v8579_v38 = vld [vmem:[#allocation5 + $0x8] ss:$0 sm:$0xff] }
 0xec3   :  { %v8174_v48 = vmul.f32 0.3275911, %v8170_v18  ;;  %v8167_v32 = vmul.f32 0.70710677, %v8158_v40  ;;  %v8226_v6 = vsub.f32 0.0, %v8170_v18  ;;  %v8163_v57 = vmul.f32 0.5, %v8158_v40 }
 0xec5   :  { %v8178_v55 = vadd.f32 1.0, %v8174_v48  ;;  %v8171_v33 = vand.u32 2147483647, %v8167_v32  ;;  %v8230_v1 = vmul.f32 %v8226_v6, %v8170_v18  ;;  %vm8251_vm7 = vcmp.ge.f32.partialorder %v8167_v32, 0.0 }
 0xec7   :  { %9217 = vrcp.f32 %v8178_v55  ;;  %v8175_v54 = vmul.f32 0.3275911, %v8171_v33  ;;  %v8227_v46 = vsub.f32 0.0, %v8171_v33  ;;  %v8236_v24 = vmul.f32 1.442695, %v8230_v1 }
 0xec9   :  { %v8179_v53 = vadd.f32 1.0, %v8175_v54  ;;  %v8231_v60 = vmul.f32 %v8227_v46, %v8171_v33 }
 0xecb   :  { %9219 = vrcp.f32 %v8179_v53  ;;  %v8238_v51 = vmul.f32 1.442695, %v8231_v60 }
 0xecc   :  { %9221 = vpow2.f32 %v8236_v24 }
 0xecd   :  { %9223 = vpow2.f32 %v8238_v51 }
 0xed4   :  { %v9218_v39 = vpop.eup %9217 }
 0xed5   :  { %v8190_v50 = vmul.f32 1.0614054, %v9218_v39 }
 0xed7   :  { %v8194_v15 = vadd.f32 -1.4531521, %v8190_v50 }
 0xed8   :  { %v9220_v56 = vpop.eup %9219 }
 0xed9   :  { %v8198_v34 = vmul.f32 %v9218_v39, %v8194_v15  ;;  %v8191_v35 = vmul.f32 1.0614054, %v9220_v56  ;;  %v9222_v2 = vpop.eup %9221 }
 0xeda   :  { %v9224_v31 = vpop.eup %9223 }
 0xedb   :  { %v8202_v10 = vadd.f32 1.4214138, %v8198_v34  ;;  %v8195_v29 = vadd.f32 -1.4531521, %v8191_v35 }
 0xedd   :  { %v8206_v26 = vmul.f32 %v9218_v39, %v8202_v10  ;;  %v8199_v47 = vmul.f32 %v9220_v56, %v8195_v29 }
 0xedf   :  { %v8210_v23 = vadd.f32 -0.28449672, %v8206_v26  ;;  %v8203_v7 = vadd.f32 1.4214138, %v8199_v47 }
 0xee1   :  { %v8214_v25 = vmul.f32 %v9218_v39, %v8210_v23  ;;  %v8207_v13 = vmul.f32 %v9220_v56, %v8203_v7 }
 0xee3   :  { %v8218_v45 = vadd.f32 0.2548296, %v8214_v25  ;;  %v8211_v37 = vadd.f32 -0.28449672, %v8207_v13 }
 0xee5   :  { %v8222_v43 = vmul.f32 %v9218_v39, %v8218_v45  ;;  %v8215_v9 = vmul.f32 %v9220_v56, %v8211_v37 }
 0xee7   :  { %v8242_v17 = vmul.f32 %v9222_v2, %v8222_v43  ;;  %v8219_v63 = vadd.f32 0.2548296, %v8215_v9 }
 0xee9   :  { %v8246_v16 = vsub.f32 1.0, %v8242_v17  ;;  %v8223_v27 = vmul.f32 %v9220_v56, %v8219_v63 }
 0xeeb   :  { %v8254_v61 = vsub.f32 0.0, %v8246_v16  ;;  %v8243_v62 = vmul.f32 %v9224_v31, %v8223_v27 }
 0xeed   :  { %v8258_v44 = vsel %vm8250_vm6, %v8246_v16, %v8254_v61  ;;  %v8247_v14 = vsub.f32 1.0, %v8243_v62 }
 0xeee   :  { %v8262_v28 = vadd.f32 1.0, %v8258_v44 }
 0xeef   :  { %v8255_v4 = vsub.f32 0.0, %v8247_v14 }
 0xef0   :  { %v8266_v30 = vmul.f32 %v8262_v28, %v8162_v8 }
 0xef1   :  { %v8259_v21 = vsel %vm8251_vm7, %v8247_v14, %v8255_v4 }
 0xef2   :  { %v8263_v49 = vadd.f32 1.0, %v8259_v21  ;;  %v8270_v3 = vmul.f32 %v8266_v30, %v8150_v42 }
 0xef4   :  { %v8267_v52 = vmul.f32 %v8263_v49, %v8163_v57  ;;  %9038 = vmatprep.mubr.f32.mxu1 %v8270_v3 }
 0xef6   :  { %v8271_v12 = vmul.f32 %v8267_v52, %v8156_v36 }
 0xef8   :  { %9039 = vmatmul.mubr.f32.gmra.mxu1 %v8271_v12 }
 0xf6f   :  { %v9037_v5 = vpop.f32.mrf.mxu1 }
 0xf70   :  { %v8365_v18 = vadd.f32 %v9037_v5, %v8579_v38 }
 0xf71   :  { %v8359_v20 = vpop.f32.mrf.mxu1 }
 0xf72   :  { %v8379_v48 = vadd.f32 %v8365_v18, %v10982_v11  ;;  %v8360_v55 = vadd.f32 %v8579_v38, %v8359_v20 }
 0xf74   :  { %8383 = vst.msk [vmem:[#allocation7 + $0x8] sm:$0xff] %vm60_vm0, %v8379_v48  ;;  %v8378_v22 = vadd.f32 %v8360_v55, %v10979_v19 }
 0xf76   :  { %8382 = vst.msk [vmem:[#allocation7] sm:$0xff] %vm60_vm0, %v8378_v22 }
 0xfb8   :  { %v9040_v40 = vpop.f32.mrf.mxu1 }
 0xfb9   :  { %v8375_v32 = vadd.f32 %v9040_v40, %v8579_v38 }
 0xfba   :  { %v8369_v59 = vpop.f32.mrf.mxu1 }
 0xfbb   :  { %v8381_v0 = vadd.f32 %v8375_v32, %v11020_v41  ;;  %v8370_v33 = vadd.f32 %v8579_v38, %v8369_v59 }
 0xfbd   :  { %8385 = vst.msk [vmem:[#allocation7 + $0x18] sm:$0xff] %vm60_vm0, %v8381_v0  ;;  %v8380_v54 = vadd.f32 %v8370_v33, %v11023_v58 }
 0xfbf   :  { %8384 = vst.msk [vmem:[#allocation7 + $0x10] sm:$0xff] %vm60_vm0, %v8380_v54 }
 0xfc0   :  { %9280 = shalt.err (!%p9277_p0)
}
 0xfc1   :  { %8397 = dma.vmem_to_hbm [thread:$0]  %s8392_s5, 512, %s11131_s6, [#allocation4], %s9296_s24, %s9296_s24, %s9297_s25  }
 0xfc2   :  { %9293 = dma.done.wait [#allocation4], 512  }
 0xfc3   :  { %9294 = vsyncadd [#allocation4], 4294966784 }
 0xfc4   :  { %8401 = vsyncpa [#allocation3], 1 }
 0xfc5   :  { %8402 = vsyncpa [#allocation6], 1 }
 0xfc6   :  { %8403 = vsyncpa [#allocation4], 1 }

</bundles_post_ra>
